<compile_context>
chip_gen: v5e
topology: v5e:2x2
jax: 0.10.0
libtpu: 0.0.40
codegen_flags: <defaults>
</compile_context>

<pallas_src>
import functools

import jax
import jax.numpy as jnp
from jax import lax
from jax.experimental import pallas as pl
from jax.experimental.pallas import tpu as pltpu


# ----------------------------------------------------------------------------
# Fused 3x3 same-conv + bias + ReLU + 2x2/2 max-pool (one image per grid step)
# ----------------------------------------------------------------------------
def _conv_relu_pool_kernel(x_ref, w_ref, b_ref, o_ref, *, H, W, Cin, Cout):
    """
    x_ref : (1, H+2, W+2, Cin) f32   spatially pre-padded NHWC input block
    w_ref : (9*Cin, Cout)      bf16  HWIO weights flattened (dh, dw, cin)-major
    b_ref : (1, Cout)          f32
    o_ref : (1, H//2, (W//2)*Cout) f32  pooled output, lane-dense last dim
    """
    # --- im2col: build one (H*W, 9*Cin) patch matrix -> a single big-K MXU matmul ---
    taps = [x_ref[0, pl.ds(dh, H), pl.ds(dw, W), :]           # (H, W, Cin) shifted views
            for dh in range(3) for dw in range(3)]
    patches = jnp.concatenate(taps, axis=-1)                  # (H, W, 9*Cin)
    patches = patches.reshape(H * W, 9 * Cin).astype(jnp.bfloat16)

    acc = jnp.dot(patches, w_ref[...],                        # bf16 x bf16 -> f32 acc
                  preferred_element_type=jnp.float32)         # (H*W, Cout)
    acc = jnp.maximum(acc + b_ref[...], 0.0)                  # bias + ReLU (f32)

    # --- 2x2/2 max pool, fully in-register (no scratch, no strided loads) ----------
    a = acc.reshape(H // 2, 2 * W, Cout)                      # rows h=2i | h=2i+1
    m = jnp.maximum(a[:, :W, :], a[:, W:, :])                 # pool over H -> (H//2, W, Cout)
    cols = [jnp.maximum(m[:, 2 * w2, :], m[:, 2 * w2 + 1, :])  # pool over W
            for w2 in range(W // 2)]                           # each (H//2, Cout)
    # concatenate along lanes -> (H//2, (W//2)*Cout): full-width unmasked stores
    o_ref[0] = jnp.concatenate(cols, axis=-1).astype(o_ref.dtype)


def conv_relu_pool(x_nhwc, w_hwio, b):
    """x_nhwc: (N, H, W, Cin) f32 -> pooled (N, H//2, W//2, Cout) f32."""
    N, H, W, Cin = x_nhwc.shape
    Cout = w_hwio.shape[-1]
    assert H % 2 == 0 and W % 2 == 0 and W % 8 == 0

    # 'same' padding once in the wrapper (see TODO at top about in-kernel halos).
    x_pad = jnp.pad(x_nhwc, ((0, 0), (1, 1), (1, 1), (0, 0))).astype(jnp.float32)
    w2d = w_hwio.reshape(9 * Cin, Cout).astype(jnp.bfloat16)  # (dh, dw, cin)-major rows
    b2 = b.reshape(1, Cout).astype(jnp.float32)

    kern = functools.partial(_conv_relu_pool_kernel, H=H, W=W, Cin=Cin, Cout=Cout)
    out = pl.pallas_call(
        kern,
        out_shape=jax.ShapeDtypeStruct((N, H // 2, (W // 2) * Cout), jnp.float32),
        grid=(N,),
        in_specs=[
            pl.BlockSpec((1, H + 2, W + 2, Cin), lambda n: (n, 0, 0, 0)),
            pl.BlockSpec((9 * Cin, Cout), lambda n: (0, 0)),
            pl.BlockSpec((1, Cout), lambda n: (0, 0)),
        ],
        out_specs=pl.BlockSpec((1, H // 2, (W // 2) * Cout), lambda n: (n, 0, 0)),
        compiler_params=pltpu.CompilerParams(
            dimension_semantics=("parallel",)),     # batch axis -> shards over v7x's 2 TCs
    )(x_pad, w2d, b2)
    return out.reshape(N, H // 2, W // 2, Cout)


# ----------------------------------------------------------------------------
# Fused fc1 + ReLU + fc2 head, K-tiled over the flattened-feature axis
# ----------------------------------------------------------------------------
def _mlp_kernel(x_ref, w1_ref, b1_ref, w2_ref, b2_ref, o_ref, acc_ref):
    k = pl.program_id(0)

    @pl.when(k == 0)
    def _():
        acc_ref[...] = jnp.zeros_like(acc_ref)

    acc_ref[...] += jnp.dot(x_ref[...], w1_ref[...],
                            preferred_element_type=jnp.float32)

    @pl.when(k == pl.num_programs(0) - 1)
    def _():
        h = jnp.maximum(acc_ref[...] + b1_ref[...], 0.0).astype(w2_ref.dtype)
        o_ref[...] = (jnp.dot(h, w2_ref[...], preferred_element_type=jnp.float32)
                      + b2_ref[...]).astype(o_ref.dtype)


def mlp_head(x, w1_io, b1, w2_io, b2, *, tk=512):
    """x: (N, F) -> (N, Do). fc1 weight streamed in (tk, Dh) tiles: never whole in VMEM."""
    N, F = x.shape
    Dh = w1_io.shape[1]
    Do = w2_io.shape[1]
    if F % tk != 0:
        tk = F                                    # fall back: single K step
    dh_pad = ((Dh + 127) // 128) * 128            # 300 -> 384: lane-friendly hidden
    do_pad = ((Do + 127) // 128) * 128            # 4 -> 128: lane-dense logits store

    # zero-padding hidden/output dims is numerically exact (relu(0)=0, zero w2 rows)
    w1p = jnp.pad(w1_io, ((0, 0), (0, dh_pad - Dh))).astype(jnp.bfloat16)
    b1p = jnp.pad(b1, (0, dh_pad - Dh)).reshape(1, dh_pad).astype(jnp.float32)
    w2p = jnp.pad(w2_io, ((0, dh_pad - Dh), (0, do_pad - Do))).astype(jnp.bfloat16)
    b2p = jnp.pad(b2, (0, do_pad - Do)).reshape(1, do_pad).astype(jnp.float32)

    out = pl.pallas_call(
        _mlp_kernel,
        out_shape=jax.ShapeDtypeStruct((N, do_pad), jnp.float32),
        grid=(F // tk,),
        in_specs=[
            pl.BlockSpec((N, tk), lambda k: (0, k)),
            pl.BlockSpec((tk, dh_pad), lambda k: (k, 0)),
            pl.BlockSpec((1, dh_pad), lambda k: (0, 0)),
            pl.BlockSpec((dh_pad, do_pad), lambda k: (0, 0)),
            pl.BlockSpec((1, do_pad), lambda k: (0, 0)),
        ],
        out_specs=pl.BlockSpec((N, do_pad), lambda k: (0, 0)),
        scratch_shapes=[pltpu.VMEM((N, dh_pad), jnp.float32)],
        compiler_params=pltpu.CompilerParams(
            dimension_semantics=("arbitrary",)),   # K is a reduction axis
    )(x.astype(jnp.bfloat16), w1p, b1p, w2p, b2p)
    return out[:, :Do]


# ----------------------------------------------------------------------------
# Parameters (PyTorch layouts) + full forward
# ----------------------------------------------------------------------------
def init_params(key, hw):
    """Shapes mirror the nn.Module __init__ (PyTorch layouts: OIHW conv, (out,in) linear)."""
    H, W = hw
    F = 64 * (H // 4) * (W // 4)          # original module: 64*56*56 (i.e. H=W=224)
    ks = jax.random.split(key, 8)

    def nrm(k, shape, scale):
        return (scale * jax.random.normal(k, shape)).astype(jnp.float32)

    return {
        "conv1_w": nrm(ks[0], (32, 3, 3, 3), 0.10),
        "conv1_b": nrm(ks[1], (32,), 0.10),
        "conv2_w": nrm(ks[2], (64, 32, 3, 3), 0.05),
        "conv2_b": nrm(ks[3], (64,), 0.05),
        "fc1_w":   nrm(ks[4], (300, F), 0.02),
        "fc1_b":   nrm(ks[5], (300,), 0.02),
        "fc2_w":   nrm(ks[6], (4, 300), 0.05),
        "fc2_b":   nrm(ks[7], (4,), 0.05),
    }


def simple_cnn_forward(x_nchw, params):
    # NCHW -> NHWC (channels live on the TPU lane dim)
    x = jnp.transpose(x_nchw, (0, 2, 3, 1)).astype(jnp.float32)

    # conv weights OIHW -> HWIO; pad conv1 input channels 3 -> 8 with zeros so the
    # im2col contraction dim is sublane-aligned (zeros contribute nothing).
    w1 = jnp.transpose(params["conv1_w"], (2, 3, 1, 0))              # (3,3,3,32)
    cpad = 8 - w1.shape[2]
    w1 = jnp.pad(w1, ((0, 0), (0, 0), (0, cpad), (0, 0)))
    x = jnp.pad(x, ((0, 0), (0, 0), (0, 0), (0, cpad)))
    w2 = jnp.transpose(params["conv2_w"], (2, 3, 1, 0))              # (3,3,32,64)

    y1 = conv_relu_pool(x, w1, params["conv1_b"])                    # (N, H/2, W/2, 32)
    y2 = conv_relu_pool(y1, w2, params["conv2_b"])                   # (N, H/4, W/4, 64)

    # flatten in NCHW order to match torch's x.view(B, -1)
    feat = jnp.transpose(y2, (0, 3, 1, 2)).reshape(y2.shape[0], -1)  # (N, 64*(H/4)*(W/4))

    return mlp_head(feat,
                    params["fc1_w"].T, params["fc1_b"],
                    params["fc2_w"].T, params["fc2_b"])


# ----------------------------------------------------------------------------
# Pure-JAX reference (mirrors the PyTorch forward) for a sanity check
# ----------------------------------------------------------------------------
def reference_forward(x_nchw, p):
    with jax.default_matmul_precision("highest"):
        def conv(x, w_oihw, b):
            y = lax.conv_general_dilated(
                x, w_oihw, window_strides=(1, 1), padding=((1, 1), (1, 1)),
                dimension_numbers=("NCHW", "OIHW", "NCHW"))
            return y + b[None, :, None, None]

        def pool(x):
            return lax.reduce_window(x, -jnp.inf, lax.max,
                                     (1, 1, 2, 2), (1, 1, 2, 2), "VALID")

        x = pool(jax.nn.relu(conv(x_nchw, p["conv1_w"], p["conv1_b"])))
        x = pool(jax.nn.relu(conv(x, p["conv2_w"], p["conv2_b"])))
        x = x.reshape(x.shape[0], -1)
        x = jax.nn.relu(x @ p["fc1_w"].T + p["fc1_b"])
        return x @ p["fc2_w"].T + p["fc2_b"]


if __name__ == "__main__":
    N, C, H, W = 2, 3, 16, 16        # small stand-in for the module's 3x224x224 input
    key = jax.random.PRNGKey(0)
    kx, kp = jax.random.split(key)
    x = jax.random.normal(kx, (N, C, H, W), dtype=jnp.float32)
    params = init_params(kp, (H, W))

    fwd = jax.jit(simple_cnn_forward)
    out = jax.block_until_ready(fwd(x, params))
    ref = jax.block_until_ready(reference_forward(x, params))

    assert out.shape == (N, 4), out.shape
    assert bool(jnp.all(jnp.isfinite(out)))
    # bf16 MXU inputs (f32 accumulation) vs. the pure-f32 reference
    assert bool(jnp.allclose(out, ref, rtol=3e-2, atol=3e-2)), (out, ref)

    print("KERNEL_OK")
</pallas_src>

<mosaic_0001>
module attributes {stable_mosaic.version = 11 : i64} {
  func.func @_conv_relu_pool_kernel(%arg0: i32, %arg1: memref<1x18x18x8xf32, #tpu.memory_space<vmem>>, %arg2: memref<72x32xbf16, #tpu.memory_space<vmem>>, %arg3: memref<1x32xf32, #tpu.memory_space<vmem>>, %arg4: memref<1x8x256xf32, #tpu.memory_space<vmem>>) attributes {dimension_semantics = [#tpu.dimension_semantics<parallel>], iteration_bounds = array<i64: 2>, scalar_prefetch = 0 : i64, scratch_operands = 0 : i64, tpu.core_type = #tpu.core_type<tc>, window_params = [{transform_indices = @transform_0, window_bounds = array<i64: 1, 18, 18, 8>}, {pipeline_mode = #tpu.pipeline_mode<synchronous>, transform_indices = @transform_1, window_bounds = array<i64: 72, 32>}, {pipeline_mode = #tpu.pipeline_mode<synchronous>, transform_indices = @transform_2, window_bounds = array<i64: 1, 32>}, {transform_indices = @transform_3, window_bounds = array<i64: 1, 8, 256>}]} {
    %c0 = arith.constant 0 : index
    %c0_0 = arith.constant 0 : index
    %c0_1 = arith.constant 0 : index
    %c0_2 = arith.constant 0 : index
    %0 = vector.load %arg1[%c0, %c0_0, %c0_1, %c0_2] : memref<1x18x18x8xf32, #tpu.memory_space<vmem>>, vector<1x16x16x8xf32>
    %1 = vector.shape_cast %0 : vector<1x16x16x8xf32> to vector<16x16x8xf32>
    %c0_3 = arith.constant 0 : index
    %c0_4 = arith.constant 0 : index
    %c1 = arith.constant 1 : index
    %c0_5 = arith.constant 0 : index
    %2 = vector.load %arg1[%c0_3, %c0_4, %c1, %c0_5] : memref<1x18x18x8xf32, #tpu.memory_space<vmem>>, vector<1x16x16x8xf32>
    %3 = vector.shape_cast %2 : vector<1x16x16x8xf32> to vector<16x16x8xf32>
    %c0_6 = arith.constant 0 : index
    %c0_7 = arith.constant 0 : index
    %c2 = arith.constant 2 : index
    %c0_8 = arith.constant 0 : index
    %4 = vector.load %arg1[%c0_6, %c0_7, %c2, %c0_8] : memref<1x18x18x8xf32, #tpu.memory_space<vmem>>, vector<1x16x16x8xf32>
    %5 = vector.shape_cast %4 : vector<1x16x16x8xf32> to vector<16x16x8xf32>
    %c0_9 = arith.constant 0 : index
    %c1_10 = arith.constant 1 : index
    %c0_11 = arith.constant 0 : index
    %c0_12 = arith.constant 0 : index
    %6 = vector.load %arg1[%c0_9, %c1_10, %c0_11, %c0_12] : memref<1x18x18x8xf32, #tpu.memory_space<vmem>>, vector<1x16x16x8xf32>
    %7 = vector.shape_cast %6 : vector<1x16x16x8xf32> to vector<16x16x8xf32>
    %c0_13 = arith.constant 0 : index
    %c1_14 = arith.constant 1 : index
    %c1_15 = arith.constant 1 : index
    %c0_16 = arith.constant 0 : index
    %8 = vector.load %arg1[%c0_13, %c1_14, %c1_15, %c0_16] : memref<1x18x18x8xf32, #tpu.memory_space<vmem>>, vector<1x16x16x8xf32>
    %9 = vector.shape_cast %8 : vector<1x16x16x8xf32> to vector<16x16x8xf32>
    %c0_17 = arith.constant 0 : index
    %c1_18 = arith.constant 1 : index
    %c2_19 = arith.constant 2 : index
    %c0_20 = arith.constant 0 : index
    %10 = vector.load %arg1[%c0_17, %c1_18, %c2_19, %c0_20] : memref<1x18x18x8xf32, #tpu.memory_space<vmem>>, vector<1x16x16x8xf32>
    %11 = vector.shape_cast %10 : vector<1x16x16x8xf32> to vector<16x16x8xf32>
    %c0_21 = arith.constant 0 : index
    %c2_22 = arith.constant 2 : index
    %c0_23 = arith.constant 0 : index
    %c0_24 = arith.constant 0 : index
    %12 = vector.load %arg1[%c0_21, %c2_22, %c0_23, %c0_24] : memref<1x18x18x8xf32, #tpu.memory_space<vmem>>, vector<1x16x16x8xf32>
    %13 = vector.shape_cast %12 : vector<1x16x16x8xf32> to vector<16x16x8xf32>
    %c0_25 = arith.constant 0 : index
    %c2_26 = arith.constant 2 : index
    %c1_27 = arith.constant 1 : index
    %c0_28 = arith.constant 0 : index
    %14 = vector.load %arg1[%c0_25, %c2_26, %c1_27, %c0_28] : memref<1x18x18x8xf32, #tpu.memory_space<vmem>>, vector<1x16x16x8xf32>
    %15 = vector.shape_cast %14 : vector<1x16x16x8xf32> to vector<16x16x8xf32>
    %c0_29 = arith.constant 0 : index
    %c2_30 = arith.constant 2 : index
    %c2_31 = arith.constant 2 : index
    %c0_32 = arith.constant 0 : index
    %16 = vector.load %arg1[%c0_29, %c2_30, %c2_31, %c0_32] : memref<1x18x18x8xf32, #tpu.memory_space<vmem>>, vector<1x16x16x8xf32>
    %17 = vector.shape_cast %16 : vector<1x16x16x8xf32> to vector<16x16x8xf32>
    %18 = tpu.concatenate %1, %3, %5, %7, %9, %11, %13, %15, %17 in 2 : vector<16x16x8xf32>, vector<16x16x8xf32>, vector<16x16x8xf32>, vector<16x16x8xf32>, vector<16x16x8xf32>, vector<16x16x8xf32>, vector<16x16x8xf32>, vector<16x16x8xf32>, vector<16x16x8xf32> -> vector<16x16x72xf32>
    %19 = vector.shape_cast %18 : vector<16x16x72xf32> to vector<256x72xf32>
    %20 = arith.truncf %19 : vector<256x72xf32> to vector<256x72xbf16>
    %c0_33 = arith.constant 0 : index
    %c0_34 = arith.constant 0 : index
    %21 = vector.load %arg2[%c0_33, %c0_34] : memref<72x32xbf16, #tpu.memory_space<vmem>>, vector<72x32xbf16>
    %cst = arith.constant dense<0.000000e+00> : vector<256x32xf32>
    %22 = tpu.matmul %20, %21, %cst {dimension_numbers = #tpu.dot_dimension_numbers<[1], [0], [0], [1], [0, 0, 1, 1], [], []>} : vector<256x72xbf16>, vector<72x32xbf16>, vector<256x32xf32> -> vector<256x32xf32>
    %c0_35 = arith.constant 0 : index
    %c0_36 = arith.constant 0 : index
    %23 = vector.load %arg3[%c0_35, %c0_36] : memref<1x32xf32, #tpu.memory_space<vmem>>, vector<1x32xf32>
    %24 = vector.broadcast %23 : vector<1x32xf32> to vector<256x32xf32>
    %25 = arith.addf %22, %24 : vector<256x32xf32>
    %cst_37 = arith.constant 0.000000e+00 : f32
    %26 = vector.broadcast %cst_37 : f32 to vector<256x32xf32>
    %27 = arith.maximumf %25, %26 : vector<256x32xf32>
    %28 = vector.shape_cast %27 : vector<256x32xf32> to vector<8x32x32xf32>
    %29 = vector.extract_strided_slice %28 {offsets = [0, 0, 0], sizes = [8, 16, 32], strides = [1, 1, 1]} : vector<8x32x32xf32> to vector<8x16x32xf32>
    %30 = vector.extract_strided_slice %28 {offsets = [0, 16, 0], sizes = [8, 16, 32], strides = [1, 1, 1]} : vector<8x32x32xf32> to vector<8x16x32xf32>
    %31 = arith.maximumf %29, %30 : vector<8x16x32xf32>
    %32 = vector.extract_strided_slice %31 {offsets = [0, 0, 0], sizes = [8, 1, 32], strides = [1, 1, 1]} : vector<8x16x32xf32> to vector<8x1x32xf32>
    %33 = vector.shape_cast %32 : vector<8x1x32xf32> to vector<8x32xf32>
    %34 = vector.extract_strided_slice %31 {offsets = [0, 1, 0], sizes = [8, 1, 32], strides = [1, 1, 1]} : vector<8x16x32xf32> to vector<8x1x32xf32>
    %35 = vector.shape_cast %34 : vector<8x1x32xf32> to vector<8x32xf32>
    %36 = arith.maximumf %33, %35 : vector<8x32xf32>
    %37 = vector.extract_strided_slice %31 {offsets = [0, 2, 0], sizes = [8, 1, 32], strides = [1, 1, 1]} : vector<8x16x32xf32> to vector<8x1x32xf32>
    %38 = vector.shape_cast %37 : vector<8x1x32xf32> to vector<8x32xf32>
    %39 = vector.extract_strided_slice %31 {offsets = [0, 3, 0], sizes = [8, 1, 32], strides = [1, 1, 1]} : vector<8x16x32xf32> to vector<8x1x32xf32>
    %40 = vector.shape_cast %39 : vector<8x1x32xf32> to vector<8x32xf32>
    %41 = arith.maximumf %38, %40 : vector<8x32xf32>
    %42 = vector.extract_strided_slice %31 {offsets = [0, 4, 0], sizes = [8, 1, 32], strides = [1, 1, 1]} : vector<8x16x32xf32> to vector<8x1x32xf32>
    %43 = vector.shape_cast %42 : vector<8x1x32xf32> to vector<8x32xf32>
    %44 = vector.extract_strided_slice %31 {offsets = [0, 5, 0], sizes = [8, 1, 32], strides = [1, 1, 1]} : vector<8x16x32xf32> to vector<8x1x32xf32>
    %45 = vector.shape_cast %44 : vector<8x1x32xf32> to vector<8x32xf32>
    %46 = arith.maximumf %43, %45 : vector<8x32xf32>
    %47 = vector.extract_strided_slice %31 {offsets = [0, 6, 0], sizes = [8, 1, 32], strides = [1, 1, 1]} : vector<8x16x32xf32> to vector<8x1x32xf32>
    %48 = vector.shape_cast %47 : vector<8x1x32xf32> to vector<8x32xf32>
    %49 = vector.extract_strided_slice %31 {offsets = [0, 7, 0], sizes = [8, 1, 32], strides = [1, 1, 1]} : vector<8x16x32xf32> to vector<8x1x32xf32>
    %50 = vector.shape_cast %49 : vector<8x1x32xf32> to vector<8x32xf32>
    %51 = arith.maximumf %48, %50 : vector<8x32xf32>
    %52 = vector.extract_strided_slice %31 {offsets = [0, 8, 0], sizes = [8, 1, 32], strides = [1, 1, 1]} : vector<8x16x32xf32> to vector<8x1x32xf32>
    %53 = vector.shape_cast %52 : vector<8x1x32xf32> to vector<8x32xf32>
    %54 = vector.extract_strided_slice %31 {offsets = [0, 9, 0], sizes = [8, 1, 32], strides = [1, 1, 1]} : vector<8x16x32xf32> to vector<8x1x32xf32>
    %55 = vector.shape_cast %54 : vector<8x1x32xf32> to vector<8x32xf32>
    %56 = arith.maximumf %53, %55 : vector<8x32xf32>
    %57 = vector.extract_strided_slice %31 {offsets = [0, 10, 0], sizes = [8, 1, 32], strides = [1, 1, 1]} : vector<8x16x32xf32> to vector<8x1x32xf32>
    %58 = vector.shape_cast %57 : vector<8x1x32xf32> to vector<8x32xf32>
    %59 = vector.extract_strided_slice %31 {offsets = [0, 11, 0], sizes = [8, 1, 32], strides = [1, 1, 1]} : vector<8x16x32xf32> to vector<8x1x32xf32>
    %60 = vector.shape_cast %59 : vector<8x1x32xf32> to vector<8x32xf32>
    %61 = arith.maximumf %58, %60 : vector<8x32xf32>
    %62 = vector.extract_strided_slice %31 {offsets = [0, 12, 0], sizes = [8, 1, 32], strides = [1, 1, 1]} : vector<8x16x32xf32> to vector<8x1x32xf32>
    %63 = vector.shape_cast %62 : vector<8x1x32xf32> to vector<8x32xf32>
    %64 = vector.extract_strided_slice %31 {offsets = [0, 13, 0], sizes = [8, 1, 32], strides = [1, 1, 1]} : vector<8x16x32xf32> to vector<8x1x32xf32>
    %65 = vector.shape_cast %64 : vector<8x1x32xf32> to vector<8x32xf32>
    %66 = arith.maximumf %63, %65 : vector<8x32xf32>
    %67 = vector.extract_strided_slice %31 {offsets = [0, 14, 0], sizes = [8, 1, 32], strides = [1, 1, 1]} : vector<8x16x32xf32> to vector<8x1x32xf32>
    %68 = vector.shape_cast %67 : vector<8x1x32xf32> to vector<8x32xf32>
    %69 = vector.extract_strided_slice %31 {offsets = [0, 15, 0], sizes = [8, 1, 32], strides = [1, 1, 1]} : vector<8x16x32xf32> to vector<8x1x32xf32>
    %70 = vector.shape_cast %69 : vector<8x1x32xf32> to vector<8x32xf32>
    %71 = arith.maximumf %68, %70 : vector<8x32xf32>
    %72 = tpu.concatenate %36, %41, %46, %51, %56, %61, %66, %71 in 1 : vector<8x32xf32>, vector<8x32xf32>, vector<8x32xf32>, vector<8x32xf32>, vector<8x32xf32>, vector<8x32xf32>, vector<8x32xf32>, vector<8x32xf32> -> vector<8x256xf32>
    %c0_38 = arith.constant 0 : index
    %c0_39 = arith.constant 0 : index
    %c0_40 = arith.constant 0 : index
    %73 = vector.load %arg4[%c0_38, %c0_39, %c0_40] : memref<1x8x256xf32, #tpu.memory_space<vmem>>, vector<1x8x256xf32>
    %74 = vector.shape_cast %73 : vector<1x8x256xf32> to vector<8x256xf32>
    %75 = vector.shape_cast %72 : vector<8x256xf32> to vector<1x8x256xf32>
    tpu.vector_store %arg4[%c0_38, %c0_39, %c0_40], %75 {strides = array<i32>} : memref<1x8x256xf32, #tpu.memory_space<vmem>>, vector<1x8x256xf32>,
    return
  }
  func.func @transform_0(%arg0: i32) -> (i32, i32, i32, i32) {
    %c0_i32 = arith.constant 0 : i32
    %c0_i32_0 = arith.constant 0 : i32
    %c0_i32_1 = arith.constant 0 : i32
    %c0_i32_2 = arith.constant 0 : i32
    return %arg0, %c0_i32, %c0_i32_0, %c0_i32_1 : i32, i32, i32, i32
  }
  func.func @transform_1(%arg0: i32) -> (i32, i32) {
    %c0_i32 = arith.constant 0 : i32
    %c0_i32_0 = arith.constant 0 : i32
    %c0_i32_1 = arith.constant 0 : i32
    return %c0_i32, %c0_i32_0 : i32, i32
  }
  func.func @transform_2(%arg0: i32) -> (i32, i32) {
    %c0_i32 = arith.constant 0 : i32
    %c0_i32_0 = arith.constant 0 : i32
    %c0_i32_1 = arith.constant 0 : i32
    return %c0_i32, %c0_i32_0 : i32, i32
  }
  func.func @transform_3(%arg0: i32) -> (i32, i32, i32) {
    %c0_i32 = arith.constant 0 : i32
    %c0_i32_0 = arith.constant 0 : i32
    %c0_i32_1 = arith.constant 0 : i32
    return %arg0, %c0_i32, %c0_i32_0 : i32, i32, i32
  }
}

module attributes {stable_mosaic.version = 11 : i64} {
  func.func @_conv_relu_pool_kernel(%arg0: i32, %arg1: memref<1x10x10x32xf32, #tpu.memory_space<vmem>>, %arg2: memref<288x64xbf16, #tpu.memory_space<vmem>>, %arg3: memref<1x64xf32, #tpu.memory_space<vmem>>, %arg4: memref<1x4x256xf32, #tpu.memory_space<vmem>>) attributes {dimension_semantics = [#tpu.dimension_semantics<parallel>], iteration_bounds = array<i64: 2>, scalar_prefetch = 0 : i64, scratch_operands = 0 : i64, tpu.core_type = #tpu.core_type<tc>, window_params = [{transform_indices = @transform_0, window_bounds = array<i64: 1, 10, 10, 32>}, {pipeline_mode = #tpu.pipeline_mode<synchronous>, transform_indices = @transform_1, window_bounds = array<i64: 288, 64>}, {pipeline_mode = #tpu.pipeline_mode<synchronous>, transform_indices = @transform_2, window_bounds = array<i64: 1, 64>}, {transform_indices = @transform_3, window_bounds = array<i64: 1, 4, 256>}]} {
    %c0 = arith.constant 0 : index
    %c0_0 = arith.constant 0 : index
    %c0_1 = arith.constant 0 : index
    %c0_2 = arith.constant 0 : index
    %0 = vector.load %arg1[%c0, %c0_0, %c0_1, %c0_2] : memref<1x10x10x32xf32, #tpu.memory_space<vmem>>, vector<1x8x8x32xf32>
    %1 = vector.shape_cast %0 : vector<1x8x8x32xf32> to vector<8x8x32xf32>
    %c0_3 = arith.constant 0 : index
    %c0_4 = arith.constant 0 : index
    %c1 = arith.constant 1 : index
    %c0_5 = arith.constant 0 : index
    %2 = vector.load %arg1[%c0_3, %c0_4, %c1, %c0_5] : memref<1x10x10x32xf32, #tpu.memory_space<vmem>>, vector<1x8x8x32xf32>
    %3 = vector.shape_cast %2 : vector<1x8x8x32xf32> to vector<8x8x32xf32>
    %c0_6 = arith.constant 0 : index
    %c0_7 = arith.constant 0 : index
    %c2 = arith.constant 2 : index
    %c0_8 = arith.constant 0 : index
    %4 = vector.load %arg1[%c0_6, %c0_7, %c2, %c0_8] : memref<1x10x10x32xf32, #tpu.memory_space<vmem>>, vector<1x8x8x32xf32>
    %5 = vector.shape_cast %4 : vector<1x8x8x32xf32> to vector<8x8x32xf32>
    %c0_9 = arith.constant 0 : index
    %c1_10 = arith.constant 1 : index
    %c0_11 = arith.constant 0 : index
    %c0_12 = arith.constant 0 : index
    %6 = vector.load %arg1[%c0_9, %c1_10, %c0_11, %c0_12] : memref<1x10x10x32xf32, #tpu.memory_space<vmem>>, vector<1x8x8x32xf32>
    %7 = vector.shape_cast %6 : vector<1x8x8x32xf32> to vector<8x8x32xf32>
    %c0_13 = arith.constant 0 : index
    %c1_14 = arith.constant 1 : index
    %c1_15 = arith.constant 1 : index
    %c0_16 = arith.constant 0 : index
    %8 = vector.load %arg1[%c0_13, %c1_14, %c1_15, %c0_16] : memref<1x10x10x32xf32, #tpu.memory_space<vmem>>, vector<1x8x8x32xf32>
    %9 = vector.shape_cast %8 : vector<1x8x8x32xf32> to vector<8x8x32xf32>
    %c0_17 = arith.constant 0 : index
    %c1_18 = arith.constant 1 : index
    %c2_19 = arith.constant 2 : index
    %c0_20 = arith.constant 0 : index
    %10 = vector.load %arg1[%c0_17, %c1_18, %c2_19, %c0_20] : memref<1x10x10x32xf32, #tpu.memory_space<vmem>>, vector<1x8x8x32xf32>
    %11 = vector.shape_cast %10 : vector<1x8x8x32xf32> to vector<8x8x32xf32>
    %c0_21 = arith.constant 0 : index
    %c2_22 = arith.constant 2 : index
    %c0_23 = arith.constant 0 : index
    %c0_24 = arith.constant 0 : index
    %12 = vector.load %arg1[%c0_21, %c2_22, %c0_23, %c0_24] : memref<1x10x10x32xf32, #tpu.memory_space<vmem>>, vector<1x8x8x32xf32>
    %13 = vector.shape_cast %12 : vector<1x8x8x32xf32> to vector<8x8x32xf32>
    %c0_25 = arith.constant 0 : index
    %c2_26 = arith.constant 2 : index
    %c1_27 = arith.constant 1 : index
    %c0_28 = arith.constant 0 : index
    %14 = vector.load %arg1[%c0_25, %c2_26, %c1_27, %c0_28] : memref<1x10x10x32xf32, #tpu.memory_space<vmem>>, vector<1x8x8x32xf32>
    %15 = vector.shape_cast %14 : vector<1x8x8x32xf32> to vector<8x8x32xf32>
    %c0_29 = arith.constant 0 : index
    %c2_30 = arith.constant 2 : index
    %c2_31 = arith.constant 2 : index
    %c0_32 = arith.constant 0 : index
    %16 = vector.load %arg1[%c0_29, %c2_30, %c2_31, %c0_32] : memref<1x10x10x32xf32, #tpu.memory_space<vmem>>, vector<1x8x8x32xf32>
    %17 = vector.shape_cast %16 : vector<1x8x8x32xf32> to vector<8x8x32xf32>
    %18 = tpu.concatenate %1, %3, %5, %7, %9, %11, %13, %15, %17 in 2 : vector<8x8x32xf32>, vector<8x8x32xf32>, vector<8x8x32xf32>, vector<8x8x32xf32>, vector<8x8x32xf32>, vector<8x8x32xf32>, vector<8x8x32xf32>, vector<8x8x32xf32>, vector<8x8x32xf32> -> vector<8x8x288xf32>
    %19 = vector.shape_cast %18 : vector<8x8x288xf32> to vector<64x288xf32>
    %20 = arith.truncf %19 : vector<64x288xf32> to vector<64x288xbf16>
    %c0_33 = arith.constant 0 : index
    %c0_34 = arith.constant 0 : index
    %21 = vector.load %arg2[%c0_33, %c0_34] : memref<288x64xbf16, #tpu.memory_space<vmem>>, vector<288x64xbf16>
    %cst = arith.constant dense<0.000000e+00> : vector<64x64xf32>
    %22 = tpu.matmul %20, %21, %cst {dimension_numbers = #tpu.dot_dimension_numbers<[1], [0], [0], [1], [0, 0, 1, 1], [], []>} : vector<64x288xbf16>, vector<288x64xbf16>, vector<64x64xf32> -> vector<64x64xf32>
    %c0_35 = arith.constant 0 : index
    %c0_36 = arith.constant 0 : index
    %23 = vector.load %arg3[%c0_35, %c0_36] : memref<1x64xf32, #tpu.memory_space<vmem>>, vector<1x64xf32>
    %24 = vector.broadcast %23 : vector<1x64xf32> to vector<64x64xf32>
    %25 = arith.addf %22, %24 : vector<64x64xf32>
    %cst_37 = arith.constant 0.000000e+00 : f32
    %26 = vector.broadcast %cst_37 : f32 to vector<64x64xf32>
    %27 = arith.maximumf %25, %26 : vector<64x64xf32>
    %28 = vector.shape_cast %27 : vector<64x64xf32> to vector<4x16x64xf32>
    %29 = vector.extract_strided_slice %28 {offsets = [0, 0, 0], sizes = [4, 8, 64], strides = [1, 1, 1]} : vector<4x16x64xf32> to vector<4x8x64xf32>
    %30 = vector.extract_strided_slice %28 {offsets = [0, 8, 0], sizes = [4, 8, 64], strides = [1, 1, 1]} : vector<4x16x64xf32> to vector<4x8x64xf32>
    %31 = arith.maximumf %29, %30 : vector<4x8x64xf32>
    %32 = vector.extract_strided_slice %31 {offsets = [0, 0, 0], sizes = [4, 1, 64], strides = [1, 1, 1]} : vector<4x8x64xf32> to vector<4x1x64xf32>
    %33 = vector.shape_cast %32 : vector<4x1x64xf32> to vector<4x64xf32>
    %34 = vector.extract_strided_slice %31 {offsets = [0, 1, 0], sizes = [4, 1, 64], strides = [1, 1, 1]} : vector<4x8x64xf32> to vector<4x1x64xf32>
    %35 = vector.shape_cast %34 : vector<4x1x64xf32> to vector<4x64xf32>
    %36 = arith.maximumf %33, %35 : vector<4x64xf32>
    %37 = vector.extract_strided_slice %31 {offsets = [0, 2, 0], sizes = [4, 1, 64], strides = [1, 1, 1]} : vector<4x8x64xf32> to vector<4x1x64xf32>
    %38 = vector.shape_cast %37 : vector<4x1x64xf32> to vector<4x64xf32>
    %39 = vector.extract_strided_slice %31 {offsets = [0, 3, 0], sizes = [4, 1, 64], strides = [1, 1, 1]} : vector<4x8x64xf32> to vector<4x1x64xf32>
    %40 = vector.shape_cast %39 : vector<4x1x64xf32> to vector<4x64xf32>
    %41 = arith.maximumf %38, %40 : vector<4x64xf32>
    %42 = vector.extract_strided_slice %31 {offsets = [0, 4, 0], sizes = [4, 1, 64], strides = [1, 1, 1]} : vector<4x8x64xf32> to vector<4x1x64xf32>
    %43 = vector.shape_cast %42 : vector<4x1x64xf32> to vector<4x64xf32>
    %44 = vector.extract_strided_slice %31 {offsets = [0, 5, 0], sizes = [4, 1, 64], strides = [1, 1, 1]} : vector<4x8x64xf32> to vector<4x1x64xf32>
    %45 = vector.shape_cast %44 : vector<4x1x64xf32> to vector<4x64xf32>
    %46 = arith.maximumf %43, %45 : vector<4x64xf32>
    %47 = vector.extract_strided_slice %31 {offsets = [0, 6, 0], sizes = [4, 1, 64], strides = [1, 1, 1]} : vector<4x8x64xf32> to vector<4x1x64xf32>
    %48 = vector.shape_cast %47 : vector<4x1x64xf32> to vector<4x64xf32>
    %49 = vector.extract_strided_slice %31 {offsets = [0, 7, 0], sizes = [4, 1, 64], strides = [1, 1, 1]} : vector<4x8x64xf32> to vector<4x1x64xf32>
    %50 = vector.shape_cast %49 : vector<4x1x64xf32> to vector<4x64xf32>
    %51 = arith.maximumf %48, %50 : vector<4x64xf32>
    %52 = tpu.concatenate %36, %41, %46, %51 in 1 : vector<4x64xf32>, vector<4x64xf32>, vector<4x64xf32>, vector<4x64xf32> -> vector<4x256xf32>
    %c0_38 = arith.constant 0 : index
    %c0_39 = arith.constant 0 : index
    %c0_40 = arith.constant 0 : index
    %53 = vector.load %arg4[%c0_38, %c0_39, %c0_40] : memref<1x4x256xf32, #tpu.memory_space<vmem>>, vector<1x4x256xf32>
    %54 = vector.shape_cast %53 : vector<1x4x256xf32> to vector<4x256xf32>
    %55 = vector.shape_cast %52 : vector<4x256xf32> to vector<1x4x256xf32>
    tpu.vector_store %arg4[%c0_38, %c0_39, %c0_40], %55 {strides = array<i32>} : memref<1x4x256xf32, #tpu.memory_space<vmem>>, vector<1x4x256xf32>,
    return
  }
  func.func @transform_0(%arg0: i32) -> (i32, i32, i32, i32) {
    %c0_i32 = arith.constant 0 : i32
    %c0_i32_0 = arith.constant 0 : i32
    %c0_i32_1 = arith.constant 0 : i32
    %c0_i32_2 = arith.constant 0 : i32
    return %arg0, %c0_i32, %c0_i32_0, %c0_i32_1 : i32, i32, i32, i32
  }
  func.func @transform_1(%arg0: i32) -> (i32, i32) {
    %c0_i32 = arith.constant 0 : i32
    %c0_i32_0 = arith.constant 0 : i32
    %c0_i32_1 = arith.constant 0 : i32
    return %c0_i32, %c0_i32_0 : i32, i32
  }
  func.func @transform_2(%arg0: i32) -> (i32, i32) {
    %c0_i32 = arith.constant 0 : i32
    %c0_i32_0 = arith.constant 0 : i32
    %c0_i32_1 = arith.constant 0 : i32
    return %c0_i32, %c0_i32_0 : i32, i32
  }
  func.func @transform_3(%arg0: i32) -> (i32, i32, i32) {
    %c0_i32 = arith.constant 0 : i32
    %c0_i32_0 = arith.constant 0 : i32
    %c0_i32_1 = arith.constant 0 : i32
    return %arg0, %c0_i32, %c0_i32_0 : i32, i32, i32
  }
}

module attributes {stable_mosaic.version = 11 : i64} {
  func.func @_mlp_kernel(%arg0: i32, %arg1: memref<2x512xbf16, #tpu.memory_space<vmem>>, %arg2: memref<512x384xbf16, #tpu.memory_space<vmem>>, %arg3: memref<1x384xf32, #tpu.memory_space<vmem>>, %arg4: memref<384x128xbf16, #tpu.memory_space<vmem>>, %arg5: memref<1x128xf32, #tpu.memory_space<vmem>>, %arg6: memref<2x128xf32, #tpu.memory_space<vmem>>, %arg7: memref<2x384xf32, #tpu.memory_space<vmem>>) attributes {dimension_semantics = [#tpu.dimension_semantics<arbitrary>], iteration_bounds = array<i64: 2>, scalar_prefetch = 0 : i64, scratch_operands = 1 : i64, tpu.core_type = #tpu.core_type<tc>, window_params = [{transform_indices = @transform_0, window_bounds = array<i64: 2, 512>}, {transform_indices = @transform_1, window_bounds = array<i64: 512, 384>}, {pipeline_mode = #tpu.pipeline_mode<synchronous>, transform_indices = @transform_2, window_bounds = array<i64: 1, 384>}, {pipeline_mode = #tpu.pipeline_mode<synchronous>, transform_indices = @transform_3, window_bounds = array<i64: 384, 128>}, {pipeline_mode = #tpu.pipeline_mode<synchronous>, transform_indices = @transform_4, window_bounds = array<i64: 1, 128>}, {pipeline_mode = #tpu.pipeline_mode<synchronous>, transform_indices = @transform_5, window_bounds = array<i64: 2, 128>}]} {
    %c0_i32 = arith.constant 0 : i32
    %0 = arith.cmpi eq, %arg0, %c0_i32 : i32
    %1 = arith.extui %0 : i1 to i32
    %c0_i32_0 = arith.constant 0 : i32
    %2 = arith.cmpi ne, %1, %c0_i32_0 : i32
    scf.if %2 {
      %cst_9 = arith.constant 0.000000e+00 : f32
      %12 = vector.broadcast %cst_9 : f32 to vector<2x384xf32>
      %c0_10 = arith.constant 0 : index
      %c0_11 = arith.constant 0 : index
      %13 = vector.load %arg7[%c0_10, %c0_11] : memref<2x384xf32, #tpu.memory_space<vmem>>, vector<2x384xf32>
      tpu.vector_store %arg7[%c0_10, %c0_11], %12 {strides = array<i32>} : memref<2x384xf32, #tpu.memory_space<vmem>>, vector<2x384xf32>,
    } else {
    }
    %c0 = arith.constant 0 : index
    %c0_1 = arith.constant 0 : index
    %3 = vector.load %arg7[%c0, %c0_1] : memref<2x384xf32, #tpu.memory_space<vmem>>, vector<2x384xf32>
    %c0_2 = arith.constant 0 : index
    %c0_3 = arith.constant 0 : index
    %4 = vector.load %arg1[%c0_2, %c0_3] : memref<2x512xbf16, #tpu.memory_space<vmem>>, vector<2x512xbf16>
    %c0_4 = arith.constant 0 : index
    %c0_5 = arith.constant 0 : index
    %5 = vector.load %arg2[%c0_4, %c0_5] : memref<512x384xbf16, #tpu.memory_space<vmem>>, vector<512x384xbf16>
    %cst = arith.constant dense<0.000000e+00> : vector<2x384xf32>
    %6 = tpu.matmul %4, %5, %cst {dimension_numbers = #tpu.dot_dimension_numbers<[1], [0], [0], [1], [0, 0, 1, 1], [], []>} : vector<2x512xbf16>, vector<512x384xbf16>, vector<2x384xf32> -> vector<2x384xf32>
    %7 = arith.addf %3, %6 : vector<2x384xf32>
    %c0_6 = arith.constant 0 : index
    %c0_7 = arith.constant 0 : index
    %8 = vector.load %arg7[%c0_6, %c0_7] : memref<2x384xf32, #tpu.memory_space<vmem>>, vector<2x384xf32>
    tpu.vector_store %arg7[%c0_6, %c0_7], %7 {strides = array<i32>} : memref<2x384xf32, #tpu.memory_space<vmem>>, vector<2x384xf32>,
    %c1_i32 = arith.constant 1 : i32
    %9 = arith.cmpi eq, %arg0, %c1_i32 : i32
    %10 = arith.extui %9 : i1 to i32
    %c0_i32_8 = arith.constant 0 : i32
    %11 = arith.cmpi ne, %10, %c0_i32_8 : i32
    scf.if %11 {
      %c0_9 = arith.constant 0 : index
      %c0_10 = arith.constant 0 : index
      %12 = vector.load %arg7[%c0_9, %c0_10] : memref<2x384xf32, #tpu.memory_space<vmem>>, vector<2x384xf32>
      %c0_11 = arith.constant 0 : index
      %c0_12 = arith.constant 0 : index
      %13 = vector.load %arg3[%c0_11, %c0_12] : memref<1x384xf32, #tpu.memory_space<vmem>>, vector<1x384xf32>
      %14 = vector.broadcast %13 : vector<1x384xf32> to vector<2x384xf32>
      %15 = arith.addf %12, %14 : vector<2x384xf32>
      %cst_13 = arith.constant 0.000000e+00 : f32
      %16 = vector.broadcast %cst_13 : f32 to vector<2x384xf32>
      %17 = arith.maximumf %15, %16 : vector<2x384xf32>
      %18 = arith.truncf %17 : vector<2x384xf32> to vector<2x384xbf16>
      %c0_14 = arith.constant 0 : index
      %c0_15 = arith.constant 0 : index
      %19 = vector.load %arg4[%c0_14, %c0_15] : memref<384x128xbf16, #tpu.memory_space<vmem>>, vector<384x128xbf16>
      %cst_16 = arith.constant dense<0.000000e+00> : vector<2x128xf32>
      %20 = tpu.matmul %18, %19, %cst_16 {dimension_numbers = #tpu.dot_dimension_numbers<[1], [0], [0], [1], [0, 0, 1, 1], [], []>} : vector<2x384xbf16>, vector<384x128xbf16>, vector<2x128xf32> -> vector<2x128xf32>
      %c0_17 = arith.constant 0 : index
      %c0_18 = arith.constant 0 : index
      %21 = vector.load %arg5[%c0_17, %c0_18] : memref<1x128xf32, #tpu.memory_space<vmem>>, vector<1x128xf32>
      %22 = vector.broadcast %21 : vector<1x128xf32> to vector<2x128xf32>
      %23 = arith.addf %20, %22 : vector<2x128xf32>
      %c0_19 = arith.constant 0 : index
      %c0_20 = arith.constant 0 : index
      %24 = vector.load %arg6[%c0_19, %c0_20] : memref<2x128xf32, #tpu.memory_space<vmem>>, vector<2x128xf32>
      tpu.vector_store %arg6[%c0_19, %c0_20], %23 {strides = array<i32>} : memref<2x128xf32, #tpu.memory_space<vmem>>, vector<2x128xf32>,
    } else {
    }
    return
  }
  func.func @transform_0(%arg0: i32) -> (i32, i32) {
    %c0_i32 = arith.constant 0 : i32
    %c0_i32_0 = arith.constant 0 : i32
    return %c0_i32, %arg0 : i32, i32
  }
  func.func @transform_1(%arg0: i32) -> (i32, i32) {
    %c0_i32 = arith.constant 0 : i32
    %c0_i32_0 = arith.constant 0 : i32
    return %arg0, %c0_i32 : i32, i32
  }
  func.func @transform_2(%arg0: i32) -> (i32, i32) {
    %c0_i32 = arith.constant 0 : i32
    %c0_i32_0 = arith.constant 0 : i32
    %c0_i32_1 = arith.constant 0 : i32
    return %c0_i32, %c0_i32_0 : i32, i32
  }
  func.func @transform_3(%arg0: i32) -> (i32, i32) {
    %c0_i32 = arith.constant 0 : i32
    %c0_i32_0 = arith.constant 0 : i32
    %c0_i32_1 = arith.constant 0 : i32
    return %c0_i32, %c0_i32_0 : i32, i32
  }
  func.func @transform_4(%arg0: i32) -> (i32, i32) {
    %c0_i32 = arith.constant 0 : i32
    %c0_i32_0 = arith.constant 0 : i32
    %c0_i32_1 = arith.constant 0 : i32
    return %c0_i32, %c0_i32_0 : i32, i32
  }
  func.func @transform_5(%arg0: i32) -> (i32, i32) {
    %c0_i32 = arith.constant 0 : i32
    %c0_i32_0 = arith.constant 0 : i32
    %c0_i32_1 = arith.constant 0 : i32
    return %c0_i32, %c0_i32_0 : i32, i32
  }
}

</mosaic_0001>

<bundles_post_ra>
// kernel: simple_cnn_forward.4
= control target key start
LH: loop header
LB: loop body
LE: loop exit
PB: predicated region body
PF: predicated region fallthrough
CT: control target
= control target key end

     0   :  { %s1214_s12 = smov 0   ;;  %s1532_s0 = inlined_call_operand.vmem [shape: f32[2,10,10,32], index: 0, kind: input, shape index: {}]   ;;  %s1533_s1 = inlined_call_operand.vmem [shape: bf16[288,64], index: 1, kind: input, shape index: {}]   ;;  %s1534_s2 = inlined_call_operand.vmem [shape: f32[1,64], index: 2, kind: input, shape index: {}]   ;;  %s1535_s3 = inlined_call_operand.vmem [shape: f32[2,4,256], index: 3, kind: output, shape index: {}]  }
   0x1 LB: > { %s881_s13 = sadd.s32 4294967295, %s1189_s12   ;;  %p885_p0 = scmp.ge.s32.totalorder %s1189_s12, 1  ;;  %s1189_s12 = sphi %s1214_s12, %s13_s12  }
   0x2   : > { %p137_p1 = scmp.lt.s32.totalorder %s1189_s12, 3 }
   0x4   : > { %p138_p2 = pnand %p885_p0, %p137_p1 }
   0x5   : > { %p161_p3 = scmp.lt.s32.totalorder (!%p138_p2), %s881_s13, 1  ;;  %s1191_s18 = smov (!%p138_p2), 96  }
   0x6   : > { %141 = sbr.rel (%p138_p2) target bundleno = 466 (0x1d2), region = 32  ;;  %s1192_s19 = smov (!%p138_p2), 32  }
   0x7   : > { %s1193_s20 = smov (!%p138_p2), 64  }
   0xb   : > { %s1537_s13 = smov (!%p161_p3, %s881_s13), 1  ;;  %v1023_v32 = vld [vmem:[%s1533_s1 + $0x38] sm:$0xff]  ;;  %v1022_v35 = vld [vmem:[%s1533_s1 + $0x30] sm:$0xff]  ;;  %v1033_v37 = vld [vmem:[%s1533_s1 + $0x88] sm:$0xff]  ;;  %vm438_vm0 = vcmask 261120   ;;  %vm447_vm1 = vcmask 523264  }
   0xc   : > { %s1050_s14 = smul.u32 160, %s1537_s13  ;;  %v1326_v33 = vld [vmem:[%s1533_s1 + $0x78] sm:$0xff]  ;;  %1034 = vmatpush.bf16.msra.mxu3 %v1023_v32  ;;  %v1337_v36 = vld [vmem:[%s1533_s1 + $0x70] sm:$0xff]  ;;  %661 = vmatpush.bf16.msra.mxu0 %v1023_v32  ;;  %v1032_v40 = vld [vmem:[%s1533_s1 + $0x80] sm:$0xff]  ;;  %vm456_vm2 = vcmask 785408   ;;  %vm781_vm3 = vcmask 1041409  }
   0xd   : > { %1042 = vmatpush.bf16.msra.mxu1 %v1326_v33  ;;  %725 = vmatpush.bf16.msra.mxu2 %v1033_v37  ;;  %v1021_v43 = vld [vmem:[%s1533_s1 + $0x28] sm:$0xff]  ;;  %v1020_v46 = vld [vmem:[%s1533_s1 + $0x20] sm:$0xff]  ;;  %v1019_v50 = vld [vmem:[%s1533_s1 + $0x18] sm:$0xff]  ;;  %vm784_vm4 = vcmask 1042434   ;;  %vm787_vm5 = vcmask 1043459   ;;  %s1015_s8 = sshll.u32 %s1537_s13, 3 }
   0xe   : > { %s1228_s17 = scalar_lea.vmem %s1532_s0, %s1050_s14  ;;  %v1029_v44 = vld [vmem:[%s1533_s1 + $0x68] sm:$0xff]  ;;  %v1028_v47 = vld [vmem:[%s1533_s1 + $0x60] sm:$0xff]  ;;  %v1027_v60 = vld [vmem:[%s1533_s1 + $0x58] sm:$0xff]  ;;  %vm822_vm6 = vcmask 1043456   ;;  %s170_s11 = scalar_lea.vmem %s1535_s3, %s1015_s8 }
   0xf   : > { %v1231_v0 = vld [vmem:[%s1228_s17 + $0x30] sm:$0xff]  ;;  %v1234_v1 = vld [vmem:[%s1228_s17 + $0x40] sm:$0xff] }
  0x10   : > { %v1237_v2 = vld [vmem:[%s1228_s17 + $0x21] sm:$0xff]  ;;  %v1072_v3 = vpack.i.bf16 %v1234_v1, %v1231_v0  ;;  %v1242_v4 = vld [vmem:[%s1228_s17 + $0x31] sm:$0xff]  ;;  %1035 = vmatpush.bf16.msra.mxu3 %v1022_v35  ;;  %662 = vmatpush.bf16.msra.mxu0 %v1022_v35 }
  0x11   : > { %v1246_v5 = vpack.i.bf16 %v1242_v4, %v1237_v2  ;;  %v1252_v6 = vld [vmem:[%s1228_s17 + $0x32] sm:$0xff]  ;;  %v1255_v7 = vld [vmem:[%s1228_s17 + $0x42] sm:$0xff]  ;;  %1043 = vmatpush.bf16.msra.mxu1 %v1337_v36  ;;  %726 = vmatpush.bf16.msra.mxu2 %v1032_v40 }
  0x12   : > { %1073 = vrot.lane.b32.xlu1 %v1072_v3, %s1191_s18  ;;  %v1258_v8 = vld [vmem:[%s1228_s17 + $0x50] sm:$0xff]  ;;  %v1261_v9 = vld [vmem:[%s1228_s17 + $0x22] sm:$0xff]  ;;  %v1077_v11 = vpack.i.bf16 %v1255_v7, %v1252_v6 }
  0x13   : > { %1063 = vrot.lane.b32.xlu0 %v1246_v5, %s1192_s19  ;;  %v1082_v10 = vpack.i.bf16 %v1258_v8, %v1234_v1  ;;  %v1067_v12 = vpack.i.bf16 %v1252_v6, %v1261_v9  ;;  %v1271_v13 = vld [vmem:[%s1228_s17 + $0x41] sm:$0xff]  ;;  %v1274_v14 = vld [vmem:[%s1228_s17 + $0x51] sm:$0xff]  ;;  %v491_v61 = vpack.c.bf16 %v1252_v6, %v1261_v9 }
  0x14   : > { %v1279_v15 = vld [vmem:[%s1228_s17 + $0x52] sm:$0xff]  ;;  %v1092_v16 = vpack.i.bf16 %v1274_v14, %v1271_v13  ;;  %v1287_v18 = vld [vmem:[%s1228_s17 + $0x60] sm:$0xff]  ;;  %1036 = vmatpush.bf16.msra.mxu3 %v1021_v43  ;;  %663 = vmatpush.bf16.msra.mxu0 %v1021_v43  ;;  %v1017_v3 = vld [vmem:[%s1533_s1 + $0x8] sm:$0xff] }
  0x15   : > { %1083 = vrot.lane.b32.xlu2 %v1082_v10, %s1193_s20  ;;  %v1097_v17 = vpack.i.bf16 %v1279_v15, %v1255_v7  ;;  %v1102_v19 = vpack.i.bf16 %v1287_v18, %v1258_v8  ;;  %v188_v20 = vld [vmem:[%s1228_s17 + $0x2] sm:$0xff]  ;;  %v189_v21 = vld [vmem:[%s1228_s17 + $0x12] sm:$0xff]  ;;  %1044 = vmatpush.bf16.msra.mxu1 %v1029_v44 }
  0x16   : > { %v180_v22 = vld [vmem:[%s1228_s17 + $0x1] sm:$0xff]  ;;  %v1297_v23 = vld [vmem:[%s1228_s17 + $0x11] sm:$0xff]  ;;  %v1112_v24 = vpack.i.bf16 %v189_v21, %v188_v20  ;;  %v1152_v52 = vpack.i.bf16 %v1261_v9, %v189_v21  ;;  %1009 = vmatmul.msk.bf16.vlgmr.msra.gmra.mxu2 %vm438_vm0, %v491_v61 }
  0x17   : > { %v1107_v25 = vpack.i.bf16 %v1297_v23, %v180_v22  ;;  %v1302_v26 = vld [vmem:[%s1228_s17 + $0x20] sm:$0xff]  ;;  %v1305_v27 = vld [vmem:[%s1228_s17 + $0x10] sm:$0xff] }
  0x18   : > { %v1117_v28 = vpack.i.bf16 %v1302_v26, %v1305_v27  ;;  %v1312_v29 = vld [vmem:[%s1228_s17 + $0x70] sm:$0xff]  ;;  %v1315_v30 = vld [vmem:[%s1228_s17 + $0x62] sm:$0xff]  ;;  %1037 = vmatpush.bf16.msra.mxu3 %v1020_v46  ;;  %664 = vmatpush.bf16.msra.mxu0 %v1020_v46  ;;  %v1157_v51 = vpack.i.bf16 %v1231_v0, %v1302_v26 }
  0x19   : > { %v1127_v31 = vpack.i.bf16 %v1312_v29, %v1287_v18  ;;  %v1122_v34 = vpack.i.bf16 %v1315_v30, %v1279_v15  ;;  %v1343_v38 = vld [vmem:[%s1228_s17 + $0x61] sm:$0xff]  ;;  %v1346_v39 = vld [vmem:[%s1228_s17 + $0x71] sm:$0xff]  ;;  %1045 = vmatpush.bf16.msra.mxu1 %v1028_v47 }
  0x1a   : > { %1078 = vrot.lane.b32.xlu1 %v1077_v11, %s1192_s19  ;;  %v1354_v41 = vld [vmem:[%s1228_s17 + $0x72] sm:$0xff]  ;;  %v1137_v42 = vpack.i.bf16 %v1346_v39, %v1343_v38  ;;  %v919_v48 = vld [vmem:[%s1228_s17 + $0x80] sm:$0xff]  ;;  %v494_v11 = vpack.c.bf16 %v1279_v15, %v1255_v7 }
  0x1b   : > { %1068 = vrot.lane.b32.xlu0 %v1067_v12, %s1193_s20  ;;  %v1142_v45 = vpack.i.bf16 %v1354_v41, %v1315_v30  ;;  %v1147_v49 = vpack.i.bf16 %v919_v48, %v1312_v29  ;;  %v1386_v53 = vld [vmem:[%s1228_s17 + $0x82] sm:$0xff]  ;;  %v920_v55 = vld [vmem:[%s1228_s17 + $0x90] sm:$0xff]  ;;  %v497_v20 = vpack.c.bf16 %v1354_v41, %v1315_v30 }
  0x1c   : > { %1038 = vmatpush.bf16.msra.mxu3 %v1019_v50  ;;  %665 = vmatpush.bf16.msra.mxu0 %v1019_v50  ;;  %v1162_v54 = vpack.i.bf16 %v1386_v53, %v1354_v41  ;;  %v1172_v56 = vpack.i.bf16 %v920_v55, %v919_v48  ;;  %v1395_v57 = vld [vmem:[%s1228_s17 + $0x81] sm:$0xff]  ;;  %v928_v58 = vld [vmem:[%s1228_s17 + $0x91] sm:$0xff] }
  0x1d   : > { %1088 = vrot.lane.b32.xlu2 %v1092_v16, %s1191_s18  ;;  %v1177_v59 = vpack.i.bf16 %v928_v58, %v1395_v57  ;;  %1046 = vmatpush.bf16.msra.mxu1 %v1027_v60  ;;  %v1018_v62 = vld [vmem:[%s1533_s1 + $0x10] sm:$0xff]  ;;  %v1016_v6 = vld [vmem:[%s1533_s1] sm:$0xff] }
  0x1e   : > { %v1026_v63 = vld [vmem:[%s1533_s1 + $0x50] sm:$0xff]  ;;  %v1024_v9 = vld [vmem:[%s1533_s1 + $0x40] sm:$0xff] }
  0x1f   : > { %v936_v55 = vld [vmem:[%s1228_s17 + $0x92] sm:$0xff] }
  0x20   : > { %1039 = vmatpush.bf16.msra.mxu3 %v1018_v62  ;;  %666 = vmatpush.bf16.msra.mxu0 %v1018_v62 }
  0x21   : > { %1047 = vmatpush.bf16.msra.mxu1 %v1026_v63 }
  0x22   : > { %1098 = vrot.lane.b32.xlu1 %v1097_v17, %s1193_s20 }
  0x23   : > { %1093 = vrot.lane.b32.xlu0 %v1092_v16, %s1192_s19 }
  0x24   : > { %1040 = vmatpush.bf16.msra.mxu3 %v1017_v3  ;;  %667 = vmatpush.bf16.msra.mxu0 %v1017_v3 }
  0x25   : > { %1103 = vrot.lane.b32.xlu2 %v1102_v19, %s1191_s18 }
  0x26   : > { %1010 = vmatmul.msk.bf16.gmra.mxu2 %vm438_vm0, %v494_v11 }
  0x28   : > { %1041 = vmatpush.bf16.msra.mxu3 %v1016_v6  ;;  %668 = vmatpush.bf16.msra.mxu0 %v1016_v6 }
  0x2a   : > { %1113 = vrot.lane.b32.xlu1 %v1112_v24, %s1193_s20 }
  0x2b   : > { %1108 = vrot.lane.b32.xlu0 %v1107_v25, %s1192_s19 }
  0x2c   : > { %690 = vmatpush.bf16.msrb.mxu0 %v1326_v33 }
  0x2d   : > { %1118 = vrot.lane.b32.xlu2 %v1117_v28, %s1191_s18 }
  0x30   : > { %691 = vmatpush.bf16.msrb.mxu0 %v1337_v36 }
  0x32   : > { %1128 = vrot.lane.b32.xlu1 %v1127_v31, %s1193_s20 }
  0x33   : > { %1123 = vrot.lane.b32.xlu0 %v1122_v34, %s1192_s19 }
  0x34   : > { %692 = vmatpush.bf16.msrb.mxu0 %v1029_v44 }
  0x35   : > { %1133 = vrot.lane.b32.xlu2 %v1137_v42, %s1191_s18 }
  0x36   : > { %1011 = vmatmul.msk.bf16.gmra.mxu2 %vm438_vm0, %v497_v20 }
  0x38   : > { %693 = vmatpush.bf16.msrb.mxu0 %v1028_v47 }
  0x3a   : > { %1143 = vrot.lane.b32.xlu1 %v1142_v45, %s1193_s20 }
  0x3b   : > { %1138 = vrot.lane.b32.xlu0 %v1137_v42, %s1192_s19 }
  0x3c   : > { %694 = vmatpush.bf16.msrb.mxu0 %v1027_v60 }
  0x3d   : > { %1148 = vrot.lane.b32.xlu2 %v1147_v49, %s1191_s18 }
  0x40   : > { %695 = vmatpush.bf16.msrb.mxu0 %v1026_v63 }
  0x42   : > { %1158 = vrot.lane.b32.xlu1 %v1157_v51, %s1193_s20 }
  0x43   : > { %1153 = vrot.lane.b32.xlu0 %v1152_v52, %s1192_s19 }
  0x45   : > { %1163 = vrot.lane.b32.xlu2 %v1162_v54, %s1192_s19 }
  0x4a   : > { %1173 = vrot.lane.b32.xlu1 %v1172_v56, %s1193_s20  ;;  %v500_v56 = vpack.c.bf16 %v936_v55, %v1386_v53 }
  0x4b   : > { %1168 = vrot.lane.b32.xlu0 %v1246_v5, %s1191_s18  ;;  %v1025_v5 = vld [vmem:[%s1533_s1 + $0x48] sm:$0xff] }
  0x4c   : > { %1048 = vmatpush.bf16.msra.mxu1 %v1025_v5  ;;  %696 = vmatpush.bf16.msrb.mxu0 %v1025_v5 }
  0x4d   : > { %1178 = vrot.lane.b32.xlu2 %v1177_v59, %s1191_s18  ;;  %1012 = vmatmul.msk.bf16.gmra.mxu2 %vm438_vm0, %v500_v56 }
  0x50   : > { %1049 = vmatpush.bf16.msra.mxu1 %v1024_v9  ;;  %697 = vmatpush.bf16.msrb.mxu0 %v1024_v9 }
  0x6f   : > { %v1084_v10 = vpop.permute.xlu2 %1083 }
  0x70   : > { %v1086_v21 = vunpack.i.h.bf16 %v1084_v10  ;;  %v1085_v22 = vunpack.i.l.bf16 %v1084_v10 }
  0x77   : > { %v1089_v12 = vpop.permute.xlu2 %1088 }
  0x78   : > { %v1091_v32 = vunpack.i.h.bf16 %v1089_v12  ;;  %v1090_v33 = vunpack.i.l.bf16 %v1089_v12  ;;  %v172_v12 = vld [vmem:[%s1228_s17] sm:$0xff] }
  0x7f   : > { %v1432_v19 = vpop.permute.xlu2 %1103 }
  0x80   : > { %v1106_v62 = vunpack.i.h.bf16 %v1432_v19  ;;  %v1105_v63 = vunpack.i.l.bf16 %v1432_v19 }
  0x84   : > { %v1074_v16 = vpop.permute.xlu1 %1073 }
  0x85   : > { %v1064_v17 = vpop.permute.xlu0 %1063  ;;  %v1076_v34 = vunpack.i.h.bf16 %v1074_v16  ;;  %v1075_v35 = vunpack.i.l.bf16 %v1074_v16 }
  0x86   : > { %v1066_v7 = vunpack.i.h.bf16 %v1064_v17  ;;  %v1065_v15 = vunpack.i.l.bf16 %v1064_v17 }
  0x87   : > { %v1119_v48 = vpop.permute.xlu2 %1118 }
  0x88   : > { %v441_v30 = vsel %vm438_vm0, %v1302_v26, %v1065_v15  ;;  %v442_v40 = vsel %vm438_vm0, %v1231_v0, %v1066_v7  ;;  %v1121_v17 = vunpack.i.h.bf16 %v1119_v48 }
  0x8c   : > { %v1079_v24 = vpop.permute.xlu1 %1078 }
  0x8d   : > { %v1081_v25 = vunpack.i.h.bf16 %v1079_v24  ;;  %v1080_v28 = vunpack.i.l.bf16 %v1079_v24  ;;  %v1069_v31 = vpop.permute.xlu0 %1068 }
  0x8e   : > { %v1071_v36 = vunpack.i.h.bf16 %v1069_v31  ;;  %v1070_v37 = vunpack.i.l.bf16 %v1069_v31 }
  0x8f   : > { %v468_v41 = vsel %vm438_vm0, %v1271_v13, %v1081_v25  ;;  %v467_v42 = vsel %vm438_vm0, %v1242_v4, %v1080_v28  ;;  %v1134_v3 = vpop.permute.xlu2 %1133 }
  0x90   : > { %v450_v43 = vsel %vm447_vm1, %v441_v30, %v1070_v37  ;;  %v451_v44 = vsel %vm447_vm1, %v442_v40, %v1071_v36  ;;  %v475_v45 = vsel %vm447_vm1, %v467_v42, %v1085_v22  ;;  %v476_v46 = vsel %vm447_vm1, %v468_v41, %v1086_v21 }
  0x91   : > { %v459_v26 = vsel %vm456_vm2, %v450_v43, %v1075_v35  ;;  %v460_v47 = vsel %vm456_vm2, %v451_v44, %v1076_v34  ;;  %v483_v0 = vsel %vm456_vm2, %v475_v45, %v1090_v33  ;;  %v484_v13 = vsel %vm456_vm2, %v476_v46, %v1091_v32 }
  0x92   : > { %v492_v49 = vpack.c.bf16 %v460_v47, %v459_v26  ;;  %v493_v4 = vpack.c.bf16 %v484_v13, %v483_v0  ;;  %v1135_v40 = vunpack.i.l.bf16 %v1134_v3 }
  0x94   : > { %674 = vmatmul.bf16.vlgmr.msra.gmra.mxu3 %v492_v49  ;;  %703 = vmatmul.bf16.vlgmr.msra.gmra.mxu1 %v493_v4  ;;  %v1099_v50 = vpop.permute.xlu1 %1098 }
  0x95   : > { %v1094_v51 = vpop.permute.xlu0 %1093  ;;  %v1101_v58 = vunpack.i.h.bf16 %v1099_v50  ;;  %v1100_v59 = vunpack.i.l.bf16 %v1099_v50 }
  0x96   : > { %v1096_v52 = vunpack.i.h.bf16 %v1094_v51  ;;  %v1095_v54 = vunpack.i.l.bf16 %v1094_v51 }
  0x97   : > { %v1149_v36 = vpop.permute.xlu2 %1148 }
  0x98   : > { %v443_v60 = vsel %vm438_vm0, %v1234_v1, %v1095_v54  ;;  %v444_v61 = vsel %vm438_vm0, %v1258_v8, %v1096_v52  ;;  %v1120_v8 = vunpack.i.l.bf16 %v1119_v48  ;;  %v1150_v50 = vunpack.i.l.bf16 %v1149_v36 }
  0x99   : > { %v452_v6 = vsel %vm447_vm1, %v443_v60, %v1100_v59  ;;  %v453_v53 = vsel %vm447_vm1, %v444_v61, %v1101_v58 }
  0x9a   : > { %v461_v20 = vsel %vm456_vm2, %v452_v6, %v1105_v63  ;;  %v462_v7 = vsel %vm456_vm2, %v453_v53, %v1106_v62 }
  0x9b   : > { %v495_v24 = vpack.c.bf16 %v462_v7, %v461_v20 }
  0x9c   : > { %v1114_v5 = vpop.permute.xlu1 %1113 }
  0x9d   : > { %v1116_v9 = vunpack.i.h.bf16 %v1114_v5  ;;  %v1115_v10 = vunpack.i.l.bf16 %v1114_v5  ;;  %v1109_v11 = vpop.permute.xlu0 %1108 }
  0x9e   : > { %v1111_v1 = vunpack.i.h.bf16 %v1109_v11  ;;  %v1110_v16 = vunpack.i.l.bf16 %v1109_v11 }
  0x9f   : > { %v1164_v51 = vpop.permute.xlu2 %1163 }
  0xa0   : > { %v439_v19 = vsel %vm438_vm0, %v172_v12, %v1110_v16  ;;  %v440_v15 = vsel %vm438_vm0, %v1305_v27, %v1111_v1  ;;  %v1136_v27 = vunpack.i.h.bf16 %v1134_v3  ;;  %v1166_v5 = vunpack.i.h.bf16 %v1164_v51 }
  0xa1   : > { %v448_v21 = vsel %vm447_vm1, %v439_v19, %v1115_v10  ;;  %v449_v22 = vsel %vm447_vm1, %v440_v15, %v1116_v9 }
  0xa2   : > { %v457_v25 = vsel %vm456_vm2, %v448_v21, %v1120_v8  ;;  %v458_v28 = vsel %vm456_vm2, %v449_v22, %v1121_v17  ;;  %v472_v8 = vsel %vm438_vm0, %v1395_v57, %v1166_v5 }
  0xa3   : > { %v489_v31 = vpack.c.bf16 %v458_v28, %v457_v25 }
  0xa4   : > { %679 = vmatmul.bf16.gmra.mxu3 %v495_v24  ;;  %v1129_v32 = vpop.permute.xlu1 %1128 }
  0xa5   : > { %v1131_v33 = vunpack.i.h.bf16 %v1129_v32  ;;  %v1130_v34 = vunpack.i.l.bf16 %v1129_v32  ;;  %v1124_v35 = vpop.permute.xlu0 %1123  ;;  %669 = vmatmul.bf16.vlgmr.msra.gmra.mxu0 %v489_v31  ;;  %v728_v31 = vpop.f32.mrf.mxu2 }
  0xa6   : > { %v1126_v37 = vunpack.i.h.bf16 %v1124_v35  ;;  %v1125_v30 = vunpack.i.l.bf16 %v1124_v35 }
  0xa7   : > { %v1179_v3 = vpop.permute.xlu2 %1178 }
  0xa8   : > { %v470_v41 = vsel %vm438_vm0, %v1343_v38, %v1126_v37  ;;  %v469_v42 = vsel %vm438_vm0, %v1274_v14, %v1125_v30  ;;  %v1151_v38 = vunpack.i.h.bf16 %v1149_v36  ;;  %v1181_v11 = vunpack.i.h.bf16 %v1179_v3 }
  0xa9   : > { %v477_v43 = vsel %vm447_vm1, %v469_v42, %v1130_v34  ;;  %v478_v44 = vsel %vm447_vm1, %v470_v41, %v1131_v33  ;;  %v1180_v12 = vunpack.i.l.bf16 %v1179_v3 }
  0xaa   : > { %v485_v45 = vsel %vm456_vm2, %v477_v43, %v1135_v40  ;;  %v486_v46 = vsel %vm456_vm2, %v478_v44, %v1136_v27  ;;  %v1182_v44 = vld [vmem:[%s1534_s2] ss:$0 sm:$0xff] }
  0xab   : > { %v496_v26 = vpack.c.bf16 %v486_v46, %v485_v45 }
  0xac   : > { %v1144_v47 = vpop.permute.xlu1 %1143 }
  0xad   : > { %v1146_v0 = vunpack.i.h.bf16 %v1144_v47  ;;  %v1145_v13 = vunpack.i.l.bf16 %v1144_v47  ;;  %v1139_v48 = vpop.permute.xlu0 %1138  ;;  %708 = vmatmul.bf16.gmra.mxu1 %v496_v26  ;;  %v730_v32 = vpop.f32.mrf.mxu2 }
  0xae   : > { %v1141_v49 = vunpack.i.h.bf16 %v1139_v48  ;;  %v1140_v4 = vunpack.i.l.bf16 %v1139_v48 }
  0xb0   : > { %v445_v14 = vsel %vm438_vm0, %v1287_v18, %v1140_v4  ;;  %v446_v52 = vsel %vm438_vm0, %v1312_v29, %v1141_v49  ;;  %v1165_v18 = vunpack.i.l.bf16 %v1164_v51 }
  0xb1   : > { %v454_v54 = vsel %vm447_vm1, %v445_v14, %v1145_v13  ;;  %v455_v55 = vsel %vm447_vm1, %v446_v52, %v1146_v0 }
  0xb2   : > { %v463_v56 = vsel %vm456_vm2, %v454_v54, %v1150_v50  ;;  %v464_v58 = vsel %vm456_vm2, %v455_v55, %v1151_v38  ;;  %v471_v20 = vsel %vm438_vm0, %v1346_v39, %v1165_v18 }
  0xb3   : > { %v498_v59 = vpack.c.bf16 %v464_v58, %v463_v56 }
  0xb4   : > { %v1159_v60 = vpop.permute.xlu1 %1158 }
  0xb5   : > { %v1154_v61 = vpop.permute.xlu0 %1153  ;;  %684 = vmatmul.bf16.gmra.mxu3 %v498_v59  ;;  %v1161_v6 = vunpack.i.h.bf16 %v1159_v60  ;;  %v1160_v53 = vunpack.i.l.bf16 %v1159_v60  ;;  %v733_v34 = vpop.f32.mrf.mxu2 }
  0xb6   : > { %v1156_v62 = vunpack.i.h.bf16 %v1154_v61  ;;  %v1155_v63 = vunpack.i.l.bf16 %v1154_v61 }
  0xb8   : > { %v466_v29 = vsel %vm438_vm0, %v1237_v2, %v1156_v62  ;;  %v465_v9 = vsel %vm438_vm0, %v1297_v23, %v1155_v63 }
  0xb9   : > { %v473_v15 = vsel %vm447_vm1, %v465_v9, %v1160_v53  ;;  %v474_v2 = vsel %vm447_vm1, %v466_v29, %v1161_v6 }
  0xbc   : > { %v1174_v10 = vpop.permute.xlu1 %1173 }
  0xbd   : > { %v1176_v1 = vunpack.i.h.bf16 %v1174_v10  ;;  %v1175_v16 = vunpack.i.l.bf16 %v1174_v10  ;;  %v1169_v17 = vpop.permute.xlu0 %1168  ;;  %v735_v37 = vpop.f32.mrf.mxu2 }
  0xbe   : > { %v1171_v7 = vunpack.i.h.bf16 %v1169_v17  ;;  %v1170_v19 = vunpack.i.l.bf16 %v1169_v17 }
  0xbf   : > { %v479_v23 = vsel %vm447_vm1, %v471_v20, %v1175_v16  ;;  %v480_v21 = vsel %vm447_vm1, %v472_v8, %v1176_v1 }
  0xc0   : > { %v481_v22 = vsel %vm456_vm2, %v473_v15, %v1170_v19  ;;  %v482_v24 = vsel %vm456_vm2, %v474_v2, %v1171_v7  ;;  %v487_v25 = vsel %vm456_vm2, %v479_v23, %v1180_v12  ;;  %v488_v57 = vsel %vm456_vm2, %v480_v21, %v1181_v11 }
  0xc1   : > { %v490_v28 = vpack.c.bf16 %v482_v24, %v481_v22  ;;  %v499_v39 = vpack.c.bf16 %v488_v57, %v487_v25 }
  0xc3   : > { %698 = vmatmul.bf16.vlgmr.msrb.gmra.mxu0 %v490_v28  ;;  %713 = vmatmul.bf16.gmra.mxu1 %v499_v39 }
  0xc5   : > { %v738_v40 = vpop.f32.mrf.mxu2 }
  0xcd   : > { %v740_v26 = vpop.f32.mrf.mxu2 }
  0xd5   : > { %v743_v58 = vpop.f32.mrf.mxu2 }
  0xdd   : > { %v745_v19 = vpop.f32.mrf.mxu2 }
 0x111   : > { %v704_v35 = vpop.f32.mrf.mxu1 }
 0x117   : > { %v675_v33 = vpop.f32.mrf.mxu3 }
 0x118   : > { %v676_v46 = vadd.f32 %v1182_v44, %v675_v33 }
 0x119   : > { %v706_v30 = vpop.f32.mrf.mxu1 }
 0x11a   : > { %v705_v4 = vadd.f32 %v704_v35, %v676_v46 }
 0x11c   : > { %v734_v52 = vadd.f32 %v733_v34, %v705_v4 }
 0x11e   : > { %v750_v61 = vmax.f32 %v734_v52, 0.0 }
 0x11f   : > { %v677_v36 = vpop.f32.mrf.mxu3 }
 0x120   : > { %v678_v45 = vadd.f32 %v1182_v44, %v677_v36 }
 0x122   : > { %v670_v41 = vpop.f32.mrf.mxu0  ;;  %v707_v13 = vadd.f32 %v706_v30, %v678_v45 }
 0x123   : > { %v671_v62 = vadd.f32 %v1182_v44, %v670_v41 }
 0x124   : > { %v736_v51 = vadd.f32 %v735_v37, %v707_v13 }
 0x126   : > { %v751_v56 = vmax.f32 %v736_v51, 0.0 }
 0x127   : > { %v680_v27 = vpop.f32.mrf.mxu3 }
 0x128   : > { %v681_v49 = vadd.f32 %v1182_v44, %v680_v27  ;;  %v757_v5 = vmax.f32 %v750_v61, %v751_v56 }
 0x12a   : > { %v709_v42 = vpop.f32.mrf.mxu1  ;;  %v672_v47 = vpop.f32.mrf.mxu0  ;;  %v765_v1 = vrot.slane %v757_v5, 1 }
 0x12b   : > { %v710_v14 = vadd.f32 %v709_v42, %v681_v49  ;;  %v673_v9 = vadd.f32 %v1182_v44, %v672_v47 }
 0x12c   : > { %v773_v21 = vmax.f32 %v757_v5, %v765_v1 }
 0x12d   : > { %v739_v60 = vadd.f32 %v738_v40, %v710_v14 }
 0x12e   : > { %v808_v35 = vrot.slane %v773_v21, 5  ;;  %v800_v37 = vrot.slane %v773_v21, 3 }
 0x12f   : > { %v682_v43 = vpop.f32.mrf.mxu3  ;;  %v752_v53 = vmax.f32 %v739_v60, 0.0 }
 0x130   : > { %v683_v0 = vadd.f32 %v1182_v44, %v682_v43 }
 0x132   : > { %v711_v48 = vpop.f32.mrf.mxu1 }
 0x133   : > { %v712_v50 = vadd.f32 %v711_v48, %v683_v0 }
 0x135   : > { %v741_v54 = vadd.f32 %v740_v26, %v712_v50 }
 0x137   : > { %v753_v63 = vmax.f32 %v741_v54, 0.0 }
 0x138   : > { %v685_v38 = vpop.f32.mrf.mxu3 }
 0x139   : > { %v686_v3 = vadd.f32 %v1182_v44, %v685_v38  ;;  %v758_v10 = vmax.f32 %v752_v53, %v753_v63 }
 0x13b   : > { %v766_v2 = vrot.slane %v758_v10, 1 }
 0x13d   : > { %v774_v39 = vmax.f32 %v758_v10, %v766_v2 }
 0x13f   : > { %v810_v40 = vrot.slane %v774_v39, 4  ;;  %v802_v41 = vrot.slane %v774_v39, 2  ;;  %v783_v42 = vrot.slane %v774_v39, 6 }
 0x140   : > { %v699_v55 = vpop.f32.mrf.mxu0  ;;  %v714_v59 = vpop.f32.mrf.mxu1 }
 0x141   : > { %v687_v18 = vpop.f32.mrf.mxu3  ;;  %v700_v6 = vadd.f32 %v699_v55, %v671_v62  ;;  %v715_v29 = vadd.f32 %v714_v59, %v686_v3 }
 0x142   : > { %v688_v11 = vadd.f32 %v1182_v44, %v687_v18 }
 0x143   : > { %v729_v16 = vadd.f32 %v728_v31, %v700_v6  ;;  %v744_v20 = vadd.f32 %v743_v58, %v715_v29  ;;  %v791_v31 = vrot.slane %v773_v21, 1 }
 0x145   : > { %v748_v22 = vmax.f32 %v729_v16, 0.0  ;;  %v754_v25 = vmax.f32 %v744_v20, 0.0 }
 0x148   : > { %v701_v12 = vpop.f32.mrf.mxu0  ;;  %v716_v8 = vpop.f32.mrf.mxu1 }
 0x149   : > { %v702_v17 = vadd.f32 %v701_v12, %v673_v9  ;;  %v717_v7 = vadd.f32 %v716_v8, %v688_v11 }
 0x14b   : > { %v731_v15 = vadd.f32 %v730_v32, %v702_v17  ;;  %v746_v23 = vadd.f32 %v745_v19, %v717_v7  ;;  %v780_v32 = vrot.slane %v773_v21, 7 }
 0x14d   : > { %v749_v24 = vmax.f32 %v731_v15, 0.0  ;;  %v755_v57 = vmax.f32 %v746_v23, 0.0 }
 0x14f   : > { %v756_v28 = vmax.f32 %v748_v22, %v749_v24  ;;  %v759_v33 = vmax.f32 %v754_v25, %v755_v57 }
 0x151   : > { %v764_v34 = vrot.slane %v756_v28, 1  ;;  %v767_v36 = vrot.slane %v759_v33, 1 }
 0x153   : > { %v772_v30 = vmax.f32 %v756_v28, %v764_v34  ;;  %v775_v27 = vmax.f32 %v759_v33, %v767_v36 }
 0x155   : > { %v807_v43 = vrot.slane %v772_v30, 6  ;;  %v790_v44 = vrot.slane %v772_v30, 2  ;;  %v799_v45 = vrot.slane %v772_v30, 4  ;;  %v782_v46 = vsel %vm781_vm3, %v780_v32, %v772_v30 }
 0x156   : > { %v812_v26 = vrot.slane %v775_v27, 3  ;;  %v794_v47 = vrot.slane %v775_v27, 7  ;;  %v804_v0 = vrot.slane %v775_v27, 1  ;;  %v786_v13 = vrot.slane %v775_v27, 5 }
 0x157   : > { %v809_v48 = vsel %vm781_vm3, %v808_v35, %v807_v43  ;;  %v792_v49 = vsel %vm781_vm3, %v791_v31, %v790_v44  ;;  %v801_v4 = vsel %vm781_vm3, %v800_v37, %v799_v45  ;;  %v785_v38 = vsel %vm784_vm4, %v783_v42, %v782_v46 }
 0x158   : > { %v811_v50 = vsel %vm784_vm4, %v810_v40, %v809_v48  ;;  %v793_v51 = vsel %vm784_vm4, %v774_v39, %v792_v49  ;;  %v803_v14 = vsel %vm784_vm4, %v802_v41, %v801_v4  ;;  %v788_v52 = vsel %vm787_vm5, %v786_v13, %v785_v38 }
 0x159   : > { %v813_v54 = vsel %vm787_vm5, %v812_v26, %v811_v50  ;;  %v795_v55 = vsel %vm787_vm5, %v794_v47, %v793_v51  ;;  %v805_v56 = vsel %vm787_vm5, %v804_v0, %v803_v14 }
 0x15a   : > { %814 = vrot.lane.b32.xlu0 %v813_v54, %s1193_s20  ;;  %796 = vrot.lane.b32.xlu1 %v795_v55, %s1193_s20 }
 0x1cc   : > { %v815_v58 = vpop.permute.xlu0 %814  ;;  %v797_v59 = vpop.permute.xlu1 %796 }
 0x1cd   : > { %v818_v60 = vsel %vm447_vm1, %v805_v56, %v815_v58  ;;  %v817_v62 = vsel %vm447_vm1, %v788_v52, %v797_v59 }
 0x1ce   : > { %v821_v61 = vrot.slane %v818_v60, 4 }
 0x1d0   : > { %v823_v63 = vsel %vm822_vm6, %v817_v62, %v821_v61 }
 0x1d1   : > { %825 = vst [vmem:[%s170_s11] sm:$0xff] %v823_v63 }
 0x1d2 PF: > { %s13_s12 = sadd.s32 1, %s1189_s12  }
 0x1d3   : > { %p10_p4 = scmp.ge.s32.totalorder %s13_s12, 4  }
 0x1d5   :  { %12 = sbr.rel (!%p10_p4) target bundleno = 1 (0x1), region = 64 }

// kernel: simple_cnn_forward.3
= control target key start
LH: loop header
LB: loop body
LE: loop exit
PB: predicated region body
PF: predicated region fallthrough
CT: control target
= control target key end

     0   :  { %s3229_s12 = smov 0   ;;  %s4711_s0 = inlined_call_operand.vmem [shape: f32[2,18,18,8], index: 0, kind: input, shape index: {}]   ;;  %s4712_s1 = inlined_call_operand.vmem [shape: bf16[72,32], index: 1, kind: input, shape index: {}]   ;;  %s4713_s2 = inlined_call_operand.vmem [shape: f32[1,32], index: 2, kind: input, shape index: {}]   ;;  %s4714_s3 = inlined_call_operand.vmem [shape: f32[2,8,256], index: 3, kind: output, shape index: {}]  }
   0x1 LB: > { %s2279_s13 = sadd.s32 4294967295, %s3198_s12   ;;  %p2283_p0 = scmp.ge.s32.totalorder %s3198_s12, 1  ;;  %s3198_s12 = sphi %s3229_s12, %s13_s12  }
   0x2   : > { %p137_p1 = scmp.lt.s32.totalorder %s3198_s12, 3 }
   0x4   : > { %p138_p2 = pnand %p2283_p0, %p137_p1 }
   0x6   : > { %141 = sbr.rel (%p138_p2) target bundleno = 754 (0x2f2), region = 32 }
   0xb   : > { %p161_p3 = scmp.lt.s32.totalorder %s2279_s13, 1  ;;  %s3200_s18 = smov 8   ;;  %vm1486_vm0 = vcmask 64512   ;;  %vm1519_vm1 = vcmask 130048   ;;  %vm1552_vm2 = vcmask 195584   ;;  %vm1585_vm3 = vcmask 261120  }
   0xc   : > { %s3201_s19 = smov 16   ;;  %s3202_s20 = smov 24   ;;  %vm1618_vm4 = vcmask 326656   ;;  %vm1855_vm5 = vcmask 1043456   ;;  %vm1651_vm6 = vcmask 392192   ;;  %vm1717_vm7 = vcmask 523264  }
   0xd   : > { %s4766_s13 = smov (!%p161_p3, %s2279_s13), 1  ;;  %s3203_s21 = smov 32   ;;  %vm1684_vm8 = vcmask 457728   ;;  %vm1806_vm9 = vcmask 588800   ;;  %vm2069_vm10 = vcmask 1041409   ;;  %vm2072_vm11 = vcmask 1042434  }
   0xe   : > { %s2533_s14 = smul.u32 432, %s4766_s13  ;;  %s3204_s22 = smov 40   ;;  %vm2075_vm12 = vcmask 1043459   ;;  %vm2078_vm13 = vcmask 1044484   ;;  %vm2081_vm14 = vcmask 1045509   ;;  %vm2084_vm15 = vcmask 1046534  }
   0xf   : > { %s3205_s23 = smov 48   ;;  %s3206_s24 = smov 64  }
  0x10   : > { %s3243_s17 = scalar_lea.vmem %s4711_s0, %s2533_s14  ;;  %s3207_s25 = smov 56  }
  0x11   : > { %v212_v0 = vld [vmem:[%s3243_s17 + $0x61] sm:$0xff]  ;;  %v213_v1 = vld [vmem:[%s3243_s17 + $0x69] sm:$0xff]  ;;  %v208_v2 = vld [vmem:[%s3243_s17 + $0x31] sm:$0xff]  ;;  %s3208_s11 = smov 96   ;;  %s2513_s14 = sshll.u32 %s4766_s13, 4 }
  0x12   : > { %v3248_v3 = vpack.i.bf16 %v213_v1, %v212_v0  ;;  %v209_v4 = vld [vmem:[%s3243_s17 + $0x39] sm:$0xff]  ;;  %v204_v5 = vld [vmem:[%s3243_s17 + $0x1] sm:$0xff]  ;;  %v205_v6 = vld [vmem:[%s3243_s17 + $0x9] sm:$0xff] }
  0x13   : > { %v3253_v7 = vpack.i.bf16 %v209_v4, %v208_v2  ;;  %v2551_v8 = vpack.i.bf16 %v205_v6, %v204_v5  ;;  %v214_v9 = vld [vmem:[%s3243_s17 + $0x79] sm:$0xff]  ;;  %v215_v10 = vld [vmem:[%s3243_s17 + $0x81] sm:$0xff]  ;;  %v210_v11 = vld [vmem:[%s3243_s17 + $0x49] sm:$0xff] }
  0x14   : > { %2572 = vrot.lane.b32.xlu2 %v3248_v3, %s3200_s18  ;;  %v211_v12 = vld [vmem:[%s3243_s17 + $0x51] sm:$0xff]  ;;  %v206_v13 = vld [vmem:[%s3243_s17 + $0x19] sm:$0xff]  ;;  %v207_v14 = vld [vmem:[%s3243_s17 + $0x21] sm:$0xff]  ;;  %v3266_v15 = vpack.i.bf16 %v215_v10, %v214_v9 }
  0x15   : > { %2562 = vrot.lane.b32.xlu1 %v3253_v7, %s3200_s18  ;;  %2552 = vrot.lane.b32.xlu0 %v2551_v8, %s3200_s18  ;;  %v3268_v16 = vpack.i.bf16 %v211_v12, %v210_v11  ;;  %v3270_v17 = vpack.i.bf16 %v207_v14, %v206_v13  ;;  %v220_v18 = vld [vmem:[%s3243_s17 + $0xc1] sm:$0xff]  ;;  %v221_v19 = vld [vmem:[%s3243_s17 + $0xc9] sm:$0xff] }
  0x16   : > { %v218_v20 = vld [vmem:[%s3243_s17 + $0xa9] sm:$0xff]  ;;  %v219_v21 = vld [vmem:[%s3243_s17 + $0xb1] sm:$0xff]  ;;  %v217_v23 = vld [vmem:[%s3243_s17 + $0x99] sm:$0xff]  ;;  %v3284_v24 = vpack.i.bf16 %v221_v19, %v220_v18 }
  0x17   : > { %v216_v22 = vld [vmem:[%s3243_s17 + $0x91] sm:$0xff]  ;;  %v3286_v25 = vpack.i.bf16 %v219_v21, %v218_v20  ;;  %v226_v27 = vld [vmem:[%s3243_s17 + $0x109] sm:$0xff]  ;;  %v225_v30 = vld [vmem:[%s3243_s17 + $0xf9] sm:$0xff] }
  0x18   : > { %v3288_v26 = vpack.i.bf16 %v217_v23, %v216_v22  ;;  %v227_v28 = vld [vmem:[%s3243_s17 + $0x111] sm:$0xff]  ;;  %v222_v31 = vld [vmem:[%s3243_s17 + $0xd9] sm:$0xff]  ;;  %v223_v32 = vld [vmem:[%s3243_s17 + $0xe1] sm:$0xff] }
  0x19   : > { %v224_v29 = vld [vmem:[%s3243_s17 + $0xf1] sm:$0xff]  ;;  %v3302_v33 = vpack.i.bf16 %v227_v28, %v226_v27  ;;  %v3306_v35 = vpack.i.bf16 %v223_v32, %v222_v31  ;;  %v233_v37 = vld [vmem:[%s3243_s17 + $0x159] sm:$0xff]  ;;  %v231_v39 = vld [vmem:[%s3243_s17 + $0x141] sm:$0xff] }
  0x1a   : > { %v3304_v34 = vpack.i.bf16 %v225_v30, %v224_v29  ;;  %v232_v36 = vld [vmem:[%s3243_s17 + $0x151] sm:$0xff]  ;;  %v230_v38 = vld [vmem:[%s3243_s17 + $0x139] sm:$0xff]  ;;  %v228_v40 = vld [vmem:[%s3243_s17 + $0x121] sm:$0xff] }
  0x1b   : > { %v229_v41 = vld [vmem:[%s3243_s17 + $0x129] sm:$0xff]  ;;  %v3320_v42 = vpack.i.bf16 %v233_v37, %v232_v36  ;;  %v3322_v43 = vpack.i.bf16 %v231_v39, %v230_v38  ;;  %v238_v45 = vld [vmem:[%s3243_s17 + $0x1a] sm:$0xff]  ;;  %v235_v50 = vld [vmem:[%s3243_s17 + $0x171] sm:$0xff] }
  0x1c   : > { %2577 = vrot.lane.b32.xlu2 %v3266_v15, %s3200_s18  ;;  %v3324_v44 = vpack.i.bf16 %v229_v41, %v228_v40  ;;  %v239_v46 = vld [vmem:[%s3243_s17 + $0x22] sm:$0xff]  ;;  %v237_v48 = vld [vmem:[%s3243_s17 + $0xa] sm:$0xff]  ;;  %v243_v57 = vld [vmem:[%s3243_s17 + $0x52] sm:$0xff] }
  0x1d   : > { %2567 = vrot.lane.b32.xlu1 %v3268_v16, %s3200_s18  ;;  %2557 = vrot.lane.b32.xlu0 %v3270_v17, %s3200_s18  ;;  %v236_v47 = vld [vmem:[%s3243_s17 + $0x2] sm:$0xff]  ;;  %v3338_v51 = vpack.i.bf16 %v239_v46, %v238_v45  ;;  %v245_v55 = vld [vmem:[%s3243_s17 + $0x6a] sm:$0xff] }
  0x1e   : > { %v234_v49 = vld [vmem:[%s3243_s17 + $0x169] sm:$0xff]  ;;  %v2631_v52 = vpack.i.bf16 %v237_v48, %v236_v47  ;;  %v240_v58 = vld [vmem:[%s3243_s17 + $0x32] sm:$0xff]  ;;  %v241_v59 = vld [vmem:[%s3243_s17 + $0x3a] sm:$0xff] }
  0x1f   : > { %v3340_v53 = vpack.i.bf16 %v235_v50, %v234_v49  ;;  %v244_v54 = vld [vmem:[%s3243_s17 + $0x62] sm:$0xff]  ;;  %v242_v56 = vld [vmem:[%s3243_s17 + $0x4a] sm:$0xff]  ;;  %v3357_v62 = vpack.i.bf16 %v241_v59, %v240_v58  ;;  %v251_v0 = vld [vmem:[%s3243_s17 + $0xb2] sm:$0xff] }
  0x20   : > { %v3353_v60 = vpack.i.bf16 %v245_v55, %v244_v54  ;;  %v3355_v61 = vpack.i.bf16 %v243_v57, %v242_v56  ;;  %v250_v63 = vld [vmem:[%s3243_s17 + $0xaa] sm:$0xff]  ;;  %v248_v1 = vld [vmem:[%s3243_s17 + $0x92] sm:$0xff]  ;;  %v249_v2 = vld [vmem:[%s3243_s17 + $0x9a] sm:$0xff] }
  0x21   : > { %v246_v4 = vld [vmem:[%s3243_s17 + $0x7a] sm:$0xff]  ;;  %v247_v5 = vld [vmem:[%s3243_s17 + $0x82] sm:$0xff]  ;;  %v3371_v6 = vpack.i.bf16 %v251_v0, %v250_v63  ;;  %v3373_v8 = vpack.i.bf16 %v249_v2, %v248_v1  ;;  %v256_v10 = vld [vmem:[%s3243_s17 + $0xf2] sm:$0xff] }
  0x22   : > { %v3375_v9 = vpack.i.bf16 %v247_v5, %v246_v4  ;;  %v257_v11 = vld [vmem:[%s3243_s17 + $0xfa] sm:$0xff]  ;;  %v255_v13 = vld [vmem:[%s3243_s17 + $0xe2] sm:$0xff]  ;;  %v253_v18 = vld [vmem:[%s3243_s17 + $0xca] sm:$0xff] }
  0x23   : > { %4732 = vst [vmem:[#allocation2_spill] sm:$0xff] %v3373_v8  ;;  %v254_v12 = vld [vmem:[%s3243_s17 + $0xda] sm:$0xff]  ;;  %v252_v14 = vld [vmem:[%s3243_s17 + $0xc2] sm:$0xff]  ;;  %v3389_v19 = vpack.i.bf16 %v257_v11, %v256_v10  ;;  %v261_v28 = vld [vmem:[%s3243_s17 + $0x12a] sm:$0xff] }
  0x24   : > { %2592 = vrot.lane.b32.xlu2 %v3284_v24, %s3200_s18  ;;  %v3391_v20 = vpack.i.bf16 %v255_v13, %v254_v12  ;;  %v3393_v21 = vpack.i.bf16 %v253_v18, %v252_v14  ;;  %v262_v22 = vld [vmem:[%s3243_s17 + $0x13a] sm:$0xff]  ;;  %v263_v23 = vld [vmem:[%s3243_s17 + $0x142] sm:$0xff]  ;;  %v258_v29 = vld [vmem:[%s3243_s17 + $0x10a] sm:$0xff] }
  0x25   : > { %2587 = vrot.lane.b32.xlu1 %v3286_v25, %s3200_s18  ;;  %2582 = vrot.lane.b32.xlu0 %v3288_v26, %s3200_s18  ;;  %4733 = vst [vmem:[#allocation3_spill] sm:$0xff] %v3389_v19  ;;  %v260_v27 = vld [vmem:[%s3243_s17 + $0x122] sm:$0xff]  ;;  %v259_v30 = vld [vmem:[%s3243_s17 + $0x112] sm:$0xff]  ;;  %v3407_v31 = vpack.i.bf16 %v263_v23, %v262_v22 }
  0x26   : > { %4734 = vst [vmem:[#allocation4_spill] sm:$0xff] %v3391_v20  ;;  %v3409_v32 = vpack.i.bf16 %v261_v28, %v260_v27  ;;  %v3411_v36 = vpack.i.bf16 %v259_v30, %v258_v29  ;;  %v3416_v37 = vld [vmem:[%s3243_s17 + $0x18] sm:$0xff]  ;;  %v3423_v38 = vld [vmem:[%s3243_s17 + $0x20] sm:$0xff]  ;;  %v266_v39 = vld [vmem:[%s3243_s17 + $0x16a] sm:$0xff] }
  0x27   : > { %4735 = vst [vmem:[#allocation5_spill] sm:$0xff] %v3407_v31  ;;  %v267_v40 = vld [vmem:[%s3243_s17 + $0x172] sm:$0xff]  ;;  %v265_v45 = vld [vmem:[%s3243_s17 + $0x15a] sm:$0xff]  ;;  %v2711_v46 = vpack.i.bf16 %v3423_v38, %v3416_v37  ;;  %v2294_v50 = vld [vmem:[%s3243_s17 + $0x68] sm:$0xff] }
  0x28   : > { %4736 = vst [vmem:[#allocation6_spill] sm:$0xff] %v3409_v32  ;;  %v264_v41 = vld [vmem:[%s3243_s17 + $0x152] sm:$0xff]  ;;  %v3431_v47 = vpack.i.bf16 %v267_v40, %v266_v39  ;;  %v2293_v49 = vld [vmem:[%s3243_s17 + $0x60] sm:$0xff]  ;;  %v3467_v63 = vld [vmem:[%s3243_s17 + $0xa8] sm:$0xff] }
  0x29   : > { %4737 = vst [vmem:[#allocation7_spill] sm:$0xff] %v3411_v36  ;;  %v3433_v48 = vpack.i.bf16 %v265_v45, %v264_v41  ;;  %v3446_v54 = vld [vmem:[%s3243_s17 + $0x50] sm:$0xff]  ;;  %v3452_v56 = vld [vmem:[%s3243_s17 + $0x38] sm:$0xff]  ;;  %v3454_v57 = vpack.i.bf16 %v2294_v50, %v2293_v49  ;;  %v2296_v10 = vld [vmem:[%s3243_s17 + $0x80] sm:$0xff] }
  0x2a   : > { %4738 = vst [vmem:[#allocation8_spill] sm:$0xff] %v3431_v47  ;;  %v3449_v55 = vld [vmem:[%s3243_s17 + $0x30] sm:$0xff]  ;;  %v3480_v4 = vld [vmem:[%s3243_s17 + $0x98] sm:$0xff]  ;;  %v3510_v39 = vld [vmem:[%s3243_s17 + $0xe0] sm:$0xff] }
  0x2b   : > { %4739 = vst [vmem:[#allocation9_spill] sm:$0xff] %v3433_v48  ;;  %v3462_v59 = vpack.i.bf16 %v3452_v56, %v3449_v55  ;;  %v3474_v0 = vld [vmem:[%s3243_s17 + $0xb0] sm:$0xff]  ;;  %v2295_v5 = vld [vmem:[%s3243_s17 + $0x78] sm:$0xff]  ;;  %v2301_v40 = vld [vmem:[%s3243_s17 + $0xc0] sm:$0xff] }
  0x2c   : > { %2607 = vrot.lane.b32.xlu2 %v3302_v33, %s3200_s18  ;;  %4740 = vst [vmem:[#allocation10_spill] sm:$0xff] %v3454_v57  ;;  %v3477_v1 = vld [vmem:[%s3243_s17 + $0x90] sm:$0xff]  ;;  %v2741_v13 = vpack.i.bf16 %v3474_v0, %v3467_v63  ;;  %v2731_v23 = vpack.i.bf16 %v2296_v10, %v2295_v5  ;;  %v3504_v28 = vld [vmem:[%s3243_s17 + $0xf8] sm:$0xff]  ;;  %v2302_v41 = vld [vmem:[%s3243_s17 + $0xc8] sm:$0xff] }
  0x2d   : > { %2602 = vrot.lane.b32.xlu1 %v3304_v34, %s3200_s18  ;;  %2597 = vrot.lane.b32.xlu0 %v3306_v35, %s3200_s18  ;;  %4742 = vst [vmem:[#allocation12_spill] sm:$0xff] %v3462_v59  ;;  %v3494_v22 = vpack.i.bf16 %v3480_v4, %v3477_v1  ;;  %v3498_v27 = vld [vmem:[%s3243_s17 + $0xf0] sm:$0xff]  ;;  %v3507_v29 = vld [vmem:[%s3243_s17 + $0xd8] sm:$0xff] }
  0x2f   : > { %4743 = vst [vmem:[#allocation13_spill] sm:$0xff] %v3494_v22 }
  0x34   : > { %2622 = vrot.lane.b32.xlu2 %v3320_v42, %s3200_s18 }
  0x35   : > { %2617 = vrot.lane.b32.xlu1 %v3322_v43, %s3200_s18  ;;  %2612 = vrot.lane.b32.xlu0 %v3324_v44, %s3200_s18 }
  0x3c   : > { %2637 = vrot.lane.b32.xlu2 %v3338_v51, %s3201_s19 }
  0x3d   : > { %2632 = vrot.lane.b32.xlu1 %v2631_v52, %s3201_s19  ;;  %2627 = vrot.lane.b32.xlu0 %v3340_v53, %s3200_s18  ;;  %v3443_v52 = vld [vmem:[%s3243_s17 + $0x48] sm:$0xff] }
  0x3e   : > { %v3458_v58 = vpack.i.bf16 %v3446_v54, %v3443_v52 }
  0x40   : > { %4741 = vst [vmem:[#allocation11_spill] sm:$0xff] %v3458_v58 }
  0x44   : > { %2652 = vrot.lane.b32.xlu2 %v3353_v60, %s3201_s19 }
  0x45   : > { %2647 = vrot.lane.b32.xlu1 %v3355_v61, %s3201_s19  ;;  %2642 = vrot.lane.b32.xlu0 %v3357_v62, %s3201_s19 }
  0x4c   : > { %2667 = vrot.lane.b32.xlu2 %v3371_v6, %s3201_s19 }
  0x4d   : > { %2662 = vrot.lane.b32.xlu1 %v3373_v8, %s3201_s19  ;;  %2657 = vrot.lane.b32.xlu0 %v3375_v9, %s3201_s19 }
  0x54   : > { %2682 = vrot.lane.b32.xlu2 %v3389_v19, %s3201_s19 }
  0x55   : > { %2677 = vrot.lane.b32.xlu1 %v3391_v20, %s3201_s19  ;;  %2672 = vrot.lane.b32.xlu0 %v3393_v21, %s3201_s19 }
  0x5c   : > { %2697 = vrot.lane.b32.xlu2 %v3407_v31, %s3201_s19 }
  0x5d   : > { %2692 = vrot.lane.b32.xlu1 %v3409_v32, %s3201_s19  ;;  %2687 = vrot.lane.b32.xlu0 %v3411_v36, %s3201_s19  ;;  %v3563_v32 = vld [vmem:[%s3243_s17 + $0x168] sm:$0xff] }
  0x64   : > { %2712 = vrot.lane.b32.xlu2 %v2711_v46, %s3202_s20 }
  0x65   : > { %2707 = vrot.lane.b32.xlu1 %v3431_v47, %s3201_s19  ;;  %2702 = vrot.lane.b32.xlu0 %v3433_v48, %s3201_s19 }
  0x6c   : > { %2727 = vrot.lane.b32.xlu2 %v3454_v57, %s3202_s20 }
  0x6d   : > { %2722 = vrot.lane.b32.xlu1 %v3458_v58, %s3202_s20  ;;  %2717 = vrot.lane.b32.xlu0 %v3462_v59, %s3202_s20  ;;  %v2317_v59 = vld [vmem:[%s3243_s17 + $0x180] sm:$0xff] }
  0x6e   : > { %v2573_v2 = vpop.permute.xlu2 %2572 }
  0x6f   : > { %v2575_v11 = vunpack.i.h.bf16 %v2573_v2  ;;  %v2574_v12 = vunpack.i.l.bf16 %v2573_v2 }
  0x71   : > { %v3487_v14 = vsel %vm1486_vm0, %v2293_v49, %v2574_v12  ;;  %v3490_v18 = vsel %vm1486_vm0, %v2294_v50, %v2575_v11  ;;  %v3516_v49 = vpack.i.bf16 %v3504_v28, %v3498_v27  ;;  %v2751_v11 = vpack.i.bf16 %v3510_v39, %v3507_v29 }
  0x72   : > { %v2746_v12 = vpack.i.bf16 %v2302_v41, %v2301_v40 }
  0x73   : > { %4744 = vst [vmem:[#allocation14_spill] sm:$0xff] %v3516_v49 }
  0x74   : > { %2742 = vrot.lane.b32.xlu2 %v2741_v13, %s3202_s20  ;;  %v3529_v13 = vld [vmem:[%s3243_s17 + $0x138] sm:$0xff] }
  0x75   : > { %2737 = vrot.lane.b32.xlu1 %v3494_v22, %s3202_s20  ;;  %2732 = vrot.lane.b32.xlu0 %v2731_v23, %s3202_s20  ;;  %v3534_v23 = vld [vmem:[%s3243_s17 + $0x140] sm:$0xff] }
  0x76   : > { %v2578_v30 = vpop.permute.xlu2 %2577 }
  0x77   : > { %v2580_v45 = vunpack.i.h.bf16 %v2578_v30  ;;  %v2579_v46 = vunpack.i.l.bf16 %v2578_v30  ;;  %v3540_v30 = vld [vmem:[%s3243_s17 + $0x128] sm:$0xff] }
  0x78   : > { %4746 = vst [vmem:[#allocation16_spill] sm:$0xff] %v3540_v30 }
  0x79   : > { %v3519_v50 = vsel %vm1486_vm0, %v2295_v5, %v2579_v46  ;;  %v3522_v2 = vsel %vm1486_vm0, %v2296_v10, %v2580_v45  ;;  %v3537_v5 = vld [vmem:[%s3243_s17 + $0x120] sm:$0xff]  ;;  %v2307_v45 = vld [vmem:[%s3243_s17 + $0x108] sm:$0xff]  ;;  %v2308_v46 = vld [vmem:[%s3243_s17 + $0x110] sm:$0xff] }
  0x7a   : > { %4745 = vst [vmem:[#allocation15_spill] sm:$0xff] %v3537_v5  ;;  %v3554_v47 = vpack.i.bf16 %v2308_v46, %v2307_v45 }
  0x7c   : > { %2757 = vrot.lane.b32.xlu2 %v3516_v49, %s3202_s20  ;;  %v2766_v49 = vpack.i.bf16 %v3540_v30, %v3537_v5  ;;  %4747 = vst [vmem:[#allocation17_spill] sm:$0xff] %v3554_v47 }
  0x7d   : > { %2752 = vrot.lane.b32.xlu1 %v2751_v11, %s3202_s20  ;;  %2747 = vrot.lane.b32.xlu0 %v2746_v12, %s3202_s20  ;;  %v2771_v11 = vpack.i.bf16 %v3534_v23, %v3529_v13 }
  0x7e   : > { %v2593_v10 = vpop.permute.xlu2 %2592 }
  0x7f   : > { %v2595_v22 = vunpack.i.h.bf16 %v2593_v10  ;;  %v2594_v58 = vunpack.i.l.bf16 %v2593_v10  ;;  %v2318_v10 = vld [vmem:[%s3243_s17 + $0x188] sm:$0xff] }
  0x80   : > { %v2786_v30 = vpack.i.bf16 %v2318_v10, %v2317_v59 }
  0x81   : > { %v3547_v12 = vsel %vm1486_vm0, %v2301_v40, %v2594_v58  ;;  %v3550_v57 = vsel %vm1486_vm0, %v2302_v41, %v2595_v22  ;;  %v3566_v40 = vld [vmem:[%s3243_s17 + $0x170] sm:$0xff]  ;;  %v2314_v41 = vld [vmem:[%s3243_s17 + $0x158] sm:$0xff] }
  0x82   : > { %v2313_v22 = vld [vmem:[%s3243_s17 + $0x150] sm:$0xff]  ;;  %v3580_v5 = vpack.i.bf16 %v3566_v40, %v3563_v32 }
  0x83   : > { %v3582_v8 = vpack.i.bf16 %v2314_v41, %v2313_v22 }
  0x84   : > { %2772 = vrot.lane.b32.xlu2 %v2771_v11, %s3202_s20 }
  0x85   : > { %2767 = vrot.lane.b32.xlu1 %v2766_v49, %s3202_s20  ;;  %2762 = vrot.lane.b32.xlu0 %v3554_v47, %s3202_s20 }
  0x86   : > { %v2608_v58 = vpop.permute.xlu2 %2607 }
  0x87   : > { %v2610_v31 = vunpack.i.h.bf16 %v2608_v58  ;;  %v2609_v48 = vunpack.i.l.bf16 %v2608_v58  ;;  %v2563_v20 = vpop.permute.xlu1 %2562  ;;  %v3570_v19 = vpop.permute.xlu0 %2552 }
  0x88   : > { %v2565_v11 = vunpack.i.h.bf16 %v2563_v20  ;;  %v2564_v36 = vunpack.i.l.bf16 %v2563_v20 }
  0x89   : > { %v3573_v49 = vsel %vm1486_vm0, %v2307_v45, %v2609_v48  ;;  %v3576_v47 = vsel %vm1486_vm0, %v2308_v46, %v2610_v31 }
  0x8a   : > { %v3586_v58 = vsel %vm1486_vm0, %v3449_v55, %v2564_v36  ;;  %v3590_v20 = vsel %vm1486_vm0, %v3452_v56, %v2565_v11 }
  0x8c   : > { %2787 = vrot.lane.b32.xlu2 %v2786_v30, %s3202_s20 }
  0x8d   : > { %2782 = vrot.lane.b32.xlu1 %v3580_v5, %s3202_s20  ;;  %2777 = vrot.lane.b32.xlu0 %v3582_v8, %s3202_s20 }
  0x8e   : > { %v2623_v31 = vpop.permute.xlu2 %2622 }
  0x8f   : > { %v2625_v48 = vunpack.i.h.bf16 %v2623_v31  ;;  %v2624_v59 = vunpack.i.l.bf16 %v2623_v31  ;;  %v3597_v45 = vpop.permute.xlu1 %2567  ;;  %v2558_v46 = vpop.permute.xlu0 %2557 }
  0x90   : > { %v2560_v56 = vunpack.i.h.bf16 %v2558_v46  ;;  %v2559_v30 = vunpack.i.l.bf16 %v2558_v46 }
  0x91   : > { %v3600_v36 = vsel %vm1486_vm0, %v2313_v22, %v2624_v59  ;;  %v3603_v55 = vsel %vm1486_vm0, %v2314_v41, %v2625_v48 }
  0x92   : > { %v1489_v41 = vsel %vm1486_vm0, %v3416_v37, %v2559_v30  ;;  %v1490_v48 = vsel %vm1486_vm0, %v3423_v38, %v2560_v56 }
  0x94   : > { %2802 = vrot.lane.b32.xlu2 %v3268_v16, %s3203_s21 }
  0x95   : > { %2797 = vrot.lane.b32.xlu1 %v3253_v7, %s3203_s21  ;;  %2792 = vrot.lane.b32.xlu0 %v3270_v17, %s3203_s21 }
  0x96   : > { %v2638_v10 = vpop.permute.xlu2 %2637 }
  0x97   : > { %v2640_v11 = vunpack.i.h.bf16 %v2638_v10  ;;  %v2639_v22 = vunpack.i.l.bf16 %v2638_v10  ;;  %v2588_v31 = vpop.permute.xlu1 %2587  ;;  %v3611_v59 = vpop.permute.xlu0 %2582 }
  0x99   : > { %v3618_v16 = vsel %vm1519_vm1, %v1489_v41, %v2639_v22  ;;  %v3621_v7 = vsel %vm1519_vm1, %v1490_v48, %v2640_v11  ;;  %v2589_v11 = vunpack.i.l.bf16 %v2588_v31 }
  0x9c   : > { %2817 = vrot.lane.b32.xlu2 %v3288_v26, %s3203_s21  ;;  %v2590_v26 = vunpack.i.h.bf16 %v2588_v31 }
  0x9d   : > { %2812 = vrot.lane.b32.xlu1 %v3266_v15, %s3203_s21  ;;  %2807 = vrot.lane.b32.xlu0 %v3248_v3, %s3203_s21 }
  0x9e   : > { %v2653_v17 = vpop.permute.xlu2 %2652 }
  0x9f   : > { %v2655_v37 = vunpack.i.h.bf16 %v2653_v17  ;;  %v2654_v46 = vunpack.i.l.bf16 %v2653_v17  ;;  %v2603_v30 = vpop.permute.xlu1 %2602  ;;  %v3629_v38 = vpop.permute.xlu0 %2597  ;;  %v2555_v17 = vunpack.i.h.bf16 %v3570_v19 }
  0xa0   : > { %v2604_v48 = vunpack.i.l.bf16 %v2603_v30 }
  0xa1   : > { %v3633_v56 = vsel %vm1519_vm1, %v3487_v14, %v2654_v46  ;;  %v3637_v10 = vsel %vm1519_vm1, %v3490_v18, %v2655_v37  ;;  %v1501_v18 = vsel %vm1486_vm0, %v3467_v63, %v2589_v11  ;;  %v2554_v37 = vunpack.i.l.bf16 %v3570_v19  ;;  %v172_v63 = vld [vmem:[%s3243_s17] sm:$0xff] }
  0xa4   : > { %2832 = vrot.lane.b32.xlu2 %v3306_v35, %s3203_s21  ;;  %v1502_v35 = vsel %vm1486_vm0, %v3474_v0, %v2590_v26  ;;  %v173_v0 = vld [vmem:[%s3243_s17 + $0x8] sm:$0xff] }
  0xa5   : > { %2827 = vrot.lane.b32.xlu1 %v3284_v24, %s3203_s21  ;;  %2822 = vrot.lane.b32.xlu0 %v3286_v25, %s3203_s21  ;;  %v2605_v25 = vunpack.i.h.bf16 %v2603_v30 }
  0xa6   : > { %v2668_v3 = vpop.permute.xlu2 %2667 }
  0xa7   : > { %v2670_v15 = vunpack.i.h.bf16 %v2668_v3  ;;  %v2669_v14 = vunpack.i.l.bf16 %v2668_v3  ;;  %v2618_v22 = vpop.permute.xlu1 %2617  ;;  %v3645_v41 = vpop.permute.xlu0 %2612  ;;  %v1508_v19 = vsel %vm1486_vm0, %v3504_v28, %v2605_v25 }
  0xa8   : > { %v2620_v25 = vunpack.i.h.bf16 %v2618_v22 }
  0xa9   : > { %v3652_v31 = vsel %vm1519_vm1, %v1501_v18, %v2669_v14  ;;  %v3655_v24 = vsel %vm1519_vm1, %v1502_v35, %v2670_v15 }
  0xac   : > { %2847 = vrot.lane.b32.xlu2 %v3324_v44, %s3203_s21  ;;  %v1507_v44 = vsel %vm1486_vm0, %v3498_v27, %v2604_v48  ;;  %v2619_v48 = vunpack.i.l.bf16 %v2618_v22 }
  0xad   : > { %2842 = vrot.lane.b32.xlu1 %v3302_v33, %s3203_s21  ;;  %2837 = vrot.lane.b32.xlu0 %v3304_v34, %s3203_s21  ;;  %v1487_v33 = vsel %vm1486_vm0, %v172_v63, %v2554_v37  ;;  %v1488_v34 = vsel %vm1486_vm0, %v173_v0, %v2555_v17  ;;  %v2570_v37 = vunpack.i.h.bf16 %v3597_v45  ;;  %v2349_v0 = vld [vmem:[%s3243_s17 + $0x181] sm:$0xff] }
  0xae   : > { %v2683_v46 = vpop.permute.xlu2 %2682  ;;  %v1513_v22 = vsel %vm1486_vm0, %v3529_v13, %v2619_v48  ;;  %v2584_v48 = vunpack.i.l.bf16 %v3611_v59 }
  0xaf   : > { %v2685_v26 = vunpack.i.h.bf16 %v2683_v46  ;;  %v2684_v11 = vunpack.i.l.bf16 %v2683_v46  ;;  %v2633_v3 = vpop.permute.xlu1 %2632  ;;  %v3667_v30 = vpop.permute.xlu0 %2627  ;;  %v2569_v46 = vunpack.i.l.bf16 %v3597_v45 }
  0xb0   : > { %v2635_v15 = vunpack.i.h.bf16 %v2633_v3  ;;  %v2634_v14 = vunpack.i.l.bf16 %v2633_v3 }
  0xb1   : > { %v3676_v18 = vsel %vm1519_vm1, %v1507_v44, %v2684_v11  ;;  %v3679_v35 = vsel %vm1519_vm1, %v1508_v19, %v2685_v26  ;;  %v1493_v17 = vsel %vm1486_vm0, %v3443_v52, %v2569_v46  ;;  %v2350_v26 = vld [vmem:[%s3243_s17 + $0x189] sm:$0xff]  ;;  %v1494_v52 = vsel %vm1486_vm0, %v3446_v54, %v2570_v37 }
  0xb2   : > { %v1520_v27 = vsel %vm1519_vm1, %v1487_v33, %v2634_v14  ;;  %v1521_v28 = vsel %vm1519_vm1, %v1488_v34, %v2635_v15  ;;  %v3707_v13 = vpack.i.bf16 %v2350_v26, %v2349_v0  ;;  %v2585_v54 = vunpack.i.h.bf16 %v3611_v59 }
  0xb4   : > { %2862 = vrot.lane.b32.xlu2 %v3340_v53, %s3203_s21  ;;  %v1514_v53 = vsel %vm1486_vm0, %v3534_v23, %v2620_v25  ;;  %v1500_v59 = vsel %vm1486_vm0, %v3480_v4, %v2585_v54  ;;  %v2600_v4 = vunpack.i.h.bf16 %v3629_v38 }
  0xb5   : > { %2857 = vrot.lane.b32.xlu1 %v3320_v42, %s3203_s21  ;;  %2852 = vrot.lane.b32.xlu0 %v3322_v43, %s3203_s21 }
  0xb6   : > { %v2698_v63 = vpop.permute.xlu2 %2697 }
  0xb7   : > { %v2700_v11 = vunpack.i.h.bf16 %v2698_v63  ;;  %v2699_v45 = vunpack.i.l.bf16 %v2698_v63  ;;  %v2648_v3 = vpop.permute.xlu1 %2647  ;;  %v2643_v44 = vpop.permute.xlu0 %2642 }
  0xb8   : > { %v2650_v42 = vunpack.i.h.bf16 %v2648_v3  ;;  %v2649_v19 = vunpack.i.l.bf16 %v2648_v3  ;;  %v2645_v15 = vunpack.i.h.bf16 %v2643_v44  ;;  %v2644_v43 = vunpack.i.l.bf16 %v2643_v44 }
  0xb9   : > { %v3702_v14 = vsel %vm1519_vm1, %v1513_v22, %v2699_v45  ;;  %v3705_v33 = vsel %vm1519_vm1, %v1514_v53, %v2700_v11  ;;  %v1499_v53 = vsel %vm1486_vm0, %v3477_v1, %v2584_v48 }
  0xba   : > { %v1526_v23 = vsel %vm1519_vm1, %v1493_v17, %v2649_v19  ;;  %v1527_v34 = vsel %vm1519_vm1, %v1494_v52, %v2650_v42  ;;  %v3713_v46 = vsel %vm1519_vm1, %v3586_v58, %v2644_v43  ;;  %v3717_v25 = vsel %vm1519_vm1, %v3590_v20, %v2645_v15 }
  0xbc   : > { %2877 = vrot.lane.b32.xlu2 %v3357_v62, %s3204_s22 }
  0xbd   : > { %2872 = vrot.lane.b32.xlu1 %v3338_v51, %s3204_s22  ;;  %2867 = vrot.lane.b32.xlu0 %v3707_v13, %s3203_s21 }
  0xbe   : > { %v2713_v58 = vpop.permute.xlu2 %2712 }
  0xbf   : > { %v2715_v37 = vunpack.i.h.bf16 %v2713_v58  ;;  %v2714_v17 = vunpack.i.l.bf16 %v2713_v58  ;;  %v2663_v20 = vpop.permute.xlu1 %2662  ;;  %v2658_v63 = vpop.permute.xlu0 %2657 }
  0xc0   : > { %v2665_v0 = vunpack.i.h.bf16 %v2663_v20  ;;  %v2664_v26 = vunpack.i.l.bf16 %v2663_v20  ;;  %v2660_v22 = vunpack.i.h.bf16 %v2658_v63  ;;  %v2659_v62 = vunpack.i.l.bf16 %v2658_v63 }
  0xc1   : > { %v3732_v51 = vsel %vm1552_vm2, %v1520_v27, %v2714_v17  ;;  %v3735_v11 = vsel %vm1552_vm2, %v1521_v28, %v2715_v37  ;;  %v2599_v27 = vunpack.i.l.bf16 %v3629_v38  ;;  %v1506_v38 = vsel %vm1486_vm0, %v3510_v39, %v2600_v4 }
  0xc2   : > { %v1532_v45 = vsel %vm1519_vm1, %v1499_v53, %v2664_v26  ;;  %v1533_v3 = vsel %vm1519_vm1, %v1500_v59, %v2665_v0  ;;  %v3741_v44 = vsel %vm1519_vm1, %v3519_v50, %v2659_v62  ;;  %v3745_v1 = vsel %vm1519_vm1, %v3522_v2, %v2660_v22  ;;  %v4750_v59 = vld [vmem:[#allocation16_spill] sm:$0xff] }
  0xc3   : > { %v2615_v39 = vunpack.i.h.bf16 %v3645_v41 }
  0xc4   : > { %2892 = vrot.lane.b32.xlu2 %v3375_v9, %s3204_s22  ;;  %v1505_v9 = vsel %vm1486_vm0, %v3507_v29, %v2599_v27 }
  0xc5   : > { %2887 = vrot.lane.b32.xlu1 %v3353_v60, %s3204_s22  ;;  %2882 = vrot.lane.b32.xlu0 %v3355_v61, %s3204_s22 }
  0xc6   : > { %v2728_v28 = vpop.permute.xlu2 %2727 }
  0xc7   : > { %v2730_v50 = vunpack.i.h.bf16 %v2728_v28  ;;  %v2729_v42 = vunpack.i.l.bf16 %v2728_v28  ;;  %v2678_v19 = vpop.permute.xlu1 %2677  ;;  %v2673_v15 = vpop.permute.xlu0 %2672 }
  0xc8   : > { %v2680_v2 = vunpack.i.h.bf16 %v2678_v19  ;;  %v2679_v43 = vunpack.i.l.bf16 %v2678_v19  ;;  %v2675_v52 = vunpack.i.h.bf16 %v2673_v15  ;;  %v2674_v54 = vunpack.i.l.bf16 %v2673_v15  ;;  %v4751_v19 = vld [vmem:[#allocation7_spill] sm:$0xff] }
  0xc9   : > { %v3760_v60 = vsel %vm1552_vm2, %v1526_v23, %v2729_v42  ;;  %v3763_v61 = vsel %vm1552_vm2, %v1527_v34, %v2730_v50  ;;  %v2614_v23 = vunpack.i.l.bf16 %v3645_v41  ;;  %v4748_v34 = vld [vmem:[#allocation2_spill] sm:$0xff]  ;;  %v1512_v41 = vsel %vm1486_vm0, %v4750_v59, %v2615_v39  ;;  %v4752_v15 = vld [vmem:[#allocation3_spill] sm:$0xff] }
  0xca   : > { %v1538_v48 = vsel %vm1519_vm1, %v1505_v9, %v2679_v43  ;;  %v1539_v58 = vsel %vm1519_vm1, %v1506_v38, %v2680_v2  ;;  %v3769_v37 = vsel %vm1519_vm1, %v3547_v12, %v2674_v54  ;;  %v3773_v29 = vsel %vm1519_vm1, %v3550_v57, %v2675_v52  ;;  %v4753_v2 = vld [vmem:[#allocation4_spill] sm:$0xff] }
  0xcc   : > { %2907 = vrot.lane.b32.xlu2 %v3393_v21, %s3204_s22  ;;  %v4749_v21 = vld [vmem:[#allocation15_spill] sm:$0xff] }
  0xcd   : > { %2902 = vrot.lane.b32.xlu1 %v3371_v6, %s3204_s22  ;;  %2897 = vrot.lane.b32.xlu0 %v4748_v34, %s3204_s22  ;;  %v1511_v53 = vsel %vm1486_vm0, %v4749_v21, %v2614_v23 }
  0xce   : > { %v2743_v17 = vpop.permute.xlu2 %2742 }
  0xcf   : > { %v2745_v12 = vunpack.i.h.bf16 %v2743_v17  ;;  %v2744_v20 = vunpack.i.l.bf16 %v2743_v17  ;;  %v2693_v63 = vpop.permute.xlu1 %2692  ;;  %v2688_v0 = vpop.permute.xlu0 %2687 }
  0xd0   : > { %v2695_v57 = vunpack.i.h.bf16 %v2693_v63  ;;  %v2694_v26 = vunpack.i.l.bf16 %v2693_v63  ;;  %v2690_v22 = vunpack.i.h.bf16 %v2688_v0  ;;  %v2689_v62 = vunpack.i.l.bf16 %v2688_v0 }
  0xd1   : > { %v3788_v6 = vsel %vm1552_vm2, %v1532_v45, %v2744_v20  ;;  %v3791_v4 = vsel %vm1552_vm2, %v1533_v3, %v2745_v12  ;;  %v2630_v45 = vunpack.i.h.bf16 %v3667_v30  ;;  %v2629_v3 = vunpack.i.l.bf16 %v3667_v30 }
  0xd2   : > { %v1544_v27 = vsel %vm1519_vm1, %v1511_v53, %v2694_v26  ;;  %v1545_v28 = vsel %vm1519_vm1, %v1512_v41, %v2695_v57  ;;  %v3797_v50 = vsel %vm1519_vm1, %v3573_v49, %v2689_v62  ;;  %v3801_v42 = vsel %vm1519_vm1, %v3576_v47, %v2690_v22  ;;  %v2381_v26 = vld [vmem:[%s3243_s17 + $0x182] sm:$0xff]  ;;  %v2382_v22 = vld [vmem:[%s3243_s17 + $0x18a] sm:$0xff] }
  0xd3   : > { %v1517_v30 = vsel %vm1486_vm0, %v3563_v32, %v2629_v3  ;;  %v1518_v34 = vsel %vm1486_vm0, %v3566_v40, %v2630_v45  ;;  %v4754_v40 = vld [vmem:[#allocation9_spill] sm:$0xff]  ;;  %vm2087_vm0 = vcmask 1047559  }
  0xd4   : > { %2922 = vrot.lane.b32.xlu2 %v4751_v19, %s3204_s22 }
  0xd5   : > { %2917 = vrot.lane.b32.xlu1 %v4752_v15, %s3204_s22  ;;  %2912 = vrot.lane.b32.xlu0 %v4753_v2, %s3204_s22  ;;  %v3845_v2 = vpack.i.bf16 %v2382_v22, %v2381_v26  ;;  %v4761_v26 = vld [vmem:[#allocation11_spill] sm:$0xff]  ;;  %v2432_v22 = vld [vmem:[%s3243_s17 + $0xf9] sm:$0xff] }
  0xd6   : > { %v2758_v43 = vpop.permute.xlu2 %2757 }
  0xd7   : > { %v2760_v49 = vunpack.i.h.bf16 %v2758_v43  ;;  %v2759_v52 = vunpack.i.l.bf16 %v2758_v43  ;;  %v2708_v54 = vpop.permute.xlu1 %2707  ;;  %v2703_v9 = vpop.permute.xlu0 %2702 }
  0xd8   : > { %v2710_v47 = vunpack.i.h.bf16 %v2708_v54  ;;  %v2709_v38 = vunpack.i.l.bf16 %v2708_v54  ;;  %v2705_v39 = vunpack.i.h.bf16 %v2703_v9  ;;  %v2704_v23 = vunpack.i.l.bf16 %v2703_v9 }
  0xd9   : > { %v3816_v17 = vsel %vm1552_vm2, %v1538_v48, %v2759_v52  ;;  %v3819_v12 = vsel %vm1552_vm2, %v1539_v58, %v2760_v49  ;;  %v4755_v48 = vld [vmem:[#allocation5_spill] sm:$0xff]  ;;  %v4756_v58 = vld [vmem:[#allocation6_spill] sm:$0xff] }
  0xda   : > { %v1550_v20 = vsel %vm1519_vm1, %v1517_v30, %v2709_v38  ;;  %v1551_v63 = vsel %vm1519_vm1, %v1518_v34, %v2710_v47  ;;  %v3825_v0 = vsel %vm1519_vm1, %v3600_v36, %v2704_v23  ;;  %v3829_v32 = vsel %vm1519_vm1, %v3603_v55, %v2705_v39 }
  0xdb   : > { %vm2217_vm1 = vcmask 785408  }
  0xdc   : > { %2937 = vrot.lane.b32.xlu2 %v4754_v40, %s3204_s22 }
  0xdd   : > { %2932 = vrot.lane.b32.xlu1 %v4755_v48, %s3204_s22  ;;  %2927 = vrot.lane.b32.xlu0 %v4756_v58, %s3204_s22 }
  0xde   : > { %v2773_v57 = vpop.permute.xlu2 %2772 }
  0xdf   : > { %v2775_v62 = vunpack.i.h.bf16 %v2773_v57  ;;  %v2774_v21 = vunpack.i.l.bf16 %v2773_v57  ;;  %v2723_v36 = vpop.permute.xlu1 %2722  ;;  %v2718_v53 = vpop.permute.xlu0 %2717 }
  0xe0   : > { %v2725_v59 = vunpack.i.h.bf16 %v2723_v36  ;;  %v2724_v41 = vunpack.i.l.bf16 %v2723_v36  ;;  %v2720_v55 = vunpack.i.h.bf16 %v2718_v53  ;;  %v2719_v19 = vunpack.i.l.bf16 %v2718_v53 }
  0xe1   : > { %v3840_v45 = vsel %vm1552_vm2, %v1544_v27, %v2774_v21  ;;  %v3843_v3 = vsel %vm1552_vm2, %v1545_v28, %v2775_v62  ;;  %v4757_v27 = vld [vmem:[#allocation12_spill] sm:$0xff] }
  0xe2   : > { %v1557_v43 = vsel %vm1552_vm2, %v3713_v46, %v2724_v41  ;;  %v1558_v49 = vsel %vm1552_vm2, %v3717_v25, %v2725_v59  ;;  %v3853_v52 = vsel %vm1552_vm2, %v3618_v16, %v2719_v19  ;;  %v3857_v54 = vsel %vm1552_vm2, %v3621_v7, %v2720_v55  ;;  %v4758_v46 = vld [vmem:[#allocation8_spill] sm:$0xff] }
  0xe4   : > { %2952 = vrot.lane.b32.xlu2 %v4757_v27, %s3205_s23 }
  0xe5   : > { %2947 = vrot.lane.b32.xlu1 %v3845_v2, %s3204_s22  ;;  %2942 = vrot.lane.b32.xlu0 %v4758_v46, %s3204_s22 }
  0xe6   : > { %v2788_v28 = vpop.permute.xlu2 %2787 }
  0xe7   : > { %v2790_v25 = vunpack.i.h.bf16 %v2788_v28  ;;  %v2789_v9 = vunpack.i.l.bf16 %v2788_v28  ;;  %v2738_v47 = vpop.permute.xlu1 %2737  ;;  %v2733_v16 = vpop.permute.xlu0 %2732 }
  0xe8   : > { %v2740_v38 = vunpack.i.h.bf16 %v2738_v47  ;;  %v2739_v7 = vunpack.i.l.bf16 %v2738_v47  ;;  %v2735_v39 = vunpack.i.h.bf16 %v2733_v16  ;;  %v2734_v23 = vunpack.i.l.bf16 %v2733_v16 }
  0xe9   : > { %v3866_v30 = vsel %vm1552_vm2, %v1550_v20, %v2789_v9  ;;  %v3869_v34 = vsel %vm1552_vm2, %v1551_v63, %v2790_v25  ;;  %v4759_v20 = vld [vmem:[#allocation14_spill] sm:$0xff] }
  0xea   : > { %v1563_v40 = vsel %vm1552_vm2, %v3741_v44, %v2739_v7  ;;  %v1564_v48 = vsel %vm1552_vm2, %v3745_v1, %v2740_v38  ;;  %v3877_v58 = vsel %vm1552_vm2, %v3633_v56, %v2734_v23  ;;  %v3881_v57 = vsel %vm1552_vm2, %v3637_v10, %v2735_v39  ;;  %v4760_v63 = vld [vmem:[#allocation10_spill] sm:$0xff]  ;;  %v2431_v1 = vld [vmem:[%s3243_s17 + $0xf1] sm:$0xff] }
  0xeb   : > { %v2971_v27 = vpack.i.bf16 %v2432_v22, %v2431_v1 }
  0xec   : > { %2967 = vrot.lane.b32.xlu2 %v4759_v20, %s3205_s23 }
  0xed   : > { %2962 = vrot.lane.b32.xlu1 %v4760_v63, %s3205_s23  ;;  %2957 = vrot.lane.b32.xlu0 %v4761_v26, %s3205_s23 }
  0xee   : > { %v2803_v44 = vpop.permute.xlu2 %2802 }
  0xef   : > { %v2805_v62 = vunpack.i.h.bf16 %v2803_v44  ;;  %v2804_v56 = vunpack.i.l.bf16 %v2803_v44  ;;  %v2753_v21 = vpop.permute.xlu1 %2752  ;;  %v2748_v36 = vpop.permute.xlu0 %2747 }
  0xf0   : > { %v2755_v53 = vunpack.i.h.bf16 %v2753_v21  ;;  %v2754_v10 = vunpack.i.l.bf16 %v2753_v21  ;;  %v2750_v59 = vunpack.i.h.bf16 %v2748_v36  ;;  %v2749_v41 = vunpack.i.l.bf16 %v2748_v36  ;;  %v2447_v36 = vld [vmem:[%s3243_s17 + $0x32] sm:$0xff] }
  0xf1   : > { %v3892_v55 = vsel %vm1585_vm3, %v1557_v43, %v2804_v56  ;;  %v3895_v19 = vsel %vm1585_vm3, %v1558_v49, %v2805_v62  ;;  %v2440_v43 = vld [vmem:[%s3243_s17 + $0x159] sm:$0xff]  ;;  %v2415_v49 = vld [vmem:[%s3243_s17 + $0x31] sm:$0xff] }
  0xf2   : > { %v1569_v46 = vsel %vm1552_vm2, %v3769_v37, %v2754_v10  ;;  %v1570_v28 = vsel %vm1552_vm2, %v3773_v29, %v2755_v53  ;;  %v3903_v25 = vsel %vm1552_vm2, %v3652_v31, %v2749_v41  ;;  %v3907_v9 = vsel %vm1552_vm2, %v3655_v24, %v2750_v59  ;;  %v2439_v37 = vld [vmem:[%s3243_s17 + $0x151] sm:$0xff]  ;;  %v2416_v31 = vld [vmem:[%s3243_s17 + $0x39] sm:$0xff] }
  0xf3   : > { %v2991_v63 = vpack.i.bf16 %v2440_v43, %v2439_v37  ;;  %v2986_v26 = vpack.i.bf16 %v2416_v31, %v2415_v49  ;;  %v2423_v62 = vld [vmem:[%s3243_s17 + $0x91] sm:$0xff]  ;;  %v2424_v56 = vld [vmem:[%s3243_s17 + $0x99] sm:$0xff] }
  0xf4   : > { %2982 = vrot.lane.b32.xlu2 %v4752_v15, %s3206_s24  ;;  %v2448_v53 = vld [vmem:[%s3243_s17 + $0x3a] sm:$0xff]  ;;  %v3011_v41 = vpack.i.bf16 %v2424_v56, %v2423_v62 }
  0xf5   : > { %2977 = vrot.lane.b32.xlu1 %v3582_v8, %s3205_s23  ;;  %2972 = vrot.lane.b32.xlu0 %v2971_v27, %s3207_s25 }
  0xf6   : > { %v2818_v29 = vpop.permute.xlu2 %2817 }
  0xf7   : > { %v2820_v47 = vunpack.i.h.bf16 %v2818_v29  ;;  %v2819_v16 = vunpack.i.l.bf16 %v2818_v29  ;;  %v2768_v24 = vpop.permute.xlu1 %2767  ;;  %v2763_v38 = vpop.permute.xlu0 %2762 }
  0xf8   : > { %v2770_v7 = vunpack.i.h.bf16 %v2768_v24  ;;  %v2769_v39 = vunpack.i.l.bf16 %v2768_v24  ;;  %v2765_v15 = vunpack.i.h.bf16 %v2763_v38  ;;  %v2764_v23 = vunpack.i.l.bf16 %v2763_v38 }
  0xf9   : > { %v3919_v8 = vsel %vm1585_vm3, %v1563_v40, %v2819_v16  ;;  %v3922_v20 = vsel %vm1585_vm3, %v1564_v48, %v2820_v47  ;;  %v4762_v48 = vld [vmem:[#allocation13_spill] sm:$0xff]  ;;  %v3001_v16 = vpack.i.bf16 %v2448_v53, %v2447_v36 }
  0xfa   : > { %v1575_v44 = vsel %vm1552_vm2, %v3797_v50, %v2769_v39  ;;  %v1576_v1 = vsel %vm1552_vm2, %v3801_v42, %v2770_v7  ;;  %v3930_v22 = vsel %vm1552_vm2, %v3676_v18, %v2764_v23  ;;  %v3934_v40 = vsel %vm1552_vm2, %v3679_v35, %v2765_v15  ;;  %v2471_v50 = vld [vmem:[%s3243_s17 + $0x152] sm:$0xff]  ;;  %v2472_v42 = vld [vmem:[%s3243_s17 + $0x15a] sm:$0xff] }
  0xfb   : > { %v3006_v47 = vpack.i.bf16 %v2472_v42, %v2471_v50  ;;  %v2455_v15 = vld [vmem:[%s3243_s17 + $0x92] sm:$0xff]  ;;  %v2456_v23 = vld [vmem:[%s3243_s17 + $0x9a] sm:$0xff] }
  0xfc   : > { %2997 = vrot.lane.b32.xlu2 %v4762_v48, %s3205_s23  ;;  %v3016_v36 = vpack.i.bf16 %v2456_v23, %v2455_v15 }
  0xfd   : > { %2992 = vrot.lane.b32.xlu1 %v2991_v63, %s3207_s25  ;;  %2987 = vrot.lane.b32.xlu0 %v2986_v26, %s3207_s25 }
  0xfe   : > { %v2833_v21 = vpop.permute.xlu2 %2832 }
  0xff   : > { %v2835_v18 = vunpack.i.h.bf16 %v2833_v21  ;;  %v2834_v10 = vunpack.i.l.bf16 %v2833_v21  ;;  %v2783_v59 = vpop.permute.xlu1 %2782  ;;  %v2778_v35 = vpop.permute.xlu0 %2777 }
 0x100   : > { %v2785_v27 = vunpack.i.h.bf16 %v2783_v59  ;;  %v2784_v37 = vunpack.i.l.bf16 %v2783_v59  ;;  %v2780_v29 = vunpack.i.h.bf16 %v2778_v35  ;;  %v2779_v43 = vunpack.i.l.bf16 %v2778_v35  ;;  %v4763_v35 = vld [vmem:[#allocation17_spill] sm:$0xff] }
 0x101   : > { %v3947_v49 = vsel %vm1585_vm3, %v1569_v46, %v2834_v10  ;;  %v3950_v31 = vsel %vm1585_vm3, %v1570_v28, %v2835_v18  ;;  %v2433_v46 = vld [vmem:[%s3243_s17 + $0x109] sm:$0xff]  ;;  %v2434_v28 = vld [vmem:[%s3243_s17 + $0x111] sm:$0xff] }
 0x102   : > { %v1581_v24 = vsel %vm1552_vm2, %v3825_v0, %v2784_v37  ;;  %v1582_v38 = vsel %vm1552_vm2, %v3829_v32, %v2785_v27  ;;  %v3958_v7 = vsel %vm1552_vm2, %v3702_v14, %v2779_v43  ;;  %v3962_v39 = vsel %vm1552_vm2, %v3705_v33, %v2780_v29 }
 0x103   : > { %v3026_v48 = vpack.i.bf16 %v2434_v28, %v2433_v46 }
 0x104   : > { %3012 = vrot.lane.b32.xlu2 %v3011_v41, %s3207_s25  ;;  %v2465_v41 = vld [vmem:[%s3243_s17 + $0x10a] sm:$0xff] }
 0x105   : > { %3007 = vrot.lane.b32.xlu1 %v3006_v47, %s3206_s24  ;;  %3002 = vrot.lane.b32.xlu0 %v3001_v16, %s3206_s24 }
 0x106   : > { %v2848_v0 = vpop.permute.xlu2 %2847 }
 0x107   : > { %v2850_v32 = vunpack.i.h.bf16 %v2848_v0  ;;  %v2849_v63 = vunpack.i.l.bf16 %v2848_v0  ;;  %v2798_v14 = vpop.permute.xlu1 %2797  ;;  %v2793_v26 = vpop.permute.xlu0 %2792 }
 0x108   : > { %v2800_v33 = vunpack.i.h.bf16 %v2798_v14  ;;  %v2799_v62 = vunpack.i.l.bf16 %v2798_v14  ;;  %v2795_v56 = vunpack.i.h.bf16 %v2793_v26  ;;  %v2794_v50 = vunpack.i.l.bf16 %v2793_v26  ;;  %v2450_v14 = vld [vmem:[%s3243_s17 + $0x52] sm:$0xff] }
 0x109   : > { %v3972_v21 = vsel %vm1585_vm3, %v1575_v44, %v2849_v63  ;;  %v3975_v42 = vsel %vm1585_vm3, %v1576_v1, %v2850_v32  ;;  %v2417_v44 = vld [vmem:[%s3243_s17 + $0x49] sm:$0xff]  ;;  %v2418_v1 = vld [vmem:[%s3243_s17 + $0x51] sm:$0xff] }
 0x10a   : > { %v1588_v53 = vsel %vm1585_vm3, %v3853_v52, %v2799_v62  ;;  %v1589_v18 = vsel %vm1585_vm3, %v3857_v54, %v2800_v33  ;;  %v3983_v10 = vsel %vm1585_vm3, %v3732_v51, %v2794_v50  ;;  %v3987_v59 = vsel %vm1585_vm3, %v3735_v11, %v2795_v56  ;;  %v2466_v54 = vld [vmem:[%s3243_s17 + $0x112] sm:$0xff] }
 0x10b   : > { %v3041_v11 = vpack.i.bf16 %v2418_v1, %v2417_v44  ;;  %v3036_v15 = vpack.i.bf16 %v2466_v54, %v2465_v41  ;;  %v2394_v26 = vld [vmem:[%s3243_s17 + $0xb0] sm:$0xff] }
 0x10c   : > { %3027 = vrot.lane.b32.xlu2 %v3026_v48, %s3207_s25  ;;  %v2441_v48 = vld [vmem:[%s3243_s17 + $0x169] sm:$0xff] }
 0x10d   : > { %3022 = vrot.lane.b32.xlu1 %v4763_v35, %s3205_s23  ;;  %3017 = vrot.lane.b32.xlu0 %v3016_v36, %s3206_s24 }
 0x10e   : > { %v2863_v52 = vpop.permute.xlu2 %2862 }
 0x10f   : > { %v2865_v27 = vunpack.i.h.bf16 %v2863_v52  ;;  %v2864_v37 = vunpack.i.l.bf16 %v2863_v52  ;;  %v2813_v51 = vpop.permute.xlu1 %2812  ;;  %v2808_v29 = vpop.permute.xlu0 %2807 }
 0x110   : > { %v2815_v43 = vunpack.i.h.bf16 %v2813_v51  ;;  %v2814_v47 = vunpack.i.l.bf16 %v2813_v51  ;;  %v2810_v16 = vunpack.i.h.bf16 %v2808_v29  ;;  %v2809_v46 = vunpack.i.l.bf16 %v2808_v29  ;;  %v2458_v29 = vld [vmem:[%s3243_s17 + $0xb2] sm:$0xff] }
 0x111   : > { %v3998_v28 = vsel %vm1585_vm3, %v1581_v24, %v2864_v37  ;;  %v4001_v0 = vsel %vm1585_vm3, %v1582_v38, %v2865_v27  ;;  %v2449_v38 = vld [vmem:[%s3243_s17 + $0x4a] sm:$0xff] }
 0x112   : > { %v1594_v23 = vsel %vm1585_vm3, %v3877_v58, %v2814_v47  ;;  %v1595_v32 = vsel %vm1585_vm3, %v3881_v57, %v2815_v43  ;;  %v4009_v63 = vsel %vm1585_vm3, %v3760_v60, %v2809_v46  ;;  %v4013_v24 = vsel %vm1585_vm3, %v3763_v61, %v2810_v16  ;;  %v2393_v58 = vld [vmem:[%s3243_s17 + $0xa8] sm:$0xff]  ;;  %v2442_v60 = vld [vmem:[%s3243_s17 + $0x171] sm:$0xff] }
 0x113   : > { %v3056_v50 = vpack.i.bf16 %v2450_v14, %v2449_v38  ;;  %v3051_v41 = vpack.i.bf16 %v2394_v26, %v2393_v58  ;;  %v3046_v54 = vpack.i.bf16 %v2442_v60, %v2441_v48  ;;  %v2426_v43 = vld [vmem:[%s3243_s17 + $0xb1] sm:$0xff] }
 0x114   : > { %3042 = vrot.lane.b32.xlu2 %v3041_v11, %s3207_s25  ;;  %v2474_v47 = vld [vmem:[%s3243_s17 + $0x172] sm:$0xff] }
 0x115   : > { %3037 = vrot.lane.b32.xlu1 %v3036_v15, %s3206_s24  ;;  %3032 = vrot.lane.b32.xlu0 %v3580_v5, %s3205_s23 }
 0x116   : > { %v2878_v57 = vpop.permute.xlu2 %2877 }
 0x117   : > { %v2880_v33 = vunpack.i.h.bf16 %v2878_v57  ;;  %v2879_v62 = vunpack.i.l.bf16 %v2878_v57  ;;  %v2828_v56 = vpop.permute.xlu1 %2827  ;;  %v2823_v61 = vpop.permute.xlu0 %2822 }
 0x118   : > { %v2830_v36 = vunpack.i.h.bf16 %v2828_v56  ;;  %v2829_v44 = vunpack.i.l.bf16 %v2828_v56  ;;  %v2825_v1 = vunpack.i.h.bf16 %v2823_v61  ;;  %v2824_v35 = vunpack.i.l.bf16 %v2823_v61 }
 0x119   : > { %v4026_v5 = vsel %vm1618_vm4, %v1588_v53, %v2879_v62  ;;  %v4029_v52 = vsel %vm1618_vm4, %v1589_v18, %v2880_v33  ;;  %v2457_v18 = vld [vmem:[%s3243_s17 + $0xaa] sm:$0xff] }
 0x11a   : > { %v1600_v27 = vsel %vm1585_vm3, %v3903_v25, %v2829_v44  ;;  %v1601_v37 = vsel %vm1585_vm3, %v3907_v9, %v2830_v36  ;;  %v4037_v51 = vsel %vm1585_vm3, %v3788_v6, %v2824_v35  ;;  %v4041_v53 = vsel %vm1585_vm3, %v3791_v4, %v2825_v1  ;;  %v2425_v25 = vld [vmem:[%s3243_s17 + $0xa9] sm:$0xff] }
 0x11b   : > { %v2473_v9 = vld [vmem:[%s3243_s17 + $0x16a] sm:$0xff]  ;;  %v3071_v4 = vpack.i.bf16 %v2458_v29, %v2457_v18  ;;  %v3066_v60 = vpack.i.bf16 %v2426_v43, %v2425_v25 }
 0x11c   : > { %3057 = vrot.lane.b32.xlu2 %v3056_v50, %s3206_s24  ;;  %v3061_v33 = vpack.i.bf16 %v2474_v47, %v2473_v9  ;;  %v2412_v50 = vld [vmem:[%s3243_s17 + $0x188] sm:$0xff] }
 0x11d   : > { %3052 = vrot.lane.b32.xlu1 %v3051_v41, %s3205_s23  ;;  %3047 = vrot.lane.b32.xlu0 %v3046_v54, %s3207_s25  ;;  %v2436_v44 = vld [vmem:[%s3243_s17 + $0x129] sm:$0xff] }
 0x11e   : > { %v2893_v11 = vpop.permute.xlu2 %2892  ;;  %v2404_v1 = vld [vmem:[%s3243_s17 + $0x128] sm:$0xff] }
 0x11f   : > { %v2895_v16 = vunpack.i.h.bf16 %v2893_v11  ;;  %v2894_v6 = vunpack.i.l.bf16 %v2893_v11  ;;  %v2843_v46 = vpop.permute.xlu1 %2842  ;;  %v2838_v15 = vpop.permute.xlu0 %2837 }
 0x120   : > { %v2845_v38 = vunpack.i.h.bf16 %v2843_v46  ;;  %v2844_v14 = vunpack.i.l.bf16 %v2843_v46  ;;  %v2840_v58 = vunpack.i.h.bf16 %v2838_v15  ;;  %v2839_v57 = vunpack.i.l.bf16 %v2838_v15 }
 0x121   : > { %v4053_v26 = vsel %vm1618_vm4, %v1594_v23, %v2894_v6  ;;  %v4056_v48 = vsel %vm1618_vm4, %v1595_v32, %v2895_v16  ;;  %v2411_v32 = vld [vmem:[%s3243_s17 + $0x180] sm:$0xff] }
 0x122   : > { %v1606_v62 = vsel %vm1585_vm3, %v3930_v22, %v2844_v14  ;;  %v1607_v56 = vsel %vm1585_vm3, %v3934_v40, %v2845_v38  ;;  %v4064_v61 = vsel %vm1585_vm3, %v3816_v17, %v2839_v57  ;;  %v4068_v23 = vsel %vm1585_vm3, %v3819_v12, %v2840_v58  ;;  %v2435_v22 = vld [vmem:[%s3243_s17 + $0x121] sm:$0xff]  ;;  %v2468_v14 = vld [vmem:[%s3243_s17 + $0x12a] sm:$0xff] }
 0x123   : > { %v2403_v40 = vld [vmem:[%s3243_s17 + $0x120] sm:$0xff]  ;;  %v3086_v18 = vpack.i.bf16 %v2412_v50, %v2411_v32  ;;  %v3081_v47 = vpack.i.bf16 %v2436_v44, %v2435_v22 }
 0x124   : > { %3072 = vrot.lane.b32.xlu2 %v3071_v4, %s3206_s24  ;;  %v3076_v16 = vpack.i.bf16 %v2404_v1, %v2403_v40  ;;  %v2467_v38 = vld [vmem:[%s3243_s17 + $0x122] sm:$0xff] }
 0x125   : > { %3067 = vrot.lane.b32.xlu1 %v3066_v60, %s3207_s25  ;;  %3062 = vrot.lane.b32.xlu0 %v3061_v33, %s3206_s24  ;;  %v3091_v44 = vpack.i.bf16 %v2468_v14, %v2467_v38 }
 0x126   : > { %v2908_v36 = vpop.permute.xlu2 %2907 }
 0x127   : > { %v2910_v35 = vunpack.i.h.bf16 %v2908_v36  ;;  %v2909_v17 = vunpack.i.l.bf16 %v2908_v36  ;;  %v2858_v41 = vpop.permute.xlu1 %2857  ;;  %v2853_v54 = vpop.permute.xlu0 %2852 }
 0x128   : > { %v2860_v12 = vunpack.i.h.bf16 %v2858_v41  ;;  %v2859_v29 = vunpack.i.l.bf16 %v2858_v41  ;;  %v2855_v25 = vunpack.i.h.bf16 %v2853_v54  ;;  %v2854_v11 = vunpack.i.l.bf16 %v2853_v54  ;;  %v2395_v41 = vld [vmem:[%s3243_s17 + $0xc0] sm:$0xff] }
 0x129   : > { %v4080_v43 = vsel %vm1618_vm4, %v1600_v27, %v2909_v17  ;;  %v4083_v9 = vsel %vm1618_vm4, %v1601_v37, %v2910_v35  ;;  %v2419_v27 = vld [vmem:[%s3243_s17 + $0x61] sm:$0xff]  ;;  %v2452_v17 = vld [vmem:[%s3243_s17 + $0x6a] sm:$0xff] }
 0x12a   : > { %v1612_v6 = vsel %vm1585_vm3, %v3958_v7, %v2859_v29  ;;  %v1613_v46 = vsel %vm1585_vm3, %v3962_v39, %v2860_v12  ;;  %v4091_v15 = vsel %vm1585_vm3, %v3840_v45, %v2854_v11  ;;  %v4095_v4 = vsel %vm1585_vm3, %v3843_v3, %v2855_v25  ;;  %v2420_v7 = vld [vmem:[%s3243_s17 + $0x69] sm:$0xff] }
 0x12b   : > { %v3096_v36 = vpack.i.bf16 %v2420_v7, %v2419_v27 }
 0x12c   : > { %3087 = vrot.lane.b32.xlu2 %v3086_v18, %s3205_s23 }
 0x12d   : > { %3082 = vrot.lane.b32.xlu1 %v3081_v47, %s3207_s25  ;;  %3077 = vrot.lane.b32.xlu0 %v3076_v16, %s3205_s23 }
 0x12e   : > { %v2923_v37 = vpop.permute.xlu2 %2922 }
 0x12f   : > { %v2925_v39 = vunpack.i.h.bf16 %v2923_v37  ;;  %v2924_v58 = vunpack.i.l.bf16 %v2923_v37  ;;  %v2873_v45 = vpop.permute.xlu1 %2872  ;;  %v2868_v57 = vpop.permute.xlu0 %2867 }
 0x130   : > { %v2875_v3 = vunpack.i.h.bf16 %v2873_v45  ;;  %v2874_v60 = vunpack.i.l.bf16 %v2873_v45  ;;  %v2870_v33 = vunpack.i.h.bf16 %v2868_v57  ;;  %v2869_v32 = vunpack.i.l.bf16 %v2868_v57  ;;  %v2405_v45 = vld [vmem:[%s3243_s17 + $0x138] sm:$0xff] }
 0x131   : > { %v4105_v50 = vsel %vm1618_vm4, %v1606_v62, %v2924_v58  ;;  %v4108_v22 = vsel %vm1618_vm4, %v1607_v56, %v2925_v39  ;;  %v2451_v56 = vld [vmem:[%s3243_s17 + $0x62] sm:$0xff] }
 0x132   : > { %v4112_v40 = vsel %vm1618_vm4, %v3983_v10, %v2874_v60  ;;  %v4116_v1 = vsel %vm1618_vm4, %v3987_v59, %v2875_v3  ;;  %v4120_v35 = vsel %vm1585_vm3, %v3866_v30, %v2869_v32  ;;  %v4124_v62 = vsel %vm1585_vm3, %v3869_v34, %v2870_v33  ;;  %v2396_v10 = vld [vmem:[%s3243_s17 + $0xc8] sm:$0xff]  ;;  %v1774_v30 = vld [vmem:[%s4712_s1 + $0x20] sm:$0xf] }
 0x133   : > { %v1796_v54 = vunpack.c.l.b16 %v1774_v30  ;;  %v3111_v25 = vpack.i.bf16 %v2452_v17, %v2451_v56  ;;  %v2427_v3 = vld [vmem:[%s3243_s17 + $0xc1] sm:$0xff]  ;;  %v2428_v60 = vld [vmem:[%s3243_s17 + $0xc9] sm:$0xff] }
 0x134   : > { %3102 = vrot.lane.b32.xlu2 %v3707_v13, %s3207_s25  ;;  %v3106_v13 = vpack.i.bf16 %v2396_v10, %v2395_v41  ;;  %v3121_v10 = vpack.i.bf16 %v2428_v60, %v2427_v3  ;;  %v2516_v30 = vld [vmem:[%s4712_s1 + $0x10] sm:$0xff]  ;;  %v2469_v3 = vld [vmem:[%s3243_s17 + $0x13a] sm:$0xff]  ;;  %v2470_v60 = vld [vmem:[%s3243_s17 + $0x142] sm:$0xff] }
 0x135   : > { %3097 = vrot.lane.b32.xlu1 %v3096_v36, %s3207_s25  ;;  %3092 = vrot.lane.b32.xlu0 %v3091_v44, %s3206_s24  ;;  %v1801_v38 = vpack.c.b16 %v1796_v54, %v1796_v54 }
 0x136   : > { %v2938_v59 = vpop.permute.xlu2 %2937 }
 0x137   : > { %v2940_v18 = vunpack.i.h.bf16 %v2938_v59  ;;  %v2939_v34 = vunpack.i.l.bf16 %v2938_v59  ;;  %v2888_v12 = vpop.permute.xlu1 %2887  ;;  %v2883_v29 = vpop.permute.xlu0 %2882  ;;  %v1857_v58 = vsel %vm1855_vm5, %v1801_v38, 0 }
 0x138   : > { %v2890_v11 = vunpack.i.h.bf16 %v2888_v12  ;;  %v2889_v47 = vunpack.i.l.bf16 %v2888_v12  ;;  %v2885_v16 = vunpack.i.h.bf16 %v2883_v29  ;;  %v2884_v27 = vunpack.i.l.bf16 %v2883_v29  ;;  %2519 = vmatpush.bf16.msra.mxu2 %v1857_v58  ;;  %1862 = vmatpush.bf16.msra.mxu0 %v1857_v58  ;;  %v2414_v12 = vld [vmem:[%s3243_s17 + $0x1a0] sm:$0xff] }
 0x139   : > { %v4138_v37 = vsel %vm1618_vm4, %v1612_v6, %v2939_v34  ;;  %v4141_v7 = vsel %vm1618_vm4, %v1613_v46, %v2940_v18  ;;  %2520 = vmatpush.bf16.msra.mxu3 %v1857_v58  ;;  %2518 = vmatpush.bf16.msra.mxu1 %v1857_v58  ;;  %v2514_v58 = vld [vmem:[%s4712_s1] sm:$0xff] }
 0x13a   : > { %v4145_v14 = vsel %vm1618_vm4, %v4009_v63, %v2889_v47  ;;  %v4149_v39 = vsel %vm1618_vm4, %v4013_v24, %v2890_v11  ;;  %v4153_v6 = vsel %vm1618_vm4, %v3892_v55, %v2884_v27  ;;  %v4157_v46 = vsel %vm1618_vm4, %v3895_v19, %v2885_v16  ;;  %v2406_v63 = vld [vmem:[%s3243_s17 + $0x140] sm:$0xff]  ;;  %v2517_v55 = vld [vmem:[%s4712_s1 + $0x18] sm:$0xff]  ;;  %v2460_v19 = vld [vmem:[%s3243_s17 + $0xca] sm:$0xff] }
 0x13b   : > { %v2459_v24 = vld [vmem:[%s3243_s17 + $0xc2] sm:$0xff]  ;;  %v3131_v32 = vpack.i.bf16 %v2406_v63, %v2405_v45  ;;  %v2445_v45 = vld [vmem:[%s3243_s17 + $0x199] sm:$0xff] }
 0x13c   : > { %3117 = vrot.lane.b32.xlu2 %v3845_v2, %s3206_s24  ;;  %2522 = vmatpush.bf16.msra.mxu2 %v2517_v55  ;;  %v3126_v41 = vpack.i.bf16 %v2460_v19, %v2459_v24  ;;  %v2446_v63 = vld [vmem:[%s3243_s17 + $0x1a1] sm:$0xff]  ;;  %v2421_v24 = vld [vmem:[%s3243_s17 + $0x79] sm:$0xff] }
 0x13d   : > { %3112 = vrot.lane.b32.xlu1 %v3111_v25, %s3206_s24  ;;  %3107 = vrot.lane.b32.xlu0 %v3106_v13, %s3205_s23  ;;  %v2437_v25 = vld [vmem:[%s3243_s17 + $0x139] sm:$0xff]  ;;  %v2438_v13 = vld [vmem:[%s3243_s17 + $0x141] sm:$0xff] }
 0x13e   : > { %v4169_v57 = vpop.permute.xlu2 %2952  ;;  %1863 = vmatpush.bf16.msra.mxu0 %v2517_v55  ;;  %2523 = vmatpush.bf16.msra.mxu3 %v2517_v55  ;;  %v3136_v38 = vpack.i.bf16 %v2438_v13, %v2437_v25  ;;  %v2422_v19 = vld [vmem:[%s3243_s17 + $0x81] sm:$0xff] }
 0x13f   : > { %v2903_v2 = vpop.permute.xlu1 %2902  ;;  %v2898_v33 = vpop.permute.xlu0 %2897  ;;  %2521 = vmatpush.bf16.msra.mxu1 %v2517_v55  ;;  %v2398_v25 = vld [vmem:[%s3243_s17 + $0xe0] sm:$0xff] }
 0x140   : > { %v2905_v36 = vunpack.i.h.bf16 %v2903_v2  ;;  %v2904_v44 = vunpack.i.l.bf16 %v2903_v2  ;;  %v2900_v56 = vunpack.i.h.bf16 %v2898_v33  ;;  %v2899_v17 = vunpack.i.l.bf16 %v2898_v33  ;;  %2525 = vmatpush.bf16.msra.mxu2 %v2516_v30 }
 0x142   : > { %v4179_v59 = vsel %vm1618_vm4, %v4037_v51, %v2904_v44  ;;  %v4183_v54 = vsel %vm1618_vm4, %v4041_v53, %v2905_v36  ;;  %v4187_v18 = vsel %vm1618_vm4, %v3919_v8, %v2899_v17  ;;  %v4191_v34 = vsel %vm1618_vm4, %v3922_v20, %v2900_v56  ;;  %v2413_v51 = vld [vmem:[%s3243_s17 + $0x198] sm:$0xff]  ;;  %v2515_v8 = vld [vmem:[%s4712_s1 + $0x8] sm:$0xff]  ;;  %v2390_v20 = vld [vmem:[%s3243_s17 + $0x80] sm:$0xff]  ;;  %1864 = vmatpush.bf16.msra.mxu0 %v2516_v30 }
 0x143   : > { %v2389_v53 = vld [vmem:[%s3243_s17 + $0x78] sm:$0xff]  ;;  %2526 = vmatpush.bf16.msra.mxu3 %v2516_v30  ;;  %2524 = vmatpush.bf16.msra.mxu1 %v2516_v30  ;;  %v3146_v16 = vpack.i.bf16 %v2414_v12, %v2413_v51  ;;  %v3161_v44 = vpack.i.bf16 %v2446_v63, %v2445_v45  ;;  %v3156_v56 = vpack.i.bf16 %v2422_v19, %v2421_v24  ;;  %v2478_v51 = vld [vmem:[%s3243_s17 + $0x1a2] sm:$0xff] }
 0x144   : > { %3132 = vrot.lane.b32.xlu2 %v3131_v32, %s3205_s23  ;;  %2528 = vmatpush.bf16.msra.mxu2 %v2515_v8  ;;  %v3141_v27 = vpack.i.bf16 %v2390_v20, %v2389_v53  ;;  %v3151_v17 = vpack.i.bf16 %v2470_v60, %v2469_v3  ;;  %v2477_v30 = vld [vmem:[%s3243_s17 + $0x19a] sm:$0xff] }
 0x145   : > { %3127 = vrot.lane.b32.xlu1 %v3126_v41, %s3206_s24  ;;  %3122 = vrot.lane.b32.xlu0 %v3121_v10, %s3207_s25  ;;  %v2453_v12 = vld [vmem:[%s3243_s17 + $0x7a] sm:$0xff] }
 0x146   : > { %v4202_v29 = vpop.permute.xlu2 %2967  ;;  %1865 = vmatpush.bf16.msra.mxu0 %v2515_v8  ;;  %v2397_v20 = vld [vmem:[%s3243_s17 + $0xd8] sm:$0xff] }
 0x147   : > { %v4207_v11 = vpop.permute.xlu1 %2917  ;;  %v4209_v47 = vpop.permute.xlu0 %2912  ;;  %2529 = vmatpush.bf16.msra.mxu3 %v2515_v8  ;;  %2527 = vmatpush.bf16.msra.mxu1 %v2515_v8  ;;  %v2454_v8 = vld [vmem:[%s3243_s17 + $0x82] sm:$0xff]  ;;  %v3166_v63 = vpack.i.bf16 %v2398_v25, %v2397_v20  ;;  %v2970_v25 = vunpack.i.h.bf16 %v4202_v29 }
 0x148   : > { %2531 = vmatpush.bf16.msra.mxu2 %v2514_v58  ;;  %v3171_v45 = vpack.i.bf16 %v2454_v8, %v2453_v12  ;;  %v2914_v12 = vunpack.i.l.bf16 %v4209_v47 }
 0x14a   : > { %1866 = vmatpush.bf16.msra.mxu0 %v2514_v58 }
 0x14b   : > { %2532 = vmatpush.bf16.msra.mxu3 %v2514_v58  ;;  %2530 = vmatpush.bf16.msra.mxu1 %v2514_v58 }
 0x14c   : > { %3147 = vrot.lane.b32.xlu2 %v3146_v16, %s3205_s23  ;;  %v3176_v16 = vpack.i.bf16 %v2478_v51, %v2477_v30  ;;  %v2915_v51 = vunpack.i.h.bf16 %v4209_v47 }
 0x14d   : > { %3142 = vrot.lane.b32.xlu1 %v3141_v27, %s3205_s23  ;;  %3137 = vrot.lane.b32.xlu0 %v3136_v38, %s3207_s25 }
 0x14e   : > { %v4220_v55 = vpop.permute.xlu2 %2982  ;;  %v1636_v47 = vsel %vm1618_vm4, %v3950_v31, %v2915_v51 }
 0x14f   : > { %v4225_v2 = vpop.permute.xlu1 %2932  ;;  %v2928_v33 = vpop.permute.xlu0 %2927 }
 0x150   : > { %v2930_v32 = vunpack.i.h.bf16 %v2928_v33  ;;  %v2929_v36 = vunpack.i.l.bf16 %v2928_v33 }
 0x152   : > { %v4229_v41 = vsel %vm1618_vm4, %v3972_v21, %v2929_v36  ;;  %v4233_v10 = vsel %vm1618_vm4, %v3975_v42, %v2930_v32  ;;  %v2430_v32 = vld [vmem:[%s3243_s17 + $0xe1] sm:$0xff] }
 0x153   : > { %v2462_v36 = vld [vmem:[%s3243_s17 + $0xe2] sm:$0xff] }
 0x154   : > { %3162 = vrot.lane.b32.xlu2 %v3161_v44, %s3207_s25 }
 0x155   : > { %3157 = vrot.lane.b32.xlu1 %v3156_v56, %s3207_s25  ;;  %3152 = vrot.lane.b32.xlu0 %v3151_v17, %s3206_s24 }
 0x156   : > { %v4241_v53 = vpop.permute.xlu2 %2997 }
 0x157   : > { %v2948_v21 = vpop.permute.xlu1 %2947  ;;  %v2943_v13 = vpop.permute.xlu0 %2942 }
 0x158   : > { %v2950_v42 = vunpack.i.h.bf16 %v2948_v21  ;;  %v2949_v27 = vunpack.i.l.bf16 %v2948_v21  ;;  %v2945_v38 = vunpack.i.h.bf16 %v2943_v13  ;;  %v2944_v58 = vunpack.i.l.bf16 %v2943_v13 }
 0x159   : > { %v2969_v21 = vunpack.i.l.bf16 %v4202_v29  ;;  %v1635_v13 = vsel %vm1618_vm4, %v3947_v49, %v2914_v12 }
 0x15a   : > { %v4248_v24 = vsel %vm1618_vm4, %v4120_v35, %v2949_v27  ;;  %v4252_v19 = vsel %vm1618_vm4, %v4124_v62, %v2950_v42  ;;  %v4256_v3 = vsel %vm1618_vm4, %v3998_v28, %v2944_v58  ;;  %v4260_v60 = vsel %vm1618_vm4, %v4001_v0, %v2945_v38  ;;  %v2429_v35 = vld [vmem:[%s3243_s17 + $0xd9] sm:$0xff] }
 0x15b   : > { %v2461_v62 = vld [vmem:[%s3243_s17 + $0xda] sm:$0xff]  ;;  %v3181_v30 = vpack.i.bf16 %v2430_v32, %v2429_v35  ;;  %v1668_v58 = vsel %vm1651_vm6, %v1635_v13, %v2969_v21  ;;  %s170_s17 = scalar_lea.vmem %s4714_s3, %s2513_s14 }
 0x15c   : > { %3177 = vrot.lane.b32.xlu2 %v3176_v16, %s3206_s24  ;;  %v3186_v0 = vpack.i.bf16 %v2462_v36, %v2461_v62  ;;  %v2985_v16 = vunpack.i.h.bf16 %v4220_v55 }
 0x15d   : > { %3172 = vrot.lane.b32.xlu1 %v3171_v45, %s3206_s24  ;;  %3167 = vrot.lane.b32.xlu0 %v3166_v63, %s3205_s23  ;;  %v1669_v45 = vsel %vm1651_vm6, %v1636_v47, %v2970_v25 }
 0x15e   : > { %v4266_v33 = vpop.permute.xlu2 %3012 }
 0x15f   : > { %v2963_v44 = vpop.permute.xlu1 %2962  ;;  %v2958_v56 = vpop.permute.xlu0 %2957 }
 0x160   : > { %v2965_v28 = vunpack.i.h.bf16 %v2963_v44  ;;  %v2964_v17 = vunpack.i.l.bf16 %v2963_v44  ;;  %v2955_v44 = vunpack.i.h.bf16 %v4169_v57  ;;  %v2959_v51 = vunpack.i.l.bf16 %v2958_v56 }
 0x162   : > { %v4275_v8 = vsel %vm1651_vm6, %v4153_v6, %v2964_v17  ;;  %v4279_v20 = vsel %vm1651_vm6, %v4157_v46, %v2965_v28  ;;  %v2984_v46 = vunpack.i.l.bf16 %v4220_v55  ;;  %v2954_v28 = vunpack.i.l.bf16 %v4169_v57 }
 0x163   : > { %v2935_v17 = vunpack.i.h.bf16 %v4225_v2 }
 0x165   : > { %3182 = vrot.lane.b32.xlu0 %v3181_v30, %s3207_s25  ;;  %3187 = vrot.lane.b32.xlu1 %v3186_v0, %s3206_s24  ;;  %v2934_v30 = vunpack.i.l.bf16 %v4225_v2  ;;  %v2960_v0 = vunpack.i.h.bf16 %v2958_v56  ;;  %v1644_v2 = vsel %vm1618_vm4, %v4095_v4, %v2935_v17  ;;  %v1654_v56 = vsel %vm1651_vm6, %v4026_v5, %v2959_v51 }
 0x166   : > { %v4289_v6 = vpop.permute.xlu2 %3027 }
 0x167   : > { %v2978_v42 = vpop.permute.xlu1 %2977  ;;  %v2973_v27 = vpop.permute.xlu0 %2972  ;;  %v1643_v57 = vsel %vm1618_vm4, %v4091_v15, %v2934_v30 }
 0x168   : > { %v2975_v38 = vunpack.i.h.bf16 %v2973_v27  ;;  %v2974_v29 = vunpack.i.l.bf16 %v2973_v27  ;;  %v2980_v12 = vunpack.i.h.bf16 %v2978_v42  ;;  %v2979_v25 = vunpack.i.l.bf16 %v2978_v42 }
 0x169   : > { %v1653_v27 = vsel %vm1651_vm6, %v4116_v1, %v2955_v44  ;;  %v1655_v42 = vsel %vm1651_vm6, %v4029_v52, %v2960_v0 }
 0x16a   : > { %v1701_v49 = vsel %vm1684_vm8, %v1668_v58, %v2974_v29  ;;  %v1702_v31 = vsel %vm1684_vm8, %v1669_v45, %v2975_v38  ;;  %v1676_v58 = vsel %vm1651_vm6, %v1643_v57, %v2979_v25 }
 0x16b   : > { %v1734_v63 = vsel %vm1717_vm7, %v1701_v49, %v2984_v46  ;;  %v1735_v35 = vsel %vm1717_vm7, %v1702_v31, %v2985_v16  ;;  %v1652_v46 = vsel %vm1651_vm6, %v4112_v40, %v2954_v28  ;;  %v1677_v40 = vsel %vm1651_vm6, %v1644_v2, %v2980_v12 }
 0x16c   : > { %v1758_v55 = vpack.c.bf16 %v1735_v35, %v1734_v63 }
 0x16e   : > { %2503 = vmatmul.msk.bf16.vlgmr.msra.gmra.mxu2 %vm1806_vm9, %v1758_v55  ;;  %v3043_v32 = vpop.permute.xlu2 %3042 }
 0x16f   : > { %v2993_v62 = vpop.permute.xlu1 %2992  ;;  %v2988_v36 = vpop.permute.xlu0 %2987  ;;  %v3045_v21 = vunpack.i.h.bf16 %v3043_v32  ;;  %v3044_v13 = vunpack.i.l.bf16 %v3043_v32 }
 0x170   : > { %v2995_v47 = vunpack.i.h.bf16 %v2993_v62  ;;  %v2994_v16 = vunpack.i.l.bf16 %v2993_v62  ;;  %v2990_v38 = vunpack.i.h.bf16 %v2988_v36  ;;  %v2989_v29 = vunpack.i.l.bf16 %v2988_v36 }
 0x171   : > { %v1687_v1 = vsel %vm1684_vm8, %v1654_v56, %v3044_v13  ;;  %v1688_v45 = vsel %vm1684_vm8, %v1655_v42, %v3045_v21 }
 0x172   : > { %v1709_v49 = vsel %vm1684_vm8, %v1676_v58, %v2994_v16  ;;  %v1710_v4 = vsel %vm1684_vm8, %v1677_v40, %v2995_v47  ;;  %v1685_v36 = vsel %vm1684_vm8, %v1652_v46, %v2989_v29  ;;  %v1686_v44 = vsel %vm1684_vm8, %v1653_v27, %v2990_v38 }
 0x173   : > { %v3000_v47 = vunpack.i.h.bf16 %v4241_v53  ;;  %v2999_v16 = vunpack.i.l.bf16 %v4241_v53  ;;  %v3015_v46 = vunpack.i.h.bf16 %v4266_v33  ;;  %v3014_v27 = vunpack.i.l.bf16 %v4266_v33 }
 0x174   : > { %v2920_v58 = vunpack.i.h.bf16 %v4207_v11  ;;  %v2919_v33 = vunpack.i.l.bf16 %v4207_v11  ;;  %v3029_v11 = vunpack.i.l.bf16 %v4289_v6 }
 0x175   : > { %v1660_v42 = vsel %vm1651_vm6, %v4053_v26, %v2999_v16  ;;  %v1661_v38 = vsel %vm1651_vm6, %v4056_v48, %v3000_v47 }
 0x176   : > { %v3058_v15 = vpop.permute.xlu2 %3057  ;;  %v1693_v40 = vsel %vm1684_vm8, %v1660_v42, %v3014_v27  ;;  %v1637_v48 = vsel %vm1618_vm4, %v4064_v61, %v2919_v33 }
 0x177   : > { %v3060_v31 = vunpack.i.h.bf16 %v3058_v15  ;;  %v3059_v5 = vunpack.i.l.bf16 %v3058_v15  ;;  %v3008_v63 = vpop.permute.xlu1 %3007  ;;  %v3003_v35 = vpop.permute.xlu0 %3002 }
 0x178   : > { %v3010_v52 = vunpack.i.h.bf16 %v3008_v63  ;;  %v3009_v55 = vunpack.i.l.bf16 %v3008_v63  ;;  %v3005_v32 = vunpack.i.h.bf16 %v3003_v35  ;;  %v3004_v62 = vunpack.i.l.bf16 %v3003_v35 }
 0x179   : > { %v1720_v28 = vsel %vm1717_vm7, %v1687_v1, %v3059_v5  ;;  %v1721_v17 = vsel %vm1717_vm7, %v1688_v45, %v3060_v31  ;;  %v1694_v1 = vsel %vm1684_vm8, %v1661_v38, %v3015_v46  ;;  %v1638_v31 = vsel %vm1618_vm4, %v4068_v23, %v2920_v58 }
 0x17a   : > { %v1718_v30 = vsel %vm1717_vm7, %v1685_v36, %v3004_v62  ;;  %v1719_v0 = vsel %vm1717_vm7, %v1686_v44, %v3005_v32  ;;  %v1742_v51 = vsel %vm1717_vm7, %v1709_v49, %v3009_v55  ;;  %v1743_v12 = vsel %vm1717_vm7, %v1710_v4, %v3010_v52 }
 0x17b   : > { %v1750_v25 = vpack.c.bf16 %v1719_v0, %v1718_v30  ;;  %v1762_v21 = vpack.c.bf16 %v1743_v12, %v1742_v51  ;;  %v1751_v13 = vpack.c.bf16 %v1721_v17, %v1720_v28  ;;  %v3030_v5 = vunpack.i.h.bf16 %v4289_v6 }
 0x17d   : > { %2495 = vmatmul.msk.bf16.vlgmr.msra.gmra.mxu0 %vm1806_vm9, %v1750_v25  ;;  %2507 = vmatmul.msk.bf16.vlgmr.msra.gmra.mxu3 %vm1806_vm9, %v1762_v21 }
 0x17e   : > { %v4336_v57 = vpop.permute.xlu2 %3072 }
 0x17f   : > { %v3023_v2 = vpop.permute.xlu1 %3022  ;;  %v3018_v56 = vpop.permute.xlu0 %3017 }
 0x180   : > { %v3020_v29 = vunpack.i.h.bf16 %v3018_v56  ;;  %v3019_v53 = vunpack.i.l.bf16 %v3018_v56  ;;  %v3025_v45 = vunpack.i.h.bf16 %v3023_v2  ;;  %v3024_v15 = vunpack.i.l.bf16 %v3023_v2 }
 0x181   : > { %v3075_v2 = vunpack.i.h.bf16 %v4336_v57  ;;  %v3074_v56 = vunpack.i.l.bf16 %v4336_v57 }
 0x182   : > { %v1726_v49 = vsel %vm1717_vm7, %v1693_v40, %v3019_v53  ;;  %v1727_v4 = vsel %vm1717_vm7, %v1694_v1, %v3020_v29  ;;  %v1670_v63 = vsel %vm1651_vm6, %v1637_v48, %v3024_v15  ;;  %v1671_v35 = vsel %vm1651_vm6, %v1638_v31, %v3025_v45 }
 0x183   : > { %v1754_v26 = vpack.c.bf16 %v1727_v4, %v1726_v49  ;;  %v1703_v61 = vsel %vm1684_vm8, %v1670_v63, %v3029_v11  ;;  %v1704_v44 = vsel %vm1684_vm8, %v1671_v35, %v3030_v5 }
 0x185   : > { %2499 = vmatmul.msk.bf16.vlgmr.msra.gmra.mxu1 %vm1806_vm9, %v1754_v26 }
 0x186   : > { %v3088_v52 = vpop.permute.xlu2 %3087 }
 0x187   : > { %v3038_v55 = vpop.permute.xlu1 %3037  ;;  %v3033_v32 = vpop.permute.xlu0 %3032  ;;  %v3090_v51 = vunpack.i.h.bf16 %v3088_v52  ;;  %v3089_v12 = vunpack.i.l.bf16 %v3088_v52 }
 0x188   : > { %v3040_v62 = vunpack.i.h.bf16 %v3038_v55  ;;  %v3039_v36 = vunpack.i.l.bf16 %v3038_v55  ;;  %v3035_v25 = vunpack.i.h.bf16 %v3033_v32  ;;  %v3034_v21 = vunpack.i.l.bf16 %v3033_v32 }
 0x189   : > { %v1681_v42 = vsel %vm1651_vm6, %v4260_v60, %v3090_v51 }
 0x18a   : > { %v1736_v23 = vsel %vm1717_vm7, %v1703_v61, %v3039_v36  ;;  %v1737_v28 = vsel %vm1717_vm7, %v1704_v44, %v3040_v62  ;;  %v1678_v53 = vsel %vm1651_vm6, %v4138_v37, %v3034_v21  ;;  %v1679_v58 = vsel %vm1651_vm6, %v4141_v7, %v3035_v25 }
 0x18b   : > { %v1759_v6 = vpack.c.bf16 %v1737_v28, %v1736_v23 }
 0x18d   : > { %2496 = vmatmul.msk.bf16.gmra.mxu0 %vm1806_vm9, %v1751_v13  ;;  %2504 = vmatmul.msk.bf16.gmra.mxu2 %vm1806_vm9, %v1759_v6  ;;  %v1680_v13 = vsel %vm1651_vm6, %v4256_v3, %v3089_v12 }
 0x18e   : > { %v3103_v17 = vpop.permute.xlu2 %3102 }
 0x18f   : > { %v3053_v30 = vpop.permute.xlu1 %3052  ;;  %v3048_v0 = vpop.permute.xlu0 %3047  ;;  %v3105_v47 = vunpack.i.h.bf16 %v3103_v17  ;;  %v3104_v16 = vunpack.i.l.bf16 %v3103_v17 }
 0x190   : > { %v3055_v46 = vunpack.i.h.bf16 %v3053_v30  ;;  %v3054_v27 = vunpack.i.l.bf16 %v3053_v30  ;;  %v3050_v38 = vunpack.i.h.bf16 %v3048_v0  ;;  %v3049_v29 = vunpack.i.l.bf16 %v3048_v0 }
 0x191   : > { %v1713_v33 = vsel %vm1684_vm8, %v1680_v13, %v3104_v16  ;;  %v1714_v40 = vsel %vm1684_vm8, %v1681_v42, %v3105_v47 }
 0x192   : > { %v1662_v57 = vsel %vm1651_vm6, %v4187_v18, %v3054_v27  ;;  %v1663_v3 = vsel %vm1651_vm6, %v4191_v34, %v3055_v46  ;;  %v1711_v7 = vsel %vm1684_vm8, %v1678_v53, %v3049_v29  ;;  %v1712_v31 = vsel %vm1684_vm8, %v1679_v58, %v3050_v38 }
 0x196   : > { %v3118_v1 = vpop.permute.xlu2 %3117 }
 0x197   : > { %v3120_v60 = vunpack.i.h.bf16 %v3118_v1  ;;  %v3119_v45 = vunpack.i.l.bf16 %v3118_v1  ;;  %v3068_v15 = vpop.permute.xlu1 %3067  ;;  %v3063_v49 = vpop.permute.xlu0 %3062 }
 0x198   : > { %v3070_v4 = vunpack.i.h.bf16 %v3068_v15  ;;  %v3069_v37 = vunpack.i.l.bf16 %v3068_v15  ;;  %v3065_v26 = vunpack.i.h.bf16 %v3063_v49  ;;  %v3064_v48 = vunpack.i.l.bf16 %v3063_v49 }
 0x199   : > { %v1746_v5 = vsel %vm1717_vm7, %v1713_v33, %v3119_v45  ;;  %v1747_v11 = vsel %vm1717_vm7, %v1714_v40, %v3120_v60 }
 0x19a   : > { %v1695_v18 = vsel %vm1684_vm8, %v1662_v57, %v3069_v37  ;;  %v1696_v34 = vsel %vm1684_vm8, %v1663_v3, %v3070_v4  ;;  %v1744_v63 = vsel %vm1717_vm7, %v1711_v7, %v3064_v48  ;;  %v1745_v35 = vsel %vm1717_vm7, %v1712_v31, %v3065_v26 }
 0x19b   : > { %v1763_v52 = vpack.c.bf16 %v1745_v35, %v1744_v63  ;;  %v1728_v55 = vsel %vm1717_vm7, %v1695_v18, %v3074_v56  ;;  %v1729_v32 = vsel %vm1717_vm7, %v1696_v34, %v3075_v2  ;;  %v1764_v62 = vpack.c.bf16 %v1747_v11, %v1746_v5 }
 0x19c   : > { %v1755_v36 = vpack.c.bf16 %v1729_v32, %v1728_v55 }
 0x19d   : > { %2508 = vmatmul.msk.bf16.gmra.mxu3 %vm1806_vm9, %v1763_v52 }
 0x19e   : > { %2500 = vmatmul.msk.bf16.gmra.mxu1 %vm1806_vm9, %v1755_v36  ;;  %v4391_v61 = vpop.permute.xlu2 %3132 }
 0x19f   : > { %v3083_v44 = vpop.permute.xlu1 %3082  ;;  %v3078_v23 = vpop.permute.xlu0 %3077 }
 0x1a0   : > { %v3080_v28 = vunpack.i.h.bf16 %v3078_v23  ;;  %v3079_v6 = vunpack.i.l.bf16 %v3078_v23  ;;  %v3085_v17 = vunpack.i.h.bf16 %v3083_v44  ;;  %v3084_v30 = vunpack.i.l.bf16 %v3083_v44 }
 0x1a2   : > { %v1672_v0 = vsel %vm1651_vm6, %v4105_v50, %v3079_v6  ;;  %v1673_v51 = vsel %vm1651_vm6, %v4108_v22, %v3080_v28 }
 0x1a3   : > { %v1705_v46 = vsel %vm1684_vm8, %v1672_v0, %v3084_v30  ;;  %v1706_v27 = vsel %vm1684_vm8, %v1673_v51, %v3085_v17  ;;  %v3135_v17 = vunpack.i.h.bf16 %v4391_v61  ;;  %v3134_v30 = vunpack.i.l.bf16 %v4391_v61 }
 0x1a6   : > { %v3148_v12 = vpop.permute.xlu2 %3147 }
 0x1a7   : > { %v3098_v25 = vpop.permute.xlu1 %3097  ;;  %v3093_v21 = vpop.permute.xlu0 %3092  ;;  %v3150_v1 = vunpack.i.h.bf16 %v3148_v12  ;;  %v3149_v57 = vunpack.i.l.bf16 %v3148_v12 }
 0x1a8   : > { %v3095_v47 = vunpack.i.h.bf16 %v3093_v21  ;;  %v3094_v16 = vunpack.i.l.bf16 %v3093_v21  ;;  %v3100_v42 = vunpack.i.h.bf16 %v3098_v25  ;;  %v3099_v38 = vunpack.i.l.bf16 %v3098_v25 }
 0x1a9   : > { %v1682_v26 = vsel %vm1651_vm6, %v4248_v24, %v3149_v57  ;;  %v1674_v21 = vsel %vm1651_vm6, %v4229_v41, %v3134_v30 }
 0x1aa   : > { %v1738_v2 = vsel %vm1717_vm7, %v1705_v46, %v3094_v16  ;;  %v1739_v56 = vsel %vm1717_vm7, %v1706_v27, %v3095_v47  ;;  %v1689_v33 = vsel %vm1684_vm8, %v4275_v8, %v3099_v38  ;;  %v1690_v40 = vsel %vm1684_vm8, %v4279_v20, %v3100_v42 }
 0x1ab   : > { %v1760_v13 = vpack.c.bf16 %v1739_v56, %v1738_v2  ;;  %v1683_v8 = vsel %vm1651_vm6, %v4252_v19, %v3150_v1  ;;  %v1675_v47 = vsel %vm1651_vm6, %v4233_v10, %v3135_v17 }
 0x1ad   : > { %2505 = vmatmul.msk.bf16.gmra.mxu2 %vm1806_vm9, %v1760_v13  ;;  %2509 = vmatmul.msk.bf16.gmra.mxu3 %vm1806_vm9, %v1764_v62 }
 0x1ae   : > { %v3163_v50 = vpop.permute.xlu2 %3162 }
 0x1af   : > { %v3113_v22 = vpop.permute.xlu1 %3112  ;;  %v3108_v29 = vpop.permute.xlu0 %3107  ;;  %v3165_v45 = vunpack.i.h.bf16 %v3163_v50  ;;  %v3164_v15 = vunpack.i.l.bf16 %v3163_v50 }
 0x1b0   : > { %v3115_v53 = vunpack.i.h.bf16 %v3113_v22  ;;  %v3114_v58 = vunpack.i.l.bf16 %v3113_v22  ;;  %v3110_v4 = vunpack.i.h.bf16 %v3108_v29  ;;  %v3109_v37 = vunpack.i.l.bf16 %v3108_v29 }
 0x1b1   : > { %v1715_v48 = vsel %vm1684_vm8, %v1682_v26, %v3164_v15  ;;  %v1716_v7 = vsel %vm1684_vm8, %v1683_v8, %v3165_v45 }
 0x1b2   : > { %v1722_v3 = vsel %vm1717_vm7, %v1689_v33, %v3114_v58  ;;  %v1723_v60 = vsel %vm1717_vm7, %v1690_v40, %v3115_v53  ;;  %v1664_v55 = vsel %vm1651_vm6, %v4179_v59, %v3109_v37  ;;  %v1665_v24 = vsel %vm1651_vm6, %v4183_v54, %v3110_v4 }
 0x1b3   : > { %v1752_v49 = vpack.c.bf16 %v1723_v60, %v1722_v3 }
 0x1b5   : > { %2497 = vmatmul.msk.bf16.gmra.mxu0 %vm1806_vm9, %v1752_v49 }
 0x1b6   : > { %v3178_v20 = vpop.permute.xlu2 %3177 }
 0x1b7   : > { %v3180_v31 = vunpack.i.h.bf16 %v3178_v20  ;;  %v3179_v5 = vunpack.i.l.bf16 %v3178_v20  ;;  %v3128_v11 = vpop.permute.xlu1 %3127  ;;  %v3123_v18 = vpop.permute.xlu0 %3122 }
 0x1b8   : > { %v3130_v34 = vunpack.i.h.bf16 %v3128_v11  ;;  %v3129_v63 = vunpack.i.l.bf16 %v3128_v11  ;;  %v3125_v35 = vunpack.i.h.bf16 %v3123_v18  ;;  %v3124_v52 = vunpack.i.l.bf16 %v3123_v18 }
 0x1b9   : > { %v1748_v19 = vsel %vm1717_vm7, %v1715_v48, %v3179_v5  ;;  %v1749_v32 = vsel %vm1717_vm7, %v1716_v7, %v3180_v31 }
 0x1ba   : > { %v1697_v62 = vsel %vm1684_vm8, %v1664_v55, %v3124_v52  ;;  %v1698_v36 = vsel %vm1684_vm8, %v1665_v24, %v3125_v35  ;;  %v1765_v44 = vpack.c.bf16 %v1749_v32, %v1748_v19 }
 0x1bb   : > { %v1730_v23 = vsel %vm1717_vm7, %v1697_v62, %v3129_v63  ;;  %v1731_v28 = vsel %vm1717_vm7, %v1698_v36, %v3130_v34 }
 0x1bc   : > { %v1756_v6 = vpack.c.bf16 %v1731_v28, %v1730_v23 }
 0x1bd   : > { %2510 = vmatmul.msk.bf16.gmra.mxu3 %vm1806_vm9, %v1765_v44  ;;  %v4462_v44 = vld [vmem:[%s4713_s2] ss:$0 sm:$0xff] }
 0x1be   : > { %2501 = vmatmul.msk.bf16.gmra.mxu1 %vm1806_vm9, %v1756_v6 }
 0x1bf   : > { %v3143_v59 = vpop.permute.xlu1 %3142  ;;  %v3138_v54 = vpop.permute.xlu0 %3137 }
 0x1c0   : > { %v3140_v0 = vunpack.i.h.bf16 %v3138_v54  ;;  %v3139_v51 = vunpack.i.l.bf16 %v3138_v54  ;;  %v3145_v42 = vunpack.i.h.bf16 %v3143_v59  ;;  %v3144_v38 = vunpack.i.l.bf16 %v3143_v59 }
 0x1c2   : > { %v1707_v27 = vsel %vm1684_vm8, %v1674_v21, %v3139_v51  ;;  %v1708_v2 = vsel %vm1684_vm8, %v1675_v47, %v3140_v0  ;;  %v1658_v10 = vsel %vm1651_vm6, %v4145_v14, %v3144_v38  ;;  %v1659_v53 = vsel %vm1651_vm6, %v4149_v39, %v3145_v42 }
 0x1c7   : > { %v3158_v12 = vpop.permute.xlu1 %3157  ;;  %v3153_v25 = vpop.permute.xlu0 %3152 }
 0x1c8   : > { %v3155_v16 = vunpack.i.h.bf16 %v3153_v25  ;;  %v3154_v46 = vunpack.i.l.bf16 %v3153_v25  ;;  %v3160_v50 = vunpack.i.h.bf16 %v3158_v12  ;;  %v3159_v22 = vunpack.i.l.bf16 %v3158_v12 }
 0x1ca   : > { %v1740_v56 = vsel %vm1717_vm7, %v1707_v27, %v3154_v46  ;;  %v1741_v61 = vsel %vm1717_vm7, %v1708_v2, %v3155_v16  ;;  %v1691_v40 = vsel %vm1684_vm8, %v1658_v10, %v3159_v22  ;;  %v1692_v1 = vsel %vm1684_vm8, %v1659_v53, %v3160_v50 }
 0x1cb   : > { %v1761_v13 = vpack.c.bf16 %v1741_v61, %v1740_v56 }
 0x1cd   : > { %2506 = vmatmul.msk.bf16.gmra.mxu2 %vm1806_vm9, %v1761_v13 }
 0x1cf   : > { %v3173_v41 = vpop.permute.xlu1 %3172  ;;  %v3168_v29 = vpop.permute.xlu0 %3167 }
 0x1d0   : > { %v3175_v58 = vunpack.i.h.bf16 %v3173_v41  ;;  %v3174_v33 = vunpack.i.l.bf16 %v3173_v41  ;;  %v3170_v45 = vunpack.i.h.bf16 %v3168_v29  ;;  %v3169_v15 = vunpack.i.l.bf16 %v3168_v29 }
 0x1d2   : > { %v1724_v57 = vsel %vm1717_vm7, %v1691_v40, %v3174_v33  ;;  %v1725_v3 = vsel %vm1717_vm7, %v1692_v1, %v3175_v58  ;;  %v1666_v8 = vsel %vm1651_vm6, %v4080_v43, %v3169_v15  ;;  %v1667_v20 = vsel %vm1651_vm6, %v4083_v9, %v3170_v45 }
 0x1d3   : > { %v1753_v60 = vpack.c.bf16 %v1725_v3, %v1724_v57 }
 0x1d5   : > { %2498 = vmatmul.msk.bf16.gmra.mxu0 %vm1806_vm9, %v1753_v60 }
 0x1d7   : > { %v3183_v49 = vpop.permute.xlu0 %3182  ;;  %v3188_v14 = vpop.permute.xlu1 %3187 }
 0x1d8   : > { %v3185_v4 = vunpack.i.h.bf16 %v3183_v49  ;;  %v3184_v37 = vunpack.i.l.bf16 %v3183_v49  ;;  %v3190_v39 = vunpack.i.h.bf16 %v3188_v14  ;;  %v3189_v26 = vunpack.i.l.bf16 %v3188_v14 }
 0x1da   : > { %v1699_v48 = vsel %vm1684_vm8, %v1666_v8, %v3184_v37  ;;  %v1700_v7 = vsel %vm1684_vm8, %v1667_v20, %v3185_v4 }
 0x1db   : > { %v1732_v31 = vsel %vm1717_vm7, %v1699_v48, %v3189_v26  ;;  %v1733_v5 = vsel %vm1717_vm7, %v1700_v7, %v3190_v39 }
 0x1dc   : > { %v1757_v11 = vpack.c.bf16 %v1733_v5, %v1732_v31 }
 0x1de   : > { %2502 = vmatmul.msk.bf16.gmra.mxu1 %vm1806_vm9, %v1757_v11 }
 0x1f1   : > { %v1908_v63 = vpop.f32.mrf.mxu2 }
 0x1f2   : > { %v1909_v0 = vadd.f32 %v4462_v44, %v1908_v63 }
 0x1f4   : > { %v1964_v56 = vmax.f32 %v1909_v0, 0.0 }
 0x1f9   : > { %v1910_v55 = vpop.f32.mrf.mxu2 }
 0x1fa   : > { %v1868_v35 = vpop.f32.mrf.mxu0  ;;  %v1911_v46 = vadd.f32 %v4462_v44, %v1910_v55 }
 0x1fb   : > { %v1869_v17 = vadd.f32 %v4462_v44, %v1868_v35 }
 0x1fc   : > { %v1965_v58 = vmax.f32 %v1911_v46, 0.0 }
 0x1fd   : > { %v1948_v21 = vmax.f32 %v1869_v17, 0.0 }
 0x200   : > { %v1928_v18 = vpop.f32.mrf.mxu3 }
 0x201   : > { %v1929_v33 = vadd.f32 %v4462_v44, %v1928_v18 }
 0x202   : > { %v1888_v43 = vpop.f32.mrf.mxu1  ;;  %v1870_v24 = vpop.f32.mrf.mxu0 }
 0x203   : > { %v1871_v47 = vadd.f32 %v4462_v44, %v1870_v24  ;;  %v1889_v61 = vadd.f32 %v4462_v44, %v1888_v43  ;;  %v1972_v37 = vmax.f32 %v1929_v33, 0.0 }
 0x205   : > { %v1949_v10 = vmax.f32 %v1871_v47, 0.0  ;;  %v1956_v57 = vmax.f32 %v1889_v61, 0.0 }
 0x208   : > { %v1930_v34 = vpop.f32.mrf.mxu3 }
 0x209   : > { %v1931_v39 = vadd.f32 %v4462_v44, %v1930_v34 }
 0x20a   : > { %v1890_v32 = vpop.f32.mrf.mxu1  ;;  %v1873_v62 = vpop.f32.mrf.mxu0 }
 0x20b   : > { %v1874_v6 = vadd.f32 %v4462_v44, %v1873_v62  ;;  %v1891_v45 = vadd.f32 %v4462_v44, %v1890_v32 }
 0x20d   : > { %v1950_v51 = vmax.f32 %v1874_v6, 0.0  ;;  %v1957_v7 = vmax.f32 %v1891_v45, 0.0 }
 0x20f   : > { %v1980_v13 = vmax.f32 %v1948_v21, %v1950_v51 }
 0x210   : > { %v1913_v19 = vpop.f32.mrf.mxu2 }
 0x211   : > { %v1914_v30 = vadd.f32 %v4462_v44, %v1913_v19  ;;  %v2004_v3 = vrot.slane %v1980_v13, 1 }
 0x212   : > { %v1875_v59 = vpop.f32.mrf.mxu0 }
 0x213   : > { %v1876_v12 = vadd.f32 %v4462_v44, %v1875_v59  ;;  %v1966_v16 = vmax.f32 %v1914_v30, 0.0  ;;  %v4484_v20 = vmax.f32 %v1980_v13, %v2004_v3 }
 0x215   : > { %v1951_v42 = vmax.f32 %v1876_v12, 0.0  ;;  %v1988_v53 = vmax.f32 %v1964_v56, %v1966_v16  ;;  %v2090_v19 = vrot.slane %v4484_v20, 2  ;;  %v2107_v32 = vrot.slane %v4484_v20, 4 }
 0x216   : > { %v2124_v17 = vrot.slane %v4484_v20, 6 }
 0x217   : > { %v1981_v60 = vmax.f32 %v1949_v10, %v1951_v42  ;;  %v2008_v4 = vrot.slane %v1988_v53, 1 }
 0x218   : > { %v1915_v28 = vpop.f32.mrf.mxu2 }
 0x219   : > { %v1916_v25 = vadd.f32 %v4462_v44, %v1915_v28  ;;  %v2036_v48 = vrot.slane %v1981_v60, 1  ;;  %v4486_v63 = vmax.f32 %v1988_v53, %v2008_v4 }
 0x21b   : > { %v1893_v23 = vpop.f32.mrf.mxu1  ;;  %v1967_v50 = vmax.f32 %v1916_v25, 0.0  ;;  %v4491_v62 = vmax.f32 %v1981_v60, %v2036_v48  ;;  %v2077_v30 = vrot.slane %v4486_v63, 4  ;;  %v2096_v51 = vrot.slane %v4486_v63, 6 }
 0x21c   : > { %v1894_v27 = vadd.f32 %v4462_v44, %v1893_v23  ;;  %v2131_v47 = vrot.slane %v4486_v63, 2 }
 0x21d   : > { %v1989_v15 = vmax.f32 %v1965_v58, %v1967_v50  ;;  %v2164_v16 = vrot.slane %v4491_v62, 2  ;;  %v2181_v46 = vrot.slane %v4491_v62, 4 }
 0x21e   : > { %v1958_v40 = vmax.f32 %v1894_v27, 0.0 }
 0x21f   : > { %v2040_v31 = vrot.slane %v1989_v15, 1 }
 0x220   : > { %v1933_v52 = vpop.f32.mrf.mxu3  ;;  %v1984_v26 = vmax.f32 %v1956_v57, %v1958_v40 }
 0x221   : > { %v1934_v22 = vadd.f32 %v4462_v44, %v1933_v52  ;;  %v1973_v52 = vmax.f32 %v1931_v39, 0.0  ;;  %v4493_v23 = vmax.f32 %v1989_v15, %v2040_v31 }
 0x222   : > { %v2006_v43 = vrot.slane %v1984_v26, 1 }
 0x223   : > { %v1895_v38 = vpop.f32.mrf.mxu1  ;;  %v1974_v49 = vmax.f32 %v1934_v22, 0.0  ;;  %v2155_v56 = vrot.slane %v4493_v23, 4  ;;  %v2170_v10 = vrot.slane %v4493_v23, 6  ;;  %v2205_v40 = vrot.slane %v4493_v23, 2 }
 0x224   : > { %v1896_v1 = vadd.f32 %v4462_v44, %v1895_v38  ;;  %v4501_v12 = vmax.f32 %v1984_v26, %v2006_v43 }
 0x225   : > { %v1992_v5 = vmax.f32 %v1972_v37, %v1974_v49 }
 0x226   : > { %v1959_v8 = vmax.f32 %v1896_v1, 0.0  ;;  %v2071_v53 = vrot.slane %v4501_v12, 6  ;;  %v2110_v1 = vrot.slane %v4501_v12, 2  ;;  %v2127_v45 = vrot.slane %v4501_v12, 4 }
 0x227   : > { %v2010_v28 = vrot.slane %v1992_v5, 1 }
 0x228   : > { %v1935_v9 = vpop.f32.mrf.mxu3  ;;  %v1985_v55 = vmax.f32 %v1957_v7, %v1959_v8 }
 0x229   : > { %v1936_v14 = vadd.f32 %v4462_v44, %v1935_v9  ;;  %v4510_v61 = vmax.f32 %v1992_v5, %v2010_v28 }
 0x22a   : > { %v2038_v25 = vrot.slane %v1985_v55, 1 }
 0x22b   : > { %v1975_v11 = vmax.f32 %v1936_v14, 0.0  ;;  %v2117_v49 = vrot.slane %v4510_v61, 6  ;;  %v2100_v14 = vrot.slane %v4510_v61, 4  ;;  %v2083_v7 = vrot.slane %v4510_v61, 2 }
 0x22c   : > { %v4516_v58 = vmax.f32 %v1985_v55, %v2038_v25 }
 0x22d   : > { %v1993_v6 = vmax.f32 %v1973_v52, %v1975_v11 }
 0x22e   : > { %v2151_v8 = vrot.slane %v4516_v58, 6  ;;  %v2184_v31 = vrot.slane %v4516_v58, 2  ;;  %v2201_v43 = vrot.slane %v4516_v58, 4 }
 0x22f   : > { %v2042_v13 = vrot.slane %v1993_v6, 1 }
 0x230   : > { %v4457_v36 = vpop.f32.mrf.mxu3  ;;  %v4475_v2 = vpop.f32.mrf.mxu2 }
 0x231   : > { %v1939_v59 = vadd.f32 %v4462_v44, %v4457_v36  ;;  %v2198_v36 = vrot.slane %v4491_v62, 6  ;;  %v1919_v57 = vadd.f32 %v4462_v44, %v4475_v2  ;;  %v4524_v15 = vmax.f32 %v1993_v6, %v2042_v13 }
 0x232   : > { %v1878_v41 = vpop.f32.mrf.mxu0 }
 0x233   : > { %v1976_v42 = vmax.f32 %v1939_v59, 0.0  ;;  %v1879_v50 = vadd.f32 %v4462_v44, %v1878_v41  ;;  %v1968_v5 = vmax.f32 %v1919_v57, 0.0  ;;  %v2174_v28 = vrot.slane %v4524_v15, 4 }
 0x234   : > { %v2159_v13 = vrot.slane %v4524_v15, 2 }
 0x235   : > { %v1952_v4 = vmax.f32 %v1879_v50, 0.0 }
 0x238   : > { %v4465_v54 = vpop.f32.mrf.mxu3  ;;  %v1920_v18 = vpop.f32.mrf.mxu2 }
 0x239   : > { %v1941_v27 = vadd.f32 %v4462_v44, %v4465_v54  ;;  %v1921_v2 = vadd.f32 %v4462_v44, %v1920_v18 }
 0x23a   : > { %v1880_v24 = vpop.f32.mrf.mxu0 }
 0x23b   : > { %v1898_v35 = vpop.f32.mrf.mxu1  ;;  %v1977_v3 = vmax.f32 %v1941_v27, 0.0  ;;  %v1881_v11 = vadd.f32 %v4462_v44, %v1880_v24  ;;  %v1969_v25 = vmax.f32 %v1921_v2, 0.0  ;;  %v2191_v27 = vrot.slane %v4524_v15, 6 }
 0x23c   : > { %v1899_v55 = vadd.f32 %v4462_v44, %v1898_v35 }
 0x23d   : > { %v1953_v35 = vmax.f32 %v1881_v11, 0.0 }
 0x240   : > { %v1943_v29 = vpop.f32.mrf.mxu3 }
 0x241   : > { %v1944_v9 = vadd.f32 %v4462_v44, %v1943_v29 }
 0x243   : > { %v1978_v21 = vmax.f32 %v1944_v9, 0.0  ;;  %v1900_v41 = vpop.f32.mrf.mxu1 }
 0x244   : > { %v4536_v9 = vadd.f32 %v4462_v44, %v1900_v41 }
 0x245   : > { %v1994_v33 = vmax.f32 %v1976_v42, %v1978_v21 }
 0x246   : > { %v1961_v57 = vmax.f32 %v4536_v9, 0.0 }
 0x247   : > { %v2011_v48 = vrot.slane %v1994_v33, 1 }
 0x248   : > { %v1945_v34 = vpop.f32.mrf.mxu3 }
 0x249   : > { %v1946_v0 = vadd.f32 %v4462_v44, %v1945_v34  ;;  %v4540_v21 = vmax.f32 %v1994_v33, %v2011_v48 }
 0x24b   : > { %v1979_v22 = vmax.f32 %v1946_v0, 0.0 }
 0x24d   : > { %v1995_v37 = vmax.f32 %v1977_v3, %v1979_v22 }
 0x24f   : > { %v2043_v18 = vrot.slane %v1995_v37, 1 }
 0x250   : > { %v1923_v38 = vpop.f32.mrf.mxu2 }
 0x251   : > { %v1924_v29 = vadd.f32 %v4462_v44, %v1923_v38  ;;  %v4547_v33 = vmax.f32 %v1995_v37, %v2043_v18  ;;  %v2102_v37 = vrot.slane %v4540_v21, 3 }
 0x252   : > { %v1883_v54 = vpop.f32.mrf.mxu0 }
 0x253   : > { %v1884_v60 = vadd.f32 %v4462_v44, %v1883_v54  ;;  %v1970_v39 = vmax.f32 %v1924_v29, 0.0  ;;  %v1960_v29 = vmax.f32 %v1899_v55, 0.0  ;;  %v2176_v18 = vrot.slane %v4547_v33, 3 }
 0x255   : > { %v1954_v26 = vmax.f32 %v1884_v60, 0.0  ;;  %v1990_v6 = vmax.f32 %v1968_v5, %v1970_v39 }
 0x257   : > { %v1982_v52 = vmax.f32 %v1952_v4, %v1954_v26  ;;  %v2009_v3 = vrot.slane %v1990_v6, 1  ;;  %v2119_v26 = vrot.slane %v4540_v21, 5 }
 0x258   : > { %v1925_v34 = vpop.f32.mrf.mxu2 }
 0x259   : > { %v2005_v59 = vrot.slane %v1982_v52, 1  ;;  %v1926_v0 = vadd.f32 %v4462_v44, %v1925_v34  ;;  %v4553_v34 = vmax.f32 %v1990_v6, %v2009_v3 }
 0x25a   : > { %v1885_v24 = vpop.f32.mrf.mxu0 }
 0x25b   : > { %v2021_v42 = vmax.f32 %v1982_v52, %v2005_v59  ;;  %v1971_v38 = vmax.f32 %v1926_v0, 0.0  ;;  %v1886_v50 = vadd.f32 %v4462_v44, %v1885_v24  ;;  %v1903_v22 = vpop.f32.mrf.mxu1  ;;  %v2086_v59 = vrot.slane %v4540_v21, 1 }
 0x25c   : > { %v1904_v54 = vadd.f32 %v4462_v44, %v1903_v22  ;;  %v2193_v22 = vrot.slane %v4547_v33, 5 }
 0x25d   : > { %v2068_v41 = vrot.slane %v2021_v42, 7  ;;  %v1991_v60 = vmax.f32 %v1969_v25, %v1971_v38  ;;  %v1955_v4 = vmax.f32 %v1886_v50, 0.0  ;;  %v2091_v2 = vrot.slane %v2021_v42, 1 }
 0x25e   : > { %v1962_v39 = vmax.f32 %v1904_v54, 0.0  ;;  %v2108_v48 = vrot.slane %v2021_v42, 3  ;;  %v2125_v5 = vrot.slane %v2021_v42, 5 }
 0x25f   : > { %v2070_v11 = vsel %vm2069_vm10, %v2068_v41, %v4484_v20  ;;  %v2041_v52 = vrot.slane %v1991_v60, 1  ;;  %v1983_v55 = vmax.f32 %v1953_v35, %v1955_v4  ;;  %v2210_v35 = vrot.slane %v4547_v33, 7 }
 0x260   : > { %v1986_v9 = vmax.f32 %v1960_v29, %v1962_v39  ;;  %v2073_v0 = vsel %vm2072_vm11, %v2071_v53, %v2070_v11  ;;  %v2109_v6 = vsel %vm2069_vm10, %v2108_v48, %v2107_v32  ;;  %v2092_v50 = vsel %vm2069_vm10, %v2091_v2, %v2090_v19 }
 0x261   : > { %v4560_v25 = vmax.f32 %v1991_v60, %v2041_v52  ;;  %v2037_v24 = vrot.slane %v1983_v55, 1  ;;  %v2126_v53 = vsel %vm2069_vm10, %v2125_v5, %v2124_v17  ;;  %v2161_v41 = vrot.slane %v4547_v33, 1 }
 0x262   : > { %v2007_v42 = vrot.slane %v1986_v9, 1  ;;  %v2115_v60 = vrot.slane %v4553_v34, 7  ;;  %v2098_v32 = vrot.slane %v4553_v34, 5  ;;  %v2080_v19 = vrot.slane %v4553_v34, 3 }
 0x263   : > { %v1905_v38 = vpop.f32.mrf.mxu1  ;;  %v2053_v29 = vmax.f32 %v1983_v55, %v2037_v24  ;;  %v2111_v20 = vsel %vm2072_vm11, %v2110_v1, %v2109_v6  ;;  %v2093_v17 = vsel %vm2072_vm11, %v4501_v12, %v2092_v50  ;;  %v2172_v39 = vrot.slane %v4560_v25, 5 }
 0x264   : > { %v2023_v54 = vmax.f32 %v1986_v9, %v2007_v42  ;;  %v1906_v3 = vadd.f32 %v4462_v44, %v1905_v38  ;;  %v2128_v44 = vsel %vm2072_vm11, %v2127_v45, %v2126_v53  ;;  %v2207_v9 = vrot.slane %v4560_v25, 1 }
 0x265   : > { %v2165_v2 = vrot.slane %v2053_v29, 1  ;;  %v2199_v52 = vrot.slane %v2053_v29, 5  ;;  %v2189_v24 = vrot.slane %v4560_v25, 7  ;;  %v2149_v1 = vrot.slane %v2053_v29, 7 }
 0x266   : > { %v2074_v48 = vrot.slane %v2023_v54, 5  ;;  %v2094_v5 = vrot.slane %v2023_v54, 7  ;;  %v2112_v11 = vrot.slane %v2023_v54, 1  ;;  %v1963_v55 = vmax.f32 %v1906_v3, 0.0 }
 0x267   : > { %v2182_v42 = vrot.slane %v2053_v29, 3  ;;  %v2129_v50 = vrot.slane %v2023_v54, 3  ;;  %v2166_v29 = vsel %vm2069_vm10, %v2165_v2, %v2164_v16 }
 0x268   : > { %v2113_v38 = vsel %vm2075_vm12, %v2112_v11, %v2111_v20  ;;  %v2095_v6 = vsel %vm2075_vm12, %v2094_v5, %v2093_v17  ;;  %v1987_v12 = vmax.f32 %v1961_v57, %v1963_v55  ;;  %v2076_v20 = vsel %vm2075_vm12, %v2074_v48, %v2073_v0 }
 0x269   : > { %v2114_v45 = vsel %vm2078_vm13, %v4486_v63, %v2113_v38  ;;  %v2097_v53 = vsel %vm2078_vm13, %v2096_v51, %v2095_v6  ;;  %v2200_v51 = vsel %vm2069_vm10, %v2199_v52, %v2198_v36  ;;  %v2183_v0 = vsel %vm2069_vm10, %v2182_v42, %v2181_v46 }
 0x26a   : > { %v2116_v3 = vsel %vm2081_vm14, %v2115_v60, %v2114_v45  ;;  %v2099_v4 = vsel %vm2081_vm14, %v2098_v32, %v2097_v53  ;;  %v2039_v17 = vrot.slane %v1987_v12, 1  ;;  %v2130_v36 = vsel %vm2075_vm12, %v2129_v50, %v2128_v44 }
 0x26b   : > { %v2118_v57 = vsel %vm2084_vm15, %v2117_v49, %v2116_v3  ;;  %v2101_v54 = vsel %vm2084_vm15, %v2100_v14, %v2099_v4  ;;  %v2079_v49 = vsel %vm2078_vm13, %v2077_v30, %v2076_v20  ;;  %v2202_v46 = vsel %vm2072_vm11, %v2201_v43, %v2200_v51 }
 0x26c   : > { %v2120_v60 = vsel %vm2087_vm0, %v2119_v26, %v2118_v57  ;;  %v2103_v16 = vsel %vm2087_vm0, %v2102_v37, %v2101_v54  ;;  %v2055_v32 = vmax.f32 %v1987_v12, %v2039_v17  ;;  %v2082_v14 = vsel %vm2081_vm14, %v2080_v19, %v2079_v49 }
 0x26d   : > { %2121 = vrot.lane.b32.xlu1 %v2120_v60, %s3206_s24  ;;  %2104 = vrot.lane.b32.xlu2 %v2103_v16, %s3203_s21  ;;  %v2157_v26 = vrot.slane %v4560_v25, 3  ;;  %v2167_v37 = vsel %vm2072_vm11, %v4516_v58, %v2166_v29  ;;  %v2085_v30 = vsel %vm2084_vm15, %v2083_v7, %v2082_v14  ;;  %v2150_v4 = vsel %vm2069_vm10, %v2149_v1, %v4491_v62 }
 0x26e   : > { %v2153_v2 = vrot.slane %v2055_v32, 5  ;;  %v2168_v44 = vrot.slane %v2055_v32, 7  ;;  %v2186_v48 = vrot.slane %v2055_v32, 1  ;;  %v2203_v19 = vrot.slane %v2055_v32, 3 }
 0x26f   : > { %v2185_v25 = vsel %vm2072_vm11, %v2184_v31, %v2183_v0  ;;  %v2132_v5 = vsel %vm2078_vm13, %v2131_v47, %v2130_v36  ;;  %v2088_v43 = vsel %vm2087_vm0, %v2086_v59, %v2085_v30  ;;  %v2152_v62 = vsel %vm2072_vm11, %v2151_v8, %v2150_v4 }
 0x270   : > { %v2169_v7 = vsel %vm2075_vm12, %v2168_v44, %v2167_v37  ;;  %v2204_v11 = vsel %vm2075_vm12, %v2203_v19, %v2202_v46  ;;  %v2187_v52 = vsel %vm2075_vm12, %v2186_v48, %v2185_v25  ;;  %v2154_v31 = vsel %vm2075_vm12, %v2153_v2, %v2152_v62 }
 0x271   : > { %v2171_v63 = vsel %vm2078_vm13, %v2170_v10, %v2169_v7  ;;  %v2206_v47 = vsel %vm2078_vm13, %v2205_v40, %v2204_v11  ;;  %v2188_v58 = vsel %vm2078_vm13, %v4493_v23, %v2187_v52  ;;  %v2156_v8 = vsel %vm2078_vm13, %v2155_v56, %v2154_v31 }
 0x272   : > { %v2173_v59 = vsel %vm2081_vm14, %v2172_v39, %v2171_v63  ;;  %v2208_v55 = vsel %vm2081_vm14, %v2207_v9, %v2206_v47  ;;  %v2190_v1 = vsel %vm2081_vm14, %v2189_v24, %v2188_v58  ;;  %v2158_v42 = vsel %vm2081_vm14, %v2157_v26, %v2156_v8 }
 0x273   : > { %v2175_v10 = vsel %vm2084_vm15, %v2174_v28, %v2173_v59  ;;  %v2209_v40 = vsel %vm2084_vm15, %v4524_v15, %v2208_v55  ;;  %v2192_v23 = vsel %vm2084_vm15, %v2191_v27, %v2190_v1  ;;  %v2160_v56 = vsel %vm2084_vm15, %v2159_v13, %v2158_v42 }
 0x274   : > { %v2177_v39 = vsel %vm2087_vm0, %v2176_v18, %v2175_v10  ;;  %v2211_v28 = vsel %vm2087_vm0, %v2210_v35, %v2209_v40  ;;  %v2194_v9 = vsel %vm2087_vm0, %v2193_v22, %v2192_v23  ;;  %v2162_v27 = vsel %vm2087_vm0, %v2161_v41, %v2160_v56 }
 0x275   : > { %2178 = vrot.lane.b32.xlu0 %v2177_v39, %s3203_s21  ;;  %2212 = vrot.lane.b32.xlu1 %v2211_v28, %s3208_s11  ;;  %v4764_v15 = vrot.slane %v4553_v34, 1  ;;  %v2136_v35 = vrot.slane %v4540_v21, 7 }
 0x276   : > { %2195 = vrot.lane.b32.xlu2 %v2194_v9, %s3206_s24 }
 0x277   : > { %v2134_v13 = vsel %vm2081_vm14, %v4764_v15, %v2132_v5 }
 0x278   : > { %v2135_v18 = vsel %vm2084_vm15, %v4510_v61, %v2134_v13 }
 0x279   : > { %v2137_v22 = vsel %vm2087_vm0, %v2136_v35, %v2135_v18 }
 0x27d   : > { %2138 = vrot.lane.b32.xlu0 %v2137_v22, %s3208_s11 }
 0x2c7   : > { %v2105_v33 = vpop.permute.xlu2 %2104 }
 0x2c8   : > { %v2215_v21 = vsel %vm1585_vm3, %v2088_v43, %v2105_v33 }
 0x2d0   : > { %v2196_v38 = vpop.permute.xlu2 %2195 }
 0x2df   : > { %v2122_v41 = vpop.permute.xlu1 %2121 }
 0x2e0   : > { %v2216_v12 = vsel %vm1717_vm7, %v2215_v21, %v2122_v41 }
 0x2e7   : > { %v2179_v24 = vpop.permute.xlu0 %2178  ;;  %v2213_v34 = vpop.permute.xlu1 %2212 }
 0x2e8   : > { %v2219_v6 = vsel %vm1585_vm3, %v2162_v27, %v2179_v24 }
 0x2e9   : > { %v2220_v61 = vsel %vm1717_vm7, %v2219_v6, %v2196_v38 }
 0x2ea   : > { %v2221_v50 = vsel %vm2217_vm1, %v2220_v61, %v2213_v34 }
 0x2eb   : > { %2223 = vst [vmem:[%s170_s17 + $0x8] sm:$0xff] %v2221_v50 }
 0x2ef   : > { %v2139_v45 = vpop.permute.xlu0 %2138 }
 0x2f0   : > { %v2218_v53 = vsel %vm2217_vm1, %v2216_v12, %v2139_v45 }
 0x2f1   : > { %2222 = vst [vmem:[%s170_s17] sm:$0xff] %v2218_v53 }
 0x2f2 PF: > { %s13_s12 = sadd.s32 1, %s3198_s12  }
 0x2f3   : > { %p10_p4 = scmp.ge.s32.totalorder %s13_s12, 4  }
 0x2f5   :  { %12 = sbr.rel (!%p10_p4) target bundleno = 1 (0x1), region = 64 }

// kernel: simple_cnn_forward.5
= control target key start
LH: loop header
LB: loop body
LE: loop exit
PB: predicated region body
PF: predicated region fallthrough
CT: control target
= control target key end

     0   :  { %10 = vsyncpa [#allocation4], 0  ;;  %s2084_s18 = smov 0   ;;  %s2415_s0 = inlined_call_operand.vmem [shape: bf16[2,1024], index: 0, kind: input, shape index: {}]   ;;  %s2416_s1 = inlined_call_operand.vmem [shape: bf16[1024,384], index: 1, kind: input, shape index: {}]   ;;  %s2417_s2 = inlined_call_operand.vmem [shape: f32[1,384], index: 2, kind: input, shape index: {}]   ;;  %s2418_s3 = inlined_call_operand.vmem [shape: bf16[384,128], index: 3, kind: input, shape index: {}]   ;;  %s2419_s4 = inlined_call_operand.vmem [shape: f32[1,128], index: 4, kind: input, shape index: {}]   ;;  %s2420_s5 = inlined_call_operand.hbm [shape: f32[2,128], index: 5, kind: output, shape index: {}]  }
   0x1 LB: > { %s2090_s19 = sadd.s32 4294967295, %s2050_s18   ;;  %p1384_p0 = scmp.ge.s32.totalorder %s2050_s18, 1  ;;  %s2050_s18 = sphi %s2084_s18, %s16_s18  }
   0x2   : > { %p195_p1 = scmp.lt.s32.totalorder %s2050_s18, 3 }
   0x4   : > { %p196_p2 = pnand %p1384_p0, %p195_p1 }
   0x5   : > { %s1385_s20 = sshll.u32 (!%p196_p2), %s2090_s19, 2  ;;  %s1386_s21 = sshll.u32 (!%p196_p2), %s2090_s19, 6 }
   0x6   : > { %199 = sbr.rel (%p196_p2) target bundleno = 441 (0x1b9), region = 40  ;;  %p224_p3 = scmp.lt.s32.totalorder (!%p196_p2), %s1385_s20, 7 }
   0x7   : > { %p229_p4 = scmp.lt.s32.totalorder (!%p196_p2), %s1386_s21, 127  ;;  %p1388_p5 = scmp.ne.s32.totalorder (!%p196_p2), %s2090_s19, 0 }
   0xb   : > { %s2422_s20 = smov (!%p224_p3, %s1385_s20), 7  ;;  %s2424_s21 = smov (!%p229_p4, %s1386_s21), 127 }
   0xc   : > { %s226_s24 = scalar_lea.vmem %s2415_s0, %s2422_s20  ;;  %s1994_s25 = smul.u32 12, %s2424_s21 }
   0xd   : > { %238 = sbr.rel (%p1388_p5) target bundleno = 20 (0x14), region = 44 }
   0xe   : > { %s2105_s28 = scalar_lea.vmem %s2416_s1, %s1994_s25 }
  0x12   : > { %v2052_v0 = vmov 0.0  }
  0x13   : > { %239 = vst [vmem:[#allocation2] sm:$0x3f] %v2052_v0 }
  0x14 PF: > { %v1475_v1 = vld [vmem:[%s2105_s28 + $0xa8] sm:$0xf]  ;;  %v1896_v2 = vld [vmem:[%s2105_s28 + $0xb0] sm:$0xf0]  ;;  %v1463_v12 = vld [vmem:[%s2105_s28 + $0x90] sm:$0xf] }
  0x15   : > { %v1571_v3 = vld [vmem:[%s2105_s28 + $0x168] sm:$0xf]  ;;  %v1476_v4 = vor.u32 %v1896_v2, %v1475_v1  ;;  %v1920_v5 = vld [vmem:[%s2105_s28 + $0x170] sm:$0xf0]  ;;  %v1893_v14 = vld [vmem:[%s2105_s28 + $0x98] sm:$0xf0] }
  0x16   : > { %v1667_v6 = vld [vmem:[%s2105_s28 + $0x228] sm:$0xf]  ;;  %v1944_v7 = vld [vmem:[%s2105_s28 + $0x230] sm:$0xf0]  ;;  %v1572_v8 = vor.u32 %v1920_v5, %v1571_v3  ;;  %v1559_v15 = vld [vmem:[%s2105_s28 + $0x150] sm:$0xf]  ;;  %v1464_v17 = vor.u32 %v1893_v14, %v1463_v12 }
  0x17   : > { %v1668_v9 = vor.u32 %v1944_v7, %v1667_v6  ;;  %v1763_v10 = vld [vmem:[%s2105_s28 + $0x2e8] sm:$0xf]  ;;  %v1968_v11 = vld [vmem:[%s2105_s28 + $0x2f0] sm:$0xf0]  ;;  %892 = vmatpush.bf16.msra.mxu0 %v1476_v4  ;;  %v1917_v16 = vld [vmem:[%s2105_s28 + $0x158] sm:$0xf0] }
  0x18   : > { %v1764_v13 = vor.u32 %v1968_v11, %v1763_v10  ;;  %905 = vmatpush.bf16.msra.mxu1 %v1572_v8  ;;  %v1560_v18 = vor.u32 %v1917_v16, %v1559_v15  ;;  %v1655_v19 = vld [vmem:[%s2105_s28 + $0x210] sm:$0xf]  ;;  %v1941_v20 = vld [vmem:[%s2105_s28 + $0x218] sm:$0xf0]  ;;  %v1451_v24 = vld [vmem:[%s2105_s28 + $0x78] sm:$0xf] }
  0x19   : > { %918 = vmatpush.bf16.msra.mxu2 %v1668_v9  ;;  %v1751_v21 = vld [vmem:[%s2105_s28 + $0x2d0] sm:$0xf]  ;;  %v1656_v22 = vor.u32 %v1941_v20, %v1655_v19  ;;  %v1965_v23 = vld [vmem:[%s2105_s28 + $0x2d8] sm:$0xf0]  ;;  %v1890_v25 = vld [vmem:[%s2105_s28 + $0x80] sm:$0xf0] }
  0x1a   : > { %931 = vmatpush.bf16.msra.mxu3 %v1764_v13  ;;  %v1752_v26 = vor.u32 %v1965_v23, %v1751_v21  ;;  %v1547_v27 = vld [vmem:[%s2105_s28 + $0x138] sm:$0xf]  ;;  %v1914_v28 = vld [vmem:[%s2105_s28 + $0x140] sm:$0xf0]  ;;  %v1452_v30 = vor.u32 %v1890_v25, %v1451_v24  ;;  %v1439_v36 = vld [vmem:[%s2105_s28 + $0x60] sm:$0xf] }
  0x1b   : > { %v1643_v29 = vld [vmem:[%s2105_s28 + $0x1f8] sm:$0xf]  ;;  %893 = vmatpush.bf16.msra.mxu0 %v1464_v17  ;;  %v1938_v31 = vld [vmem:[%s2105_s28 + $0x200] sm:$0xf0]  ;;  %v1548_v34 = vor.u32 %v1914_v28, %v1547_v27  ;;  %v1887_v37 = vld [vmem:[%s2105_s28 + $0x68] sm:$0xf0] }
  0x1c   : > { %v1739_v32 = vld [vmem:[%s2105_s28 + $0x2b8] sm:$0xf]  ;;  %v1962_v33 = vld [vmem:[%s2105_s28 + $0x2c0] sm:$0xf0]  ;;  %906 = vmatpush.bf16.msra.mxu1 %v1560_v18  ;;  %v1644_v35 = vor.u32 %v1938_v31, %v1643_v29  ;;  %v1535_v38 = vld [vmem:[%s2105_s28 + $0x120] sm:$0xf]  ;;  %v1440_v45 = vor.u32 %v1887_v37, %v1439_v36 }
  0x1d   : > { %919 = vmatpush.bf16.msra.mxu2 %v1656_v22  ;;  %v1740_v39 = vor.u32 %v1962_v33, %v1739_v32  ;;  %v1911_v40 = vld [vmem:[%s2105_s28 + $0x128] sm:$0xf0]  ;;  %v1631_v41 = vld [vmem:[%s2105_s28 + $0x1e0] sm:$0xf]  ;;  %v1427_v48 = vld [vmem:[%s2105_s28 + $0x48] sm:$0xf] }
  0x1e   : > { %932 = vmatpush.bf16.msra.mxu3 %v1752_v26  ;;  %v1935_v42 = vld [vmem:[%s2105_s28 + $0x1e8] sm:$0xf0]  ;;  %v1727_v43 = vld [vmem:[%s2105_s28 + $0x2a0] sm:$0xf]  ;;  %v1536_v46 = vor.u32 %v1911_v40, %v1535_v38  ;;  %v1884_v49 = vld [vmem:[%s2105_s28 + $0x50] sm:$0xf0] }
  0x1f   : > { %v1959_v44 = vld [vmem:[%s2105_s28 + $0x2a8] sm:$0xf0]  ;;  %894 = vmatpush.bf16.msra.mxu0 %v1452_v30  ;;  %v1632_v47 = vor.u32 %v1935_v42, %v1631_v41  ;;  %v1523_v50 = vld [vmem:[%s2105_s28 + $0x108] sm:$0xf]  ;;  %v1908_v52 = vld [vmem:[%s2105_s28 + $0x110] sm:$0xf0]  ;;  %v1428_v57 = vor.u32 %v1884_v49, %v1427_v48 }
  0x20   : > { %907 = vmatpush.bf16.msra.mxu1 %v1548_v34  ;;  %v1728_v51 = vor.u32 %v1959_v44, %v1727_v43  ;;  %v1619_v53 = vld [vmem:[%s2105_s28 + $0x1c8] sm:$0xf]  ;;  %v1932_v54 = vld [vmem:[%s2105_s28 + $0x1d0] sm:$0xf0]  ;;  %v1524_v58 = vor.u32 %v1908_v52, %v1523_v50  ;;  %v1415_v60 = vld [vmem:[%s2105_s28 + $0x30] sm:$0xf] }
  0x21   : > { %920 = vmatpush.bf16.msra.mxu2 %v1644_v35  ;;  %v1715_v55 = vld [vmem:[%s2105_s28 + $0x288] sm:$0xf]  ;;  %v1956_v56 = vld [vmem:[%s2105_s28 + $0x290] sm:$0xf0]  ;;  %v1620_v59 = vor.u32 %v1932_v54, %v1619_v53  ;;  %v1881_v61 = vld [vmem:[%s2105_s28 + $0x38] sm:$0xf0] }
  0x22   : > { %933 = vmatpush.bf16.msra.mxu3 %v1740_v39  ;;  %v1511_v62 = vld [vmem:[%s2105_s28 + $0xf0] sm:$0xf]  ;;  %v1716_v63 = vor.u32 %v1956_v56, %v1715_v55  ;;  %v1905_v0 = vld [vmem:[%s2105_s28 + $0xf8] sm:$0xf0]  ;;  %v1416_v5 = vor.u32 %v1881_v61, %v1415_v60  ;;  %v1403_v8 = vld [vmem:[%s2105_s28 + $0x18] sm:$0xf] }
  0x23   : > { %895 = vmatpush.bf16.msra.mxu0 %v1440_v45  ;;  %v1607_v1 = vld [vmem:[%s2105_s28 + $0x1b0] sm:$0xf]  ;;  %v1929_v2 = vld [vmem:[%s2105_s28 + $0x1b8] sm:$0xf0]  ;;  %v1512_v6 = vor.u32 %v1905_v0, %v1511_v62  ;;  %v1878_v9 = vld [vmem:[%s2105_s28 + $0x20] sm:$0xf0] }
  0x24   : > { %908 = vmatpush.bf16.msra.mxu1 %v1536_v46  ;;  %v1703_v3 = vld [vmem:[%s2105_s28 + $0x270] sm:$0xf]  ;;  %v1953_v4 = vld [vmem:[%s2105_s28 + $0x278] sm:$0xf0]  ;;  %v1608_v7 = vor.u32 %v1929_v2, %v1607_v1  ;;  %v1499_v10 = vld [vmem:[%s2105_s28 + $0xd8] sm:$0xf]  ;;  %v1404_v17 = vor.u32 %v1878_v9, %v1403_v8 }
  0x25   : > { %921 = vmatpush.bf16.msra.mxu2 %v1632_v47  ;;  %v1704_v11 = vor.u32 %v1953_v4, %v1703_v3  ;;  %v1902_v12 = vld [vmem:[%s2105_s28 + $0xe0] sm:$0xf0]  ;;  %v1595_v13 = vld [vmem:[%s2105_s28 + $0x198] sm:$0xf]  ;;  %v1391_v18 = vld [vmem:[%s2105_s28] sm:$0xf] }
  0x26   : > { %934 = vmatpush.bf16.msra.mxu3 %v1728_v51  ;;  %v1926_v14 = vld [vmem:[%s2105_s28 + $0x1a0] sm:$0xf0]  ;;  %v1691_v15 = vld [vmem:[%s2105_s28 + $0x258] sm:$0xf]  ;;  %v1875_v19 = vld [vmem:[%s2105_s28 + $0x8] sm:$0xf0]  ;;  %v1500_v20 = vor.u32 %v1902_v12, %v1499_v10 }
  0x27   : > { %896 = vmatpush.bf16.msra.mxu0 %v1428_v57  ;;  %v1950_v16 = vld [vmem:[%s2105_s28 + $0x260] sm:$0xf0]  ;;  %v1596_v21 = vor.u32 %v1926_v14, %v1595_v13  ;;  %v1487_v22 = vld [vmem:[%s2105_s28 + $0xc0] sm:$0xf]  ;;  %v1899_v23 = vld [vmem:[%s2105_s28 + $0xc8] sm:$0xf0]  ;;  %v1392_v32 = vor.u32 %v1875_v19, %v1391_v18 }
  0x28   : > { %909 = vmatpush.bf16.msra.mxu1 %v1524_v58  ;;  %v1583_v24 = vld [vmem:[%s2105_s28 + $0x180] sm:$0xf]  ;;  %v1692_v25 = vor.u32 %v1950_v16, %v1691_v15  ;;  %v1923_v26 = vld [vmem:[%s2105_s28 + $0x188] sm:$0xf0]  ;;  %v1477_v30 = vld [vmem:[%s2105_s28 + $0xb4] sm:$0xf0]  ;;  %v1488_v36 = vor.u32 %v1899_v23, %v1487_v22 }
  0x29   : > { %922 = vmatpush.bf16.msra.mxu2 %v1620_v59  ;;  %v1679_v27 = vld [vmem:[%s2105_s28 + $0x240] sm:$0xf]  ;;  %v1947_v28 = vld [vmem:[%s2105_s28 + $0x248] sm:$0xf0]  ;;  %v1573_v33 = vld [vmem:[%s2105_s28 + $0x174] sm:$0xf0]  ;;  %v1584_v37 = vor.u32 %v1923_v26, %v1583_v24 }
  0x2a   : > { %935 = vmatpush.bf16.msra.mxu3 %v1716_v63  ;;  %v1895_v29 = vld [vmem:[%s2105_s28 + $0xac] sm:$0xf]  ;;  %v1669_v35 = vld [vmem:[%s2105_s28 + $0x234] sm:$0xf0]  ;;  %v1680_v40 = vor.u32 %v1947_v28, %v1679_v27  ;;  %v1892_v44 = vld [vmem:[%s2105_s28 + $0x94] sm:$0xf] }
  0x2b   : > { %897 = vmatpush.bf16.msra.mxu0 %v1416_v5  ;;  %v1919_v31 = vld [vmem:[%s2105_s28 + $0x16c] sm:$0xf]  ;;  %v1765_v39 = vld [vmem:[%s2105_s28 + $0x2f4] sm:$0xf0]  ;;  %v1480_v41 = vor.u32 %v1895_v29, %v1477_v30  ;;  %v1465_v45 = vld [vmem:[%s2105_s28 + $0x9c] sm:$0xf0] }
  0x2c   : > { %910 = vmatpush.bf16.msra.mxu1 %v1512_v6  ;;  %v1943_v34 = vld [vmem:[%s2105_s28 + $0x22c] sm:$0xf]  ;;  %v1576_v42 = vor.u32 %v1919_v31, %v1573_v33  ;;  %v1916_v46 = vld [vmem:[%s2105_s28 + $0x154] sm:$0xf]  ;;  %v1561_v48 = vld [vmem:[%s2105_s28 + $0x15c] sm:$0xf0]  ;;  %v1468_v54 = vor.u32 %v1892_v44, %v1465_v45 }
  0x2d   : > { %923 = vmatpush.bf16.msra.mxu2 %v1608_v7  ;;  %v1967_v38 = vld [vmem:[%s2105_s28 + $0x2ec] sm:$0xf]  ;;  %v1672_v43 = vor.u32 %v1943_v34, %v1669_v35  ;;  %v1940_v49 = vld [vmem:[%s2105_s28 + $0x214] sm:$0xf]  ;;  %v1657_v50 = vld [vmem:[%s2105_s28 + $0x21c] sm:$0xf0]  ;;  %v1564_v55 = vor.u32 %v1916_v46, %v1561_v48 }
  0x2e   : > { %936 = vmatpush.bf16.msra.mxu3 %v1704_v11  ;;  %v1768_v47 = vor.u32 %v1967_v38, %v1765_v39  ;;  %v1964_v51 = vld [vmem:[%s2105_s28 + $0x2d4] sm:$0xf]  ;;  %v1753_v52 = vld [vmem:[%s2105_s28 + $0x2dc] sm:$0xf0]  ;;  %v1660_v56 = vor.u32 %v1940_v49, %v1657_v50  ;;  %v1889_v57 = vld [vmem:[%s2105_s28 + $0x7c] sm:$0xf] }
  0x2f   : > { %898 = vmatpush.bf16.msra.mxu0 %v1404_v17  ;;  %v241_v53 = vld [vmem:[%s226_s24] sm:$0xf]  ;;  %v1453_v58 = vld [vmem:[%s2105_s28 + $0x84] sm:$0xf0]  ;;  %v1913_v59 = vld [vmem:[%s2105_s28 + $0x13c] sm:$0xf]  ;;  %v1756_v60 = vor.u32 %v1964_v51, %v1753_v52 }
  0x30   : > { %911 = vmatpush.bf16.msra.mxu1 %v1500_v20  ;;  %371 = vst [vmem:[#allocation1] ss:$9 sm:$0xff] %v241_v53  ;;  %v1549_v61 = vld [vmem:[%s2105_s28 + $0x144] sm:$0xf0]  ;;  %v1937_v62 = vld [vmem:[%s2105_s28 + $0x1fc] sm:$0xf]  ;;  %v1456_v2 = vor.u32 %v1889_v57, %v1453_v58 }
  0x31   : > { %924 = vmatpush.bf16.msra.mxu2 %v1596_v21  ;;  %v1645_v63 = vld [vmem:[%s2105_s28 + $0x204] sm:$0xf0]  ;;  %v1961_v0 = vld [vmem:[%s2105_s28 + $0x2bc] sm:$0xf]  ;;  %v1886_v3 = vld [vmem:[%s2105_s28 + $0x64] sm:$0xf]  ;;  %v1552_v4 = vor.u32 %v1913_v59, %v1549_v61 }
  0x32   : > { %937 = vmatpush.bf16.msra.mxu3 %v1692_v25  ;;  %v1741_v1 = vld [vmem:[%s2105_s28 + $0x2c4] sm:$0xf0]  ;;  %v1648_v5 = vor.u32 %v1937_v62, %v1645_v63  ;;  %v1441_v6 = vld [vmem:[%s2105_s28 + $0x6c] sm:$0xf0]  ;;  %v1910_v7 = vld [vmem:[%s2105_s28 + $0x124] sm:$0xf] }
  0x33   : > { %899 = vmatpush.bf16.msra.mxu0 %v1392_v32  ;;  %v1537_v8 = vld [vmem:[%s2105_s28 + $0x12c] sm:$0xf0]  ;;  %v1744_v9 = vor.u32 %v1961_v0, %v1741_v1  ;;  %v1934_v10 = vld [vmem:[%s2105_s28 + $0x1e4] sm:$0xf]  ;;  %v1444_v16 = vor.u32 %v1886_v3, %v1441_v6  ;;  %v1883_v21 = vld [vmem:[%s2105_s28 + $0x4c] sm:$0xf] }
  0x34   : > { %912 = vmatpush.bf16.msra.mxu1 %v1488_v36  ;;  %v1633_v11 = vld [vmem:[%s2105_s28 + $0x1ec] sm:$0xf0]  ;;  %v1958_v12 = vld [vmem:[%s2105_s28 + $0x2a4] sm:$0xf]  ;;  %v1540_v19 = vor.u32 %v1910_v7, %v1537_v8  ;;  %v1429_v22 = vld [vmem:[%s2105_s28 + $0x54] sm:$0xf0] }
  0x35   : > { %925 = vmatpush.bf16.msra.mxu2 %v1584_v37  ;;  %v1729_v13 = vld [vmem:[%s2105_s28 + $0x2ac] sm:$0xf0]  ;;  %v1636_v20 = vor.u32 %v1934_v10, %v1633_v11  ;;  %v1907_v23 = vld [vmem:[%s2105_s28 + $0x10c] sm:$0xf]  ;;  %v1525_v25 = vld [vmem:[%s2105_s28 + $0x114] sm:$0xf0]  ;;  %v1432_v30 = vor.u32 %v1883_v21, %v1429_v22 }
  0x36   : > { %938 = vmatpush.bf16.msra.mxu3 %v1680_v40  ;;  %v1732_v24 = vor.u32 %v1958_v12, %v1729_v13  ;;  %v1931_v26 = vld [vmem:[%s2105_s28 + $0x1cc] sm:$0xf]  ;;  %v1621_v27 = vld [vmem:[%s2105_s28 + $0x1d4] sm:$0xf0]  ;;  %v1528_v31 = vor.u32 %v1907_v23, %v1525_v25  ;;  %v1880_v33 = vld [vmem:[%s2105_s28 + $0x34] sm:$0xf] }
  0x37   : > { %944 = vmatpush.bf16.msrb.mxu0 %v1480_v41  ;;  %v2209_v14 = vld [vmem:[#allocation1 + $0x12] sm:$0xff]  ;;  %v2211_v15 = vld [vmem:[#allocation1] sm:$0xff]  ;;  %v2216_v18 = vld [vmem:[#allocation1 + $0x9] sm:$0xff]  ;;  %v1624_v32 = vor.u32 %v1931_v26, %v1621_v27  ;;  %vm1053_vm0 = vcmask 1041408   ;;  %vm1055_vm1 = vcmask 1043456   ;;  %p1773_p6 = scmp.ne.s32.totalorder %s2090_s19, 1 }
  0x38   : > { %957 = vmatpush.bf16.msrb.mxu1 %v1576_v42  ;;  %926 = vmatmul.bf16.vlgmr.msra.gmra.mxu2 %v2209_v14  ;;  %v2214_v17 = vld [vmem:[#allocation1 + $0x1b] sm:$0xff]  ;;  %v1955_v28 = vld [vmem:[%s2105_s28 + $0x28c] sm:$0xf]  ;;  %v1904_v35 = vld [vmem:[%s2105_s28 + $0xf4] sm:$0xf] }
  0x39   : > { %970 = vmatpush.bf16.msrb.mxu2 %v1672_v43  ;;  %900 = vmatmul.bf16.vlgmr.msra.gmra.mxu0 %v2211_v15  ;;  %v1717_v29 = vld [vmem:[%s2105_s28 + $0x294] sm:$0xf0]  ;;  %v1417_v34 = vld [vmem:[%s2105_s28 + $0x3c] sm:$0xf0]  ;;  %v1928_v38 = vld [vmem:[%s2105_s28 + $0x1b4] sm:$0xf] }
  0x3a   : > { %983 = vmatpush.bf16.msrb.mxu3 %v1768_v47  ;;  %913 = vmatmul.bf16.vlgmr.msra.gmra.mxu1 %v2216_v18  ;;  %v1720_v36 = vor.u32 %v1955_v28, %v1717_v29  ;;  %v1513_v37 = vld [vmem:[%s2105_s28 + $0xfc] sm:$0xf0]  ;;  %v1952_v40 = vld [vmem:[%s2105_s28 + $0x274] sm:$0xf]  ;;  %v1420_v42 = vor.u32 %v1880_v33, %v1417_v34  ;;  %v1877_v45 = vld [vmem:[%s2105_s28 + $0x1c] sm:$0xf] }
  0x3b   : > { %945 = vmatpush.bf16.msrb.mxu0 %v1468_v54  ;;  %939 = vmatmul.bf16.vlgmr.msra.gmra.mxu3 %v2214_v17  ;;  %v1609_v39 = vld [vmem:[%s2105_s28 + $0x1bc] sm:$0xf0]  ;;  %v1516_v43 = vor.u32 %v1904_v35, %v1513_v37  ;;  %v1405_v46 = vld [vmem:[%s2105_s28 + $0x24] sm:$0xf0]  ;;  %v1901_v47 = vld [vmem:[%s2105_s28 + $0xdc] sm:$0xf] }
  0x3c   : > { %958 = vmatpush.bf16.msrb.mxu1 %v1564_v55  ;;  %v1705_v41 = vld [vmem:[%s2105_s28 + $0x27c] sm:$0xf0]  ;;  %v1612_v44 = vor.u32 %v1928_v38, %v1609_v39  ;;  %v1501_v49 = vld [vmem:[%s2105_s28 + $0xe4] sm:$0xf0]  ;;  %v1925_v50 = vld [vmem:[%s2105_s28 + $0x19c] sm:$0xf]  ;;  %v1408_v54 = vor.u32 %v1877_v45, %v1405_v46 }
  0x3d   : > { %971 = vmatpush.bf16.msrb.mxu2 %v1660_v56  ;;  %v1708_v48 = vor.u32 %v1952_v40, %v1705_v41  ;;  %v1597_v51 = vld [vmem:[%s2105_s28 + $0x1a4] sm:$0xf0]  ;;  %v1949_v52 = vld [vmem:[%s2105_s28 + $0x25c] sm:$0xf]  ;;  %v1874_v55 = vld [vmem:[%s2105_s28 + $0x4] sm:$0xf]  ;;  %v1504_v57 = vor.u32 %v1901_v47, %v1501_v49 }
  0x3e   : > { %984 = vmatpush.bf16.msrb.mxu3 %v1756_v60  ;;  %v1693_v53 = vld [vmem:[%s2105_s28 + $0x264] sm:$0xf0]  ;;  %v1393_v56 = vld [vmem:[%s2105_s28 + $0xc] sm:$0xf0]  ;;  %v1600_v58 = vor.u32 %v1925_v50, %v1597_v51  ;;  %v1898_v59 = vld [vmem:[%s2105_s28 + $0xc4] sm:$0xf] }
  0x3f   : > { %946 = vmatpush.bf16.msrb.mxu0 %v1456_v2  ;;  %v1489_v60 = vld [vmem:[%s2105_s28 + $0xcc] sm:$0xf0]  ;;  %v1922_v61 = vld [vmem:[%s2105_s28 + $0x184] sm:$0xf]  ;;  %v1696_v62 = vor.u32 %v1949_v52, %v1693_v53  ;;  %v1897_v3 = vld [vmem:[%s2105_s28 + $0xb8] sm:$0xf0] }
  0x40   : > { %959 = vmatpush.bf16.msrb.mxu1 %v1552_v4  ;;  %v1585_v63 = vld [vmem:[%s2105_s28 + $0x18c] sm:$0xf0]  ;;  %v1946_v0 = vld [vmem:[%s2105_s28 + $0x244] sm:$0xf]  ;;  %v1921_v6 = vld [vmem:[%s2105_s28 + $0x178] sm:$0xf0] }
  0x41   : > { %972 = vmatpush.bf16.msrb.mxu2 %v1648_v5  ;;  %v1681_v1 = vld [vmem:[%s2105_s28 + $0x24c] sm:$0xf0]  ;;  %v1396_v5 = vor.u32 %v1874_v55, %v1393_v56  ;;  %v1945_v8 = vld [vmem:[%s2105_s28 + $0x238] sm:$0xf0]  ;;  %v1588_v10 = vor.u32 %v1922_v61, %v1585_v63  ;;  %v1471_v21 = vld [vmem:[%s2105_s28 + $0x98] sm:$0xf] }
  0x42   : > { %985 = vmatpush.bf16.msrb.mxu3 %v1744_v9  ;;  %v1483_v2 = vld [vmem:[%s2105_s28 + $0xb0] sm:$0xf]  ;;  %v1492_v9 = vor.u32 %v1898_v59, %v1489_v60  ;;  %v1969_v12 = vld [vmem:[%s2105_s28 + $0x2f8] sm:$0xf0]  ;;  %v1684_v13 = vor.u32 %v1946_v0, %v1681_v1  ;;  %v1894_v22 = vld [vmem:[%s2105_s28 + $0xa0] sm:$0xf0] }
  0x43   : > { %947 = vmatpush.bf16.msrb.mxu0 %v1444_v16  ;;  %v1579_v4 = vld [vmem:[%s2105_s28 + $0x170] sm:$0xf]  ;;  %v1484_v16 = vor.u32 %v1897_v3, %v1483_v2  ;;  %v1567_v23 = vld [vmem:[%s2105_s28 + $0x158] sm:$0xf]  ;;  %v1918_v25 = vld [vmem:[%s2105_s28 + $0x160] sm:$0xf0] }
  0x44   : > { %960 = vmatpush.bf16.msrb.mxu1 %v1540_v19  ;;  %v1675_v7 = vld [vmem:[%s2105_s28 + $0x230] sm:$0xf]  ;;  %v1580_v19 = vor.u32 %v1921_v6, %v1579_v4  ;;  %v1663_v26 = vld [vmem:[%s2105_s28 + $0x218] sm:$0xf]  ;;  %v1942_v27 = vld [vmem:[%s2105_s28 + $0x220] sm:$0xf0] }
  0x45   : > { %973 = vmatpush.bf16.msrb.mxu2 %v1636_v20  ;;  %v1771_v11 = vld [vmem:[%s2105_s28 + $0x2f0] sm:$0xf]  ;;  %v1676_v20 = vor.u32 %v1945_v8, %v1675_v7  ;;  %v1759_v28 = vld [vmem:[%s2105_s28 + $0x2d8] sm:$0xf]  ;;  %v1966_v29 = vld [vmem:[%s2105_s28 + $0x2e0] sm:$0xf0] }
  0x46   : > { %986 = vmatpush.bf16.msrb.mxu3 %v1732_v24  ;;  %v1772_v24 = vor.u32 %v1969_v12, %v1771_v11  ;;  %v1459_v33 = vld [vmem:[%s2105_s28 + $0x80] sm:$0xf]  ;;  %v1891_v34 = vld [vmem:[%s2105_s28 + $0x88] sm:$0xf0]  ;;  %v1447_v45 = vld [vmem:[%s2105_s28 + $0x68] sm:$0xf] }
  0x47   : > { %948 = vmatpush.bf16.msrb.mxu0 %v1432_v30  ;;  %v1472_v30 = vor.u32 %v1894_v22, %v1471_v21  ;;  %v1555_v35 = vld [vmem:[%s2105_s28 + $0x140] sm:$0xf]  ;;  %v1915_v37 = vld [vmem:[%s2105_s28 + $0x148] sm:$0xf0]  ;;  %v1888_v46 = vld [vmem:[%s2105_s28 + $0x70] sm:$0xf0] }
  0x48   : > { %961 = vmatpush.bf16.msrb.mxu1 %v1528_v31  ;;  %v1568_v31 = vor.u32 %v1918_v25, %v1567_v23  ;;  %v1651_v38 = vld [vmem:[%s2105_s28 + $0x200] sm:$0xf]  ;;  %v1939_v39 = vld [vmem:[%s2105_s28 + $0x208] sm:$0xf0]  ;;  %v1543_v47 = vld [vmem:[%s2105_s28 + $0x128] sm:$0xf] }
  0x49   : > { %974 = vmatpush.bf16.msrb.mxu2 %v1624_v32  ;;  %v1664_v32 = vor.u32 %v1942_v27, %v1663_v26  ;;  %v1747_v40 = vld [vmem:[%s2105_s28 + $0x2c0] sm:$0xf]  ;;  %v1963_v41 = vld [vmem:[%s2105_s28 + $0x2c8] sm:$0xf0]  ;;  %v1912_v49 = vld [vmem:[%s2105_s28 + $0x130] sm:$0xf0] }
  0x4a   : > { %987 = vmatpush.bf16.msrb.mxu3 %v1720_v36  ;;  %v1760_v36 = vor.u32 %v1966_v29, %v1759_v28  ;;  %v1639_v50 = vld [vmem:[%s2105_s28 + $0x1e8] sm:$0xf]  ;;  %v1936_v51 = vld [vmem:[%s2105_s28 + $0x1f0] sm:$0xf0]  ;;  %v1544_v55 = vor.u32 %v1912_v49, %v1543_v47  ;;  %v1531_v59 = vld [vmem:[%s2105_s28 + $0x110] sm:$0xf] }
  0x4b   : > { %949 = vmatpush.bf16.msrb.mxu0 %v1420_v42  ;;  %v1460_v42 = vor.u32 %v1891_v34, %v1459_v33  ;;  %v1735_v52 = vld [vmem:[%s2105_s28 + $0x2a8] sm:$0xf]  ;;  %v1960_v53 = vld [vmem:[%s2105_s28 + $0x2b0] sm:$0xf0]  ;;  %v1640_v56 = vor.u32 %v1936_v51, %v1639_v50  ;;  %v1909_v61 = vld [vmem:[%s2105_s28 + $0x118] sm:$0xf0] }
  0x4c   : > { %962 = vmatpush.bf16.msrb.mxu1 %v1516_v43  ;;  %v1556_v43 = vor.u32 %v1915_v37, %v1555_v35  ;;  %v1736_v60 = vor.u32 %v1960_v53, %v1735_v52  ;;  %v1933_v63 = vld [vmem:[%s2105_s28 + $0x1d8] sm:$0xf0]  ;;  %v1723_v0 = vld [vmem:[%s2105_s28 + $0x290] sm:$0xf]  ;;  %v1532_v3 = vor.u32 %v1909_v61, %v1531_v59  ;;  %v1882_v6 = vld [vmem:[%s2105_s28 + $0x40] sm:$0xf0] }
  0x4d   : > { %975 = vmatpush.bf16.msrb.mxu2 %v1612_v44  ;;  %v1652_v44 = vor.u32 %v1939_v39, %v1651_v38  ;;  %v1957_v1 = vld [vmem:[%s2105_s28 + $0x298] sm:$0xf0]  ;;  %v1519_v7 = vld [vmem:[%s2105_s28 + $0xf8] sm:$0xf]  ;;  %v1930_v11 = vld [vmem:[%s2105_s28 + $0x1c0] sm:$0xf0] }
  0x4e   : > { %988 = vmatpush.bf16.msrb.mxu3 %v1708_v48  ;;  %v1748_v48 = vor.u32 %v1963_v41, %v1747_v40  ;;  %v1724_v8 = vor.u32 %v1957_v1, %v1723_v0  ;;  %v1711_v12 = vld [vmem:[%s2105_s28 + $0x278] sm:$0xf]  ;;  %v1411_v21 = vld [vmem:[%s2105_s28 + $0x20] sm:$0xf]  ;;  %v1879_v22 = vld [vmem:[%s2105_s28 + $0x28] sm:$0xf0] }
  0x4f   : > { %950 = vmatpush.bf16.msrb.mxu0 %v1408_v54  ;;  %v1448_v54 = vor.u32 %v1888_v46, %v1447_v45  ;;  %v1507_v23 = vld [vmem:[%s2105_s28 + $0xe0] sm:$0xf]  ;;  %v1903_v25 = vld [vmem:[%s2105_s28 + $0xe8] sm:$0xf0]  ;;  %v1399_v33 = vld [vmem:[%s2105_s28 + $0x8] sm:$0xf] }
  0x50   : > { %963 = vmatpush.bf16.msrb.mxu1 %v1504_v57  ;;  %v1435_v57 = vld [vmem:[%s2105_s28 + $0x50] sm:$0xf]  ;;  %v1603_v26 = vld [vmem:[%s2105_s28 + $0x1a0] sm:$0xf]  ;;  %v1927_v27 = vld [vmem:[%s2105_s28 + $0x1a8] sm:$0xf0] }
  0x51   : > { %976 = vmatpush.bf16.msrb.mxu2 %v1600_v58  ;;  %v1885_v58 = vld [vmem:[%s2105_s28 + $0x58] sm:$0xf0]  ;;  %v1699_v28 = vld [vmem:[%s2105_s28 + $0x260] sm:$0xf]  ;;  %v1951_v29 = vld [vmem:[%s2105_s28 + $0x268] sm:$0xf0] }
  0x52   : > { %989 = vmatpush.bf16.msrb.mxu3 %v1696_v62  ;;  %v1627_v62 = vld [vmem:[%s2105_s28 + $0x1d0] sm:$0xf]  ;;  %v1436_v2 = vor.u32 %v1885_v58, %v1435_v57  ;;  %v1876_v34 = vld [vmem:[%s2105_s28 + $0x10] sm:$0xf0]  ;;  %v1495_v35 = vld [vmem:[%s2105_s28 + $0xc8] sm:$0xf] }
  0x53   : > { %951 = vmatpush.bf16.msrb.mxu0 %v1396_v5  ;;  %v1628_v4 = vor.u32 %v1933_v63, %v1627_v62  ;;  %v1423_v5 = vld [vmem:[%s2105_s28 + $0x38] sm:$0xf]  ;;  %v1900_v37 = vld [vmem:[%s2105_s28 + $0xd0] sm:$0xf0]  ;;  %v1591_v38 = vld [vmem:[%s2105_s28 + $0x188] sm:$0xf] }
  0x54   : > { %964 = vmatpush.bf16.msrb.mxu1 %v1492_v9  ;;  %v1906_v9 = vld [vmem:[%s2105_s28 + $0x100] sm:$0xf0]  ;;  %v1924_v39 = vld [vmem:[%s2105_s28 + $0x190] sm:$0xf0]  ;;  %v1687_v40 = vld [vmem:[%s2105_s28 + $0x248] sm:$0xf] }
  0x55   : > { %977 = vmatpush.bf16.msrb.mxu2 %v1588_v10  ;;  %v1615_v10 = vld [vmem:[%s2105_s28 + $0x1b8] sm:$0xf]  ;;  %v1948_v41 = vld [vmem:[%s2105_s28 + $0x250] sm:$0xf0] }
  0x56   : > { %990 = vmatpush.bf16.msrb.mxu3 %v1684_v13  ;;  %952 = vmatmul.bf16.vlgmr.msrb.gmra.mxu0 %v2211_v15  ;;  %v1954_v13 = vld [vmem:[%s2105_s28 + $0x280] sm:$0xf0]  ;;  %v1688_v45 = vor.u32 %v1948_v41, %v1687_v40 }
  0x57   : > { %996 = vmatpush.bf16.msra.mxu0 %v1484_v16  ;;  %965 = vmatmul.bf16.vlgmr.msrb.gmra.mxu1 %v2216_v18  ;;  %v1424_v16 = vor.u32 %v1882_v6, %v1423_v5 }
  0x58   : > { %1009 = vmatpush.bf16.msra.mxu1 %v1580_v19  ;;  %978 = vmatmul.bf16.vlgmr.msrb.gmra.mxu2 %v2209_v14  ;;  %v1520_v19 = vor.u32 %v1906_v9, %v1519_v7 }
  0x59   : > { %1022 = vmatpush.bf16.msra.mxu2 %v1676_v20  ;;  %991 = vmatmul.bf16.vlgmr.msrb.gmra.mxu3 %v2214_v17  ;;  %v1616_v20 = vor.u32 %v1930_v11, %v1615_v10  ;;  %v240_v10 = vld [vmem:[#allocation2] sm:$0x3f] }
  0x5a   : > { %1035 = vmatpush.bf16.msra.mxu3 %v1772_v24  ;;  %v1712_v24 = vor.u32 %v1954_v13, %v1711_v12 }
  0x5b   : > { %997 = vmatpush.bf16.msra.mxu0 %v1472_v30  ;;  %v1412_v30 = vor.u32 %v1879_v22, %v1411_v21 }
  0x5c   : > { %1010 = vmatpush.bf16.msra.mxu1 %v1568_v31  ;;  %v1508_v31 = vor.u32 %v1903_v25, %v1507_v23 }
  0x5d   : > { %1023 = vmatpush.bf16.msra.mxu2 %v1664_v32  ;;  %v1604_v32 = vor.u32 %v1927_v27, %v1603_v26 }
  0x5e   : > { %1036 = vmatpush.bf16.msra.mxu3 %v1760_v36  ;;  %v1700_v36 = vor.u32 %v1951_v29, %v1699_v28 }
  0x5f   : > { %998 = vmatpush.bf16.msra.mxu0 %v1460_v42  ;;  %v1400_v42 = vor.u32 %v1876_v34, %v1399_v33 }
  0x60   : > { %1011 = vmatpush.bf16.msra.mxu1 %v1556_v43  ;;  %v1496_v43 = vor.u32 %v1900_v37, %v1495_v35 }
  0x61   : > { %1024 = vmatpush.bf16.msra.mxu2 %v1652_v44  ;;  %v1592_v44 = vor.u32 %v1924_v39, %v1591_v38 }
  0x62   : > { %1037 = vmatpush.bf16.msra.mxu3 %v1748_v48 }
  0x63   : > { %999 = vmatpush.bf16.msra.mxu0 %v1448_v54 }
  0x64   : > { %1012 = vmatpush.bf16.msra.mxu1 %v1544_v55 }
  0x65   : > { %1025 = vmatpush.bf16.msra.mxu2 %v1640_v56 }
  0x66   : > { %1038 = vmatpush.bf16.msra.mxu3 %v1736_v60 }
  0x67   : > { %1000 = vmatpush.bf16.msra.mxu0 %v1436_v2 }
  0x68   : > { %1013 = vmatpush.bf16.msra.mxu1 %v1532_v3 }
  0x69   : > { %1026 = vmatpush.bf16.msra.mxu2 %v1628_v4 }
  0x6a   : > { %1039 = vmatpush.bf16.msra.mxu3 %v1724_v8 }
  0x6b   : > { %1001 = vmatpush.bf16.msra.mxu0 %v1424_v16 }
  0x6c   : > { %1014 = vmatpush.bf16.msra.mxu1 %v1520_v19 }
  0x6d   : > { %1027 = vmatpush.bf16.msra.mxu2 %v1616_v20 }
  0x6e   : > { %1040 = vmatpush.bf16.msra.mxu3 %v1712_v24 }
  0x6f   : > { %1002 = vmatpush.bf16.msra.mxu0 %v1412_v30 }
  0x70   : > { %1015 = vmatpush.bf16.msra.mxu1 %v1508_v31 }
  0x71   : > { %1028 = vmatpush.bf16.msra.mxu2 %v1604_v32 }
  0x72   : > { %1041 = vmatpush.bf16.msra.mxu3 %v1700_v36 }
  0x73   : > { %1003 = vmatpush.bf16.msra.mxu0 %v1400_v42 }
  0x74   : > { %1016 = vmatpush.bf16.msra.mxu1 %v1496_v43 }
  0x75   : > { %1029 = vmatpush.bf16.msra.mxu2 %v1592_v44 }
  0x76   : > { %1042 = vmatpush.bf16.msra.mxu3 %v1688_v45  ;;  %1004 = vmatmul.bf16.vlgmr.msra.gmra.mxu0 %v2211_v15 }
  0x77   : > { %1017 = vmatmul.bf16.vlgmr.msra.gmra.mxu1 %v2216_v18 }
  0x78   : > { %1030 = vmatmul.bf16.vlgmr.msra.gmra.mxu2 %v2209_v14 }
  0x79   : > { %1043 = vmatmul.bf16.vlgmr.msra.gmra.mxu3 %v2214_v17 }
  0xb6   : > { %v901_v46 = vpop.f32.mrf.mxu0 }
  0xb7   : > { %v914_v47 = vpop.f32.mrf.mxu1 }
  0xb8   : > { %v915_v62 = vadd.f32 %v914_v47, %v901_v46 }
  0xbb   : > { %v927_v48 = vpop.f32.mrf.mxu2 }
  0xbc   : > { %v928_v1 = vadd.f32 %v927_v48, %v915_v62 }
  0xbe   : > { %v940_v49 = vpop.f32.mrf.mxu3  ;;  %v903_v50 = vpop.f32.mrf.mxu0 }
  0xbf   : > { %v916_v51 = vpop.f32.mrf.mxu1  ;;  %v941_v9 = vadd.f32 %v940_v49, %v928_v1 }
  0xc3   : > { %v929_v52 = vpop.f32.mrf.mxu2 }
  0xc6   : > { %v942_v53 = vpop.f32.mrf.mxu3 }
  0xd3   : > { %v953_v54 = vpop.f32.mrf.mxu0 }
  0xd4   : > { %v966_v55 = vpop.f32.mrf.mxu1 }
  0xd5   : > { %v967_v60 = vadd.f32 %v966_v55, %v953_v54 }
  0xdb   : > { %v979_v56 = vpop.f32.mrf.mxu2  ;;  %v955_v58 = vpop.f32.mrf.mxu0 }
  0xdc   : > { %v992_v57 = vpop.f32.mrf.mxu3  ;;  %v968_v15 = vpop.f32.mrf.mxu1  ;;  %v980_v61 = vadd.f32 %v979_v56, %v967_v60 }
  0xde   : > { %v993_v0 = vadd.f32 %v992_v57, %v980_v61 }
  0xe0   : > { %v1051_v6 = vrot.slane %v993_v0, 6 }
  0xe2   : > { %v1054_v12 = vsel %vm1053_vm0, %v941_v9, %v1051_v6 }
  0xe3   : > { %v981_v59 = vpop.f32.mrf.mxu2 }
  0xe4   : > { %v994_v18 = vpop.f32.mrf.mxu3 }
  0xf3   : > { %v1005_v14 = vpop.f32.mrf.mxu0 }
  0xf4   : > { %v1018_v17 = vpop.f32.mrf.mxu1 }
  0xf5   : > { %v1019_v63 = vadd.f32 %v1018_v17, %v1005_v14 }
  0xfb   : > { %v1031_v2 = vpop.f32.mrf.mxu2  ;;  %v1007_v5 = vpop.f32.mrf.mxu0 }
  0xfc   : > { %v1032_v3 = vadd.f32 %v1031_v2, %v1019_v63  ;;  %v1044_v4 = vpop.f32.mrf.mxu3  ;;  %v1020_v7 = vpop.f32.mrf.mxu1 }
  0xfe   : > { %v1045_v8 = vadd.f32 %v1044_v4, %v1032_v3 }
 0x100   : > { %v1052_v11 = vrot.slane %v1045_v8, 4 }
 0x101   : > { %1063 = sbr.rel (%p1773_p6) target bundleno = 436 (0x1b4), region = 48 }
 0x102   : > { %v1056_v13 = vsel %vm1055_vm1, %v1054_v12, %v1052_v11 }
 0x103   : > { %v1058_v16 = vadd.f32 %v1056_v13, %v240_v10  ;;  %v1033_v19 = vpop.f32.mrf.mxu2 }
 0x104   : > { %v1046_v20 = vpop.f32.mrf.mxu3 }
 0x105   : > { %1059 = vst [vmem:[#allocation2] sm:$0x3f] %v1058_v16 }
 0x106   : > { %v1977_v21 = vld [vmem:[%s2418_s3 + $0x38] sm:$0xff]  ;;  %v1976_v24 = vld [vmem:[%s2418_s3 + $0x30] sm:$0xff]  ;;  %v1975_v27 = vld [vmem:[%s2418_s3 + $0x28] sm:$0xff] }
 0x107   : > { %v1985_v22 = vld [vmem:[%s2418_s3 + $0x78] sm:$0xff]  ;;  %1284 = vmatpush.bf16.msra.mxu0 %v1977_v21  ;;  %v1984_v25 = vld [vmem:[%s2418_s3 + $0x70] sm:$0xff]  ;;  %v1983_v28 = vld [vmem:[%s2418_s3 + $0x68] sm:$0xff] }
 0x108   : > { %v1993_v23 = vld [vmem:[%s2418_s3 + $0xb8] sm:$0xff]  ;;  %1297 = vmatpush.bf16.msra.mxu1 %v1985_v22  ;;  %v1992_v26 = vld [vmem:[%s2418_s3 + $0xb0] sm:$0xff]  ;;  %v1991_v29 = vld [vmem:[%s2418_s3 + $0xa8] sm:$0xff] }
 0x109   : > { %1310 = vmatpush.bf16.msra.mxu2 %v1993_v23  ;;  %v1065_v30 = vld [vmem:[%s2417_s2] sm:$0x7]  ;;  %v1973_v41 = vld [vmem:[%s2418_s3 + $0x18] sm:$0xff]  ;;  %v1972_v47 = vld [vmem:[%s2418_s3 + $0x10] sm:$0xff] }
 0x10a   : > { %v1067_v31 = vperm.slane %v1065_v30, 0  ;;  %v1068_v32 = vperm.slane %v1065_v30, 1  ;;  %v1069_v33 = vperm.slane %v1065_v30, 2  ;;  %v1974_v34 = vld [vmem:[%s2418_s3 + $0x20] sm:$0xff]  ;;  %v1981_v42 = vld [vmem:[%s2418_s3 + $0x58] sm:$0xff]  ;;  %v1980_v48 = vld [vmem:[%s2418_s3 + $0x50] sm:$0xff] }
 0x10b   : > { %1285 = vmatpush.bf16.msra.mxu0 %v1976_v24  ;;  %v1982_v35 = vld [vmem:[%s2418_s3 + $0x60] sm:$0xff]  ;;  %v1989_v44 = vld [vmem:[%s2418_s3 + $0x98] sm:$0xff]  ;;  %v1988_v49 = vld [vmem:[%s2418_s3 + $0x90] sm:$0xff] }
 0x10c   : > { %1298 = vmatpush.bf16.msra.mxu1 %v1984_v25  ;;  %v1990_v36 = vld [vmem:[%s2418_s3 + $0xa0] sm:$0xff]  ;;  %v1070_v37 = vrot.slane %v1068_v32, 6  ;;  %v1071_v38 = vrot.slane %v1069_v33, 4  ;;  %v1064_v39 = vld [vmem:[#allocation2] sm:$0x3f] }
 0x10d   : > { %1311 = vmatpush.bf16.msra.mxu2 %v1992_v26  ;;  %v1971_v50 = vld [vmem:[%s2418_s3 + $0x8] sm:$0xff]  ;;  %v1970_v53 = vld [vmem:[%s2418_s3] sm:$0xff] }
 0x10e   : > { %v1072_v40 = vsel %vm1053_vm0, %v1067_v31, %v1070_v37  ;;  %v1979_v51 = vld [vmem:[%s2418_s3 + $0x48] sm:$0xff]  ;;  %v1978_v54 = vld [vmem:[%s2418_s3 + $0x40] sm:$0xff] }
 0x10f   : > { %1286 = vmatpush.bf16.msra.mxu0 %v1975_v27  ;;  %v1073_v43 = vsel %vm1055_vm1, %v1072_v40, %v1071_v38  ;;  %v1987_v52 = vld [vmem:[%s2418_s3 + $0x88] sm:$0xff]  ;;  %v1986_v57 = vld [vmem:[%s2418_s3 + $0x80] sm:$0xff] }
 0x110   : > { %1299 = vmatpush.bf16.msra.mxu1 %v1983_v28  ;;  %v1075_v45 = vadd.f32 %v1073_v43, %v1064_v39  ;;  %v2011_v60 = vld [vmem:[%s2419_s4] ss:$0 sm:$0xff] }
 0x111   : > { %1312 = vmatpush.bf16.msra.mxu2 %v1991_v29 }
 0x112   : > { %v1076_v46 = vmax.f32 %v1075_v45, 0.0 }
 0x113   : > { %1287 = vmatpush.bf16.msra.mxu0 %v1974_v34 }
 0x114   : > { %1300 = vmatpush.bf16.msra.mxu1 %v1982_v35  ;;  %1078 = vst [vmem:[#allocation1] ss:$4 sm:$0xff] %v1076_v46 }
 0x115   : > { %1313 = vmatpush.bf16.msra.mxu2 %v1990_v36 }
 0x117   : > { %1288 = vmatpush.bf16.msra.mxu0 %v1973_v41 }
 0x118   : > { %1301 = vmatpush.bf16.msra.mxu1 %v1981_v42 }
 0x119   : > { %1314 = vmatpush.bf16.msra.mxu2 %v1989_v44 }
 0x11b   : > { %1289 = vmatpush.bf16.msra.mxu0 %v1972_v47  ;;  %v1079_v55 = vld.sshfl [vmem:[#allocation1] sm:$0xff pattern:$0x73625140]  ;;  %v1080_v56 = vld.sshfl [vmem:[#allocation1 + $0x8] sm:$0xff pattern:$0x73625140] }
 0x11c   : > { %1302 = vmatpush.bf16.msra.mxu1 %v1980_v48  ;;  %v1081_v58 = vld.sshfl [vmem:[#allocation1 + $0x10] sm:$0xff pattern:$0x73625140]  ;;  %v1085_v15 = vpack.c.bf16 %v1079_v55, %v1079_v55  ;;  %v1086_v59 = vpack.c.bf16 %v1080_v56, %v1080_v56 }
 0x11d   : > { %1315 = vmatpush.bf16.msra.mxu2 %v1988_v49  ;;  %v1087_v18 = vpack.c.bf16 %v1081_v58, %v1081_v58 }
 0x11f   : > { %1290 = vmatpush.bf16.msra.mxu0 %v1971_v50 }
 0x120   : > { %1303 = vmatpush.bf16.msra.mxu1 %v1979_v51 }
 0x121   : > { %1316 = vmatpush.bf16.msra.mxu2 %v1987_v52 }
 0x123   : > { %1291 = vmatpush.bf16.msra.mxu0 %v1970_v53 }
 0x124   : > { %1304 = vmatpush.bf16.msra.mxu1 %v1978_v54 }
 0x125   : > { %1317 = vmatpush.bf16.msra.mxu2 %v1986_v57 }
 0x126   : > { %1292 = vmatmul.bf16.vlgmr.msra.gmra.mxu0 %v1085_v15 }
 0x127   : > { %1305 = vmatmul.bf16.vlgmr.msra.gmra.mxu1 %v1086_v59 }
 0x128   : > { %1318 = vmatmul.bf16.vlgmr.msra.gmra.mxu2 %v1087_v18 }
 0x1a3   : > { %v1293_v14 = vpop.f32.mrf.mxu0 }
 0x1a4   : > { %v1306_v61 = vpop.f32.mrf.mxu1  ;;  %v1294_v17 = vadd.f32 %v2011_v60, %v1293_v14 }
 0x1a6   : > { %v1307_v62 = vadd.f32 %v1306_v61, %v1294_v17 }
 0x1ab   : > { %v1319_v63 = vpop.f32.mrf.mxu2  ;;  %v1295_v1 = vpop.f32.mrf.mxu0 }
 0x1ac   : > { %v1320_v0 = vadd.f32 %v1319_v63, %v1307_v62  ;;  %v1308_v2 = vpop.f32.mrf.mxu1 }
 0x1ae   : > { %1323 = vst [vmem:[#allocation3] sm:$0x3] %v1320_v0 }
 0x1b3   : > { %v1321_v3 = vpop.f32.mrf.mxu2 }
 0x1b4 PF: > { %p1999_p7 = scmp.eq.s32.totalorder %s2090_s19, 1  ;;  %s2053_s12 = smov [#allocation3]  }
 0x1b5   : > { %s1330_s13 = sshll.u32 %s2053_s12, 4  ;;  %s1332_s16 = sshll.u32 %s2420_s5, 4  ;;  %s1331_s13 = int_to_ptr.vmem [resolvable:$true] %s1330_s13  ;;  %s1333_s16 = int_to_ptr.hbm [resolvable:$true] %s1332_s16 }
 0x1b6   : > { %1996 = dma.vmem_to_hbm [thread:$0]  (%p1999_p7), %s1331_s13, 32, %s1333_s16, [#allocation4]  }
 0x1b7   : > { %2045 = dma.done.wait (%p1999_p7), [#allocation4], 32  }
 0x1b8   : > { %2047 = vsyncadd (%p1999_p7), [#allocation4], 4294967264 }
 0x1b9 PF: > { %s16_s18 = sadd.s32 1, %s2050_s18  }
 0x1ba   : > { %p13_p8 = scmp.ge.s32.totalorder %s16_s18, 4  }
 0x1bc   :  { %15 = sbr.rel (!%p13_p8) target bundleno = 1 (0x1), region = 78 }
 0x1c1   :  { %1346 = vsyncpa [#allocation4], 1 }
 0x1c2   :  { %1348 = vsyncpa [#allocation4 + $0x1], 1 }

</bundles_post_ra>
